<compile_context>
chip_gen: v5e
topology: v5e:2x2
jax: 0.10.0
libtpu: 0.0.40
codegen_flags: <defaults>
</compile_context>

<pallas_src>
import functools

import jax
import jax.numpy as jnp
import numpy as np
from jax.experimental import pallas as pl
from jax.experimental.pallas import tpu as pltpu


def _round_up(a, b):
    return (a + b - 1) // b * b


def _cdiv(a, b):
    return -(-a // b)


def _vmem_capacity_bytes():
    # Generation-aware: 128 MiB on v5e/v6e, 64 MiB per TensorCore on v7x.
    try:
        return int(pltpu.get_tpu_info().vmem_capacity_bytes)
    except Exception:
        return 64 << 20  # conservative (v7x-sized) default


def _vmem_budget(vmem_capacity):
    # Scoped-VMEM budget: generous on 128 MiB parts, ~28 MiB on 64 MiB parts
    # so the compiler keeps headroom for its internal scratch.
    return min(int(0.45 * vmem_capacity), 56 << 20)


def _scoped_vmem_limit(per_step_bytes, vmem_capacity):
    # 2x for double-buffering, 2x headroom, +2 MiB slack; capped by the budget.
    need = 4 * per_step_bytes + (2 << 20)
    return int(min(_vmem_budget(vmem_capacity), max(16 << 20, need)))


# ---------------------------------------------------------------------------
# Phase 1a (fast path): fused in-VMEM im2col + conv matmul + partial BN stats
# ---------------------------------------------------------------------------
def _fused_conv_stats_kernel(x_ref, w_ref, conv_ref, psum_ref, psumsq_ref, *,
                             kh_taps, kw_taps, ho, wo):
    # x_ref   : (1, Hp, Wp, Cin)  padded NHWC image slab for one batch element
    # w_ref   : (K, Cout)         reshaped conv weight (resident across steps)
    # conv_ref: (1, Ho*Wo, Cout)  conv output tile (stored in matmul dtype)
    # psum/psumsq: (1, 1, Cout)   per-step partial sum / sum of squares (f32)
    taps = []
    for kh in range(kh_taps):
        for kw in range(kw_taps):
            taps.append(x_ref[0, kh:kh + ho, kw:kw + wo, :])     # (Ho, Wo, Cin)
    # (Ho, Wo, KH*KW*Cin) -> (Ho*Wo, K); lane dim (K) is kept by the reshape.
    patches = jnp.concatenate(taps, axis=-1).reshape(ho * wo, -1)
    acc = jnp.dot(patches, w_ref[...], preferred_element_type=jnp.float32)
    cout = acc.shape[-1]
    conv_ref[...] = acc.reshape(1, ho * wo, cout).astype(conv_ref.dtype)
    psum_ref[...] = jnp.sum(acc, axis=0).reshape(1, 1, cout)
    psumsq_ref[...] = jnp.sum(acc * acc, axis=0).reshape(1, 1, cout)


# ---------------------------------------------------------------------------
# Phase 1b (fallback): conv matmul over wrapper-side im2col patches + stats
# ---------------------------------------------------------------------------
def _im2col_conv_stats_kernel(p_ref, w_ref, conv_ref, psum_ref, psumsq_ref):
    # p_ref: (tile_m, K) patch tile; w_ref: (K, Cout); conv_ref: (tile_m, Cout)
    acc = jnp.dot(p_ref[...], w_ref[...], preferred_element_type=jnp.float32)
    cout = acc.shape[-1]
    conv_ref[...] = acc.astype(conv_ref.dtype)
    psum_ref[...] = jnp.sum(acc, axis=0).reshape(1, 1, cout)
    psumsq_ref[...] = jnp.sum(acc * acc, axis=0).reshape(1, 1, cout)


# ---------------------------------------------------------------------------
# Phase 2: fused BN affine (precomputed scale/shift) + activation
# ---------------------------------------------------------------------------
def _bn_act_kernel(scale_ref, shift_ref, conv_ref, out_ref, *,
                   activation, negative_slope):
    # scale/shift: (1, Cout) broadcast over the tile; conv may be bf16.
    y = conv_ref[...].astype(jnp.float32) * scale_ref[...] + shift_ref[...]
    if activation == "relu":
        y = jnp.maximum(y, 0.0)
    elif activation == "leaky_relu":
        y = jnp.where(y >= 0.0, y, y * negative_slope)
    # else: identity
    out_ref[...] = y.astype(out_ref.dtype)


# ---------------------------------------------------------------------------
# Wrapper
# ---------------------------------------------------------------------------
def conv_block_forward(x_nchw, weight_oihw, bias, gamma, beta, *,
                       stride=1, padding=1, eps=1e-5, activation="relu",
                       negative_slope=0.2,              # nn.LeakyReLU(0.2)
                       matmul_dtype=jnp.bfloat16,       # bf16 on all gens
                       tile_m=None, out_layout="NCHW", force_im2col=False):
    """ConvBlock forward (train-mode BatchNorm batch statistics).

    x_nchw: (N, Cin, H, W) f32.  Returns (N, Cout, Ho, Wo) f32 (or NHWC).
    matmul_dtype: MXU operand + conv-intermediate storage dtype; accumulation,
      BN statistics and the BN/activation epilogue are always f32.
    """
    del bias  # A per-channel constant is cancelled exactly by train-mode BN
    #           (mean subtraction) and does not affect the variance.

    N, Cin, H, W = x_nchw.shape
    Cout, _, KH, KW = weight_oihw.shape
    Ho = (H + 2 * padding - KH) // stride + 1
    Wo = (W + 2 * padding - KW) // stride + 1
    M = N * Ho * Wo
    K = KH * KW * Cin

    vmem_cap = _vmem_capacity_bytes()
    budget = _vmem_budget(vmem_cap)
    isz = jnp.dtype(matmul_dtype).itemsize
    sub_align = 16 if isz == 2 else 8        # bf16 packs 16 rows / vreg

    x_nhwc = jnp.transpose(x_nchw, (0, 2, 3, 1)).astype(matmul_dtype)
    xp = jnp.pad(x_nhwc,
                 ((0, 0), (padding, padding), (padding, padding), (0, 0)))
    Hp, Wp = H + 2 * padding, W + 2 * padding

    # (Cout, Cin, KH, KW) -> (KH, KW, Cin, Cout) -> (K, Cout); matches the
    # tap-major / Cin-minor ordering used when assembling patches.
    w2d = jnp.transpose(weight_oihw, (2, 3, 1, 0)).reshape(K, Cout)
    w2d = w2d.astype(matmul_dtype)

    # ---- Phase 1: conv + per-step partial BN statistics ----
    fused_step_bytes = (Hp * Wp * Cin * isz          # padded image slab
                        + K * Cout * isz             # resident weight
                        + Ho * Wo * K * isz          # in-VMEM patch assembly
                        + Ho * Wo * Cout * (isz + 4) # conv tile + f32 acc
                        + 2 * Cout * 4)
    use_fused = ((not force_im2col) and stride == 1
                 and 4 * fused_step_bytes + (4 << 20) <= budget)

    if use_fused:
        kernel = functools.partial(_fused_conv_stats_kernel,
                                   kh_taps=KH, kw_taps=KW, ho=Ho, wo=Wo)
        conv3, psum, psumsq = pl.pallas_call(
            kernel,
            grid=(N,),
            in_specs=[
                pl.BlockSpec((1, Hp, Wp, Cin), lambda n: (n, 0, 0, 0)),
                pl.BlockSpec((K, Cout), lambda n: (0, 0)),
            ],
            out_specs=(
                pl.BlockSpec((1, Ho * Wo, Cout), lambda n: (n, 0, 0)),
                pl.BlockSpec((1, 1, Cout), lambda n: (n, 0, 0)),
                pl.BlockSpec((1, 1, Cout), lambda n: (n, 0, 0)),
            ),
            out_shape=(
                jax.ShapeDtypeStruct((N, Ho * Wo, Cout), matmul_dtype),
                jax.ShapeDtypeStruct((N, 1, Cout), jnp.float32),
                jax.ShapeDtypeStruct((N, 1, Cout), jnp.float32),
            ),
            compiler_params=pltpu.CompilerParams(
                dimension_semantics=("parallel",),
                vmem_limit_bytes=_scoped_vmem_limit(fused_step_bytes, vmem_cap)),
        )(xp, w2d)
        conv_flat = conv3.reshape(M, Cout)
    else:
        # Fallback: im2col in the wrapper (KH*KW x HBM expansion of the input).
        taps = []
        for kh in range(KH):
            for kw in range(KW):
                taps.append(xp[:,
                               kh:kh + (Ho - 1) * stride + 1:stride,
                               kw:kw + (Wo - 1) * stride + 1:stride,
                               :])                               # (N, Ho, Wo, Cin)
        patches = jnp.concatenate(taps, axis=-1).reshape(M, K)

        if tile_m is None:
            row_bytes = K * isz + Cout * isz + 16
            tile_goal = max(256, min(4096, (budget // 6) // max(row_bytes, 1)))
        else:
            tile_goal = tile_m
        tile_goal = max(sub_align, min(tile_goal, _round_up(M, sub_align)))
        n_tiles = max(1, _cdiv(M, tile_goal))
        tile1 = _round_up(_cdiv(M, n_tiles), sub_align)
        M_pad = n_tiles * tile1
        if M_pad != M:
            # Zero rows are harmless: zero conv rows contribute zero to
            # sum/sumsq (no bias is added) and we divide by the true M.
            patches = jnp.pad(patches, ((0, M_pad - M), (0, 0)))

        step_bytes = (tile1 * K * isz + K * Cout * isz
                      + tile1 * Cout * (isz + 4) + 2 * Cout * 4)
        conv_flat, psum, psumsq = pl.pallas_call(
            _im2col_conv_stats_kernel,
            grid=(n_tiles,),
            in_specs=[
                pl.BlockSpec((tile1, K), lambda i: (i, 0)),
                pl.BlockSpec((K, Cout), lambda i: (0, 0)),
            ],
            out_specs=(
                pl.BlockSpec((tile1, Cout), lambda i: (i, 0)),
                pl.BlockSpec((1, 1, Cout), lambda i: (i, 0, 0)),
                pl.BlockSpec((1, 1, Cout), lambda i: (i, 0, 0)),
            ),
            out_shape=(
                jax.ShapeDtypeStruct((M_pad, Cout), matmul_dtype),
                jax.ShapeDtypeStruct((n_tiles, 1, Cout), jnp.float32),
                jax.ShapeDtypeStruct((n_tiles, 1, Cout), jnp.float32),
            ),
            compiler_params=pltpu.CompilerParams(
                dimension_semantics=("parallel",),
                vmem_limit_bytes=_scoped_vmem_limit(step_bytes, vmem_cap)),
        )(patches, w2d)

    # ---- Finalize global BN statistics (tiny (Cout,)-sized glue) ----
    sum_c = jnp.sum(psum, axis=(0, 1))                   # (Cout,)
    sumsq_c = jnp.sum(psumsq, axis=(0, 1))               # (Cout,)
    mean = sum_c / M
    var = jnp.maximum(sumsq_c / M - mean * mean, 0.0)    # clamp one-pass var
    inv_std = jax.lax.rsqrt(var + eps)
    gamma32 = gamma.astype(jnp.float32)
    scale = (gamma32 * inv_std).reshape(1, Cout)
    shift = (beta.astype(jnp.float32) - mean * gamma32 * inv_std).reshape(1, Cout)

    # ---- Phase 2: fused BN affine + activation, large dedicated M tile ----
    M1 = conv_flat.shape[0]
    row_bytes2 = Cout * (conv_flat.dtype.itemsize + 4)
    tile2_goal = max(256, min(8192, (budget // 6) // max(row_bytes2, 1)))
    tile2_goal = min(tile2_goal, _round_up(M1, sub_align))
    n2 = max(1, _cdiv(M1, tile2_goal))
    tile2 = _round_up(_cdiv(M1, n2), sub_align)
    M_pad2 = n2 * tile2
    conv_in = (conv_flat if M_pad2 == M1
               else jnp.pad(conv_flat, ((0, M_pad2 - M1), (0, 0))))

    out_dtype = jnp.float32
    # Reuse the conv intermediate's HBM buffer for the output when possible.
    aliases = {2: 0} if conv_in.dtype == out_dtype else {}
    step2 = tile2 * Cout * (conv_in.dtype.itemsize + 4) + 2 * Cout * 4

    out_flat = pl.pallas_call(
        functools.partial(_bn_act_kernel, activation=activation,
                          negative_slope=negative_slope),
        grid=(n2,),
        in_specs=[
            pl.BlockSpec((1, Cout), lambda i: (0, 0)),
            pl.BlockSpec((1, Cout), lambda i: (0, 0)),
            pl.BlockSpec((tile2, Cout), lambda i: (i, 0)),
        ],
        out_specs=pl.BlockSpec((tile2, Cout), lambda i: (i, 0)),
        out_shape=jax.ShapeDtypeStruct((M_pad2, Cout), out_dtype),
        input_output_aliases=aliases,
        compiler_params=pltpu.CompilerParams(
            dimension_semantics=("parallel",),
            vmem_limit_bytes=_scoped_vmem_limit(step2, vmem_cap)),
    )(scale, shift, conv_in)

    out_nhwc = out_flat[:M].reshape(N, Ho, Wo, Cout)
    if out_layout == "NHWC":
        return out_nhwc                       # skip the full-tensor transpose
    return jnp.transpose(out_nhwc, (0, 3, 1, 2))


# ---------------------------------------------------------------------------
# Pure-JAX reference (mirrors the PyTorch module in train mode)
# ---------------------------------------------------------------------------
def _reference(x_nchw, weight_oihw, bias, gamma, beta, *, stride, padding, eps,
               activation="relu"):
    conv = jax.lax.conv_general_dilated(
        x_nchw, weight_oihw, (stride, stride),
        [(padding, padding), (padding, padding)],
        dimension_numbers=("NCHW", "OIHW", "NCHW"))
    conv = conv + bias.reshape(1, -1, 1, 1)
    mean = conv.mean(axis=(0, 2, 3), keepdims=True)
    var = conv.var(axis=(0, 2, 3), keepdims=True)     # biased, as BN uses
    y = (conv - mean) / jnp.sqrt(var + eps)
    y = y * gamma.reshape(1, -1, 1, 1) + beta.reshape(1, -1, 1, 1)
    if activation == "relu":
        y = jnp.maximum(y, 0.0)
    elif activation == "leaky_relu":
        y = jnp.where(y >= 0.0, y, 0.2 * y)
    return y


if __name__ == "__main__":
    # ConvBlock(in_channels=4, out_channels=8, kernel_size=3, stride=1, padding=1)
    N, Cin, H, W = 2, 4, 16, 16
    Cout, KH, KW = 8, 3, 3
    stride, padding, eps = 1, 1, 1e-5

    key = jax.random.PRNGKey(0)
    kx, kw_, kb = jax.random.split(key, 3)
    x = jax.random.normal(kx, (N, Cin, H, W), dtype=jnp.float32)
    fan_in = Cin * KH * KW
    bound = 1.0 / np.sqrt(fan_in)
    weight = jax.random.uniform(kw_, (Cout, Cin, KH, KW), jnp.float32, -bound, bound)
    bias = jax.random.uniform(kb, (Cout,), jnp.float32, -bound, bound)
    gamma = jnp.ones((Cout,), jnp.float32)   # BN weight init
    beta = jnp.zeros((Cout,), jnp.float32)   # BN bias init

    ref_relu = _reference(x, weight, bias, gamma, beta,
                          stride=stride, padding=padding, eps=eps,
                          activation="relu")

    # 1) Fused in-kernel im2col, f32 MXU operands (tight tolerance).
    f32_fwd = jax.jit(functools.partial(
        conv_block_forward, stride=stride, padding=padding, eps=eps,
        activation="relu", matmul_dtype=jnp.float32))
    out = jax.block_until_ready(f32_fwd(x, weight, bias, gamma, beta))
    assert out.shape == (N, Cout, H, W), out.shape
    np.testing.assert_allclose(np.asarray(out), np.asarray(ref_relu),
                               rtol=1e-3, atol=1e-3)

    # 2) Fused path with bf16 MXU operands + bf16 conv intermediate
    #    (recommended fast path on v5e/v6e/v7x; f32 stats + f32 epilogue).
    bf16_fwd = jax.jit(functools.partial(
        conv_block_forward, stride=stride, padding=padding, eps=eps,
        activation="relu", matmul_dtype=jnp.bfloat16))
    out_bf16 = jax.block_until_ready(bf16_fwd(x, weight, bias, gamma, beta))
    np.testing.assert_allclose(np.asarray(out_bf16), np.asarray(ref_relu),
                               rtol=4e-2, atol=4e-2)

    # 3) Wrapper-im2col fallback path (used for stride != 1 or very large
    #    images); small tile exercises the cross-tile partial-stat reduction.
    fb_fwd = jax.jit(functools.partial(
        conv_block_forward, stride=stride, padding=padding, eps=eps,
        activation="relu", matmul_dtype=jnp.float32,
        force_im2col=True, tile_m=256))
    out_fb = jax.block_until_ready(fb_fwd(x, weight, bias, gamma, beta))
    np.testing.assert_allclose(np.asarray(out_fb), np.asarray(ref_relu),
                               rtol=1e-3, atol=1e-3)

    # 4) leaky_relu activation + NHWC output (skips the trailing NCHW transpose).
    ref_lrelu = _reference(x, weight, bias, gamma, beta,
                           stride=stride, padding=padding, eps=eps,
                           activation="leaky_relu")
    lr_fwd = jax.jit(functools.partial(
        conv_block_forward, stride=stride, padding=padding, eps=eps,
        activation="leaky_relu", matmul_dtype=jnp.float32, out_layout="NHWC"))
    out_lr = jax.block_until_ready(lr_fwd(x, weight, bias, gamma, beta))
    np.testing.assert_allclose(
        np.asarray(out_lr),
        np.asarray(jnp.transpose(ref_lrelu, (0, 2, 3, 1))),
        rtol=1e-3, atol=1e-3)

    print("KERNEL_OK")
</pallas_src>

<mosaic_0001>
module attributes {stable_mosaic.version = 11 : i64} {
  func.func @_fused_conv_stats_kernel(%arg0: i32, %arg1: memref<1x18x18x4xf32, #tpu.memory_space<vmem>>, %arg2: memref<36x8xf32, #tpu.memory_space<vmem>>, %arg3: memref<1x256x8xf32, #tpu.memory_space<vmem>>, %arg4: memref<1x1x8xf32, #tpu.memory_space<vmem>>, %arg5: memref<1x1x8xf32, #tpu.memory_space<vmem>>) attributes {dimension_semantics = [#tpu.dimension_semantics<parallel>], iteration_bounds = array<i64: 2>, scalar_prefetch = 0 : i64, scratch_operands = 0 : i64, tpu.core_type = #tpu.core_type<tc>, window_params = [{transform_indices = @transform_0, window_bounds = array<i64: 1, 18, 18, 4>}, {pipeline_mode = #tpu.pipeline_mode<synchronous>, transform_indices = @transform_1, window_bounds = array<i64: 36, 8>}, {transform_indices = @transform_2, window_bounds = array<i64: 1, 256, 8>}, {transform_indices = @transform_3, window_bounds = array<i64: 1, 1, 8>}, {transform_indices = @transform_4, window_bounds = array<i64: 1, 1, 8>}]} {
    %c0 = arith.constant 0 : index
    %c0_0 = arith.constant 0 : index
    %c0_1 = arith.constant 0 : index
    %c0_2 = arith.constant 0 : index
    %0 = vector.load %arg1[%c0, %c0_0, %c0_1, %c0_2] : memref<1x18x18x4xf32, #tpu.memory_space<vmem>>, vector<1x16x16x4xf32>
    %1 = vector.shape_cast %0 : vector<1x16x16x4xf32> to vector<16x16x4xf32>
    %c0_3 = arith.constant 0 : index
    %c0_4 = arith.constant 0 : index
    %c1 = arith.constant 1 : index
    %c0_5 = arith.constant 0 : index
    %2 = vector.load %arg1[%c0_3, %c0_4, %c1, %c0_5] : memref<1x18x18x4xf32, #tpu.memory_space<vmem>>, vector<1x16x16x4xf32>
    %3 = vector.shape_cast %2 : vector<1x16x16x4xf32> to vector<16x16x4xf32>
    %c0_6 = arith.constant 0 : index
    %c0_7 = arith.constant 0 : index
    %c2 = arith.constant 2 : index
    %c0_8 = arith.constant 0 : index
    %4 = vector.load %arg1[%c0_6, %c0_7, %c2, %c0_8] : memref<1x18x18x4xf32, #tpu.memory_space<vmem>>, vector<1x16x16x4xf32>
    %5 = vector.shape_cast %4 : vector<1x16x16x4xf32> to vector<16x16x4xf32>
    %c0_9 = arith.constant 0 : index
    %c1_10 = arith.constant 1 : index
    %c0_11 = arith.constant 0 : index
    %c0_12 = arith.constant 0 : index
    %6 = vector.load %arg1[%c0_9, %c1_10, %c0_11, %c0_12] : memref<1x18x18x4xf32, #tpu.memory_space<vmem>>, vector<1x16x16x4xf32>
    %7 = vector.shape_cast %6 : vector<1x16x16x4xf32> to vector<16x16x4xf32>
    %c0_13 = arith.constant 0 : index
    %c1_14 = arith.constant 1 : index
    %c1_15 = arith.constant 1 : index
    %c0_16 = arith.constant 0 : index
    %8 = vector.load %arg1[%c0_13, %c1_14, %c1_15, %c0_16] : memref<1x18x18x4xf32, #tpu.memory_space<vmem>>, vector<1x16x16x4xf32>
    %9 = vector.shape_cast %8 : vector<1x16x16x4xf32> to vector<16x16x4xf32>
    %c0_17 = arith.constant 0 : index
    %c1_18 = arith.constant 1 : index
    %c2_19 = arith.constant 2 : index
    %c0_20 = arith.constant 0 : index
    %10 = vector.load %arg1[%c0_17, %c1_18, %c2_19, %c0_20] : memref<1x18x18x4xf32, #tpu.memory_space<vmem>>, vector<1x16x16x4xf32>
    %11 = vector.shape_cast %10 : vector<1x16x16x4xf32> to vector<16x16x4xf32>
    %c0_21 = arith.constant 0 : index
    %c2_22 = arith.constant 2 : index
    %c0_23 = arith.constant 0 : index
    %c0_24 = arith.constant 0 : index
    %12 = vector.load %arg1[%c0_21, %c2_22, %c0_23, %c0_24] : memref<1x18x18x4xf32, #tpu.memory_space<vmem>>, vector<1x16x16x4xf32>
    %13 = vector.shape_cast %12 : vector<1x16x16x4xf32> to vector<16x16x4xf32>
    %c0_25 = arith.constant 0 : index
    %c2_26 = arith.constant 2 : index
    %c1_27 = arith.constant 1 : index
    %c0_28 = arith.constant 0 : index
    %14 = vector.load %arg1[%c0_25, %c2_26, %c1_27, %c0_28] : memref<1x18x18x4xf32, #tpu.memory_space<vmem>>, vector<1x16x16x4xf32>
    %15 = vector.shape_cast %14 : vector<1x16x16x4xf32> to vector<16x16x4xf32>
    %c0_29 = arith.constant 0 : index
    %c2_30 = arith.constant 2 : index
    %c2_31 = arith.constant 2 : index
    %c0_32 = arith.constant 0 : index
    %16 = vector.load %arg1[%c0_29, %c2_30, %c2_31, %c0_32] : memref<1x18x18x4xf32, #tpu.memory_space<vmem>>, vector<1x16x16x4xf32>
    %17 = vector.shape_cast %16 : vector<1x16x16x4xf32> to vector<16x16x4xf32>
    %18 = tpu.concatenate %1, %3, %5, %7, %9, %11, %13, %15, %17 in 2 : vector<16x16x4xf32>, vector<16x16x4xf32>, vector<16x16x4xf32>, vector<16x16x4xf32>, vector<16x16x4xf32>, vector<16x16x4xf32>, vector<16x16x4xf32>, vector<16x16x4xf32>, vector<16x16x4xf32> -> vector<16x16x36xf32>
    %19 = vector.shape_cast %18 : vector<16x16x36xf32> to vector<256x36xf32>
    %c0_33 = arith.constant 0 : index
    %c0_34 = arith.constant 0 : index
    %20 = vector.load %arg2[%c0_33, %c0_34] : memref<36x8xf32, #tpu.memory_space<vmem>>, vector<36x8xf32>
    %cst = arith.constant dense<0.000000e+00> : vector<256x8xf32>
    %21 = tpu.matmul %19, %20, %cst {dimension_numbers = #tpu.dot_dimension_numbers<[1], [0], [0], [1], [0, 0, 1, 1], [], []>} : vector<256x36xf32>, vector<36x8xf32>, vector<256x8xf32> -> vector<256x8xf32>
    %22 = vector.shape_cast %21 : vector<256x8xf32> to vector<1x256x8xf32>
    %c0_35 = arith.constant 0 : index
    %c0_36 = arith.constant 0 : index
    %c0_37 = arith.constant 0 : index
    %23 = vector.load %arg3[%c0_35, %c0_36, %c0_37] : memref<1x256x8xf32, #tpu.memory_space<vmem>>, vector<1x256x8xf32>
    tpu.vector_store %arg3[%c0_35, %c0_36, %c0_37], %22 {strides = array<i32>} : memref<1x256x8xf32, #tpu.memory_space<vmem>>, vector<1x256x8xf32>,
    %cst_38 = arith.constant dense<0.000000e+00> : vector<8xf32>
    %24 = vector.multi_reduction <add>, %21, %cst_38 [0] : vector<256x8xf32> to vector<8xf32>
    %25 = vector.shape_cast %24 : vector<8xf32> to vector<1x1x8xf32>
    %c0_39 = arith.constant 0 : index
    %c0_40 = arith.constant 0 : index
    %c0_41 = arith.constant 0 : index
    %26 = vector.load %arg4[%c0_39, %c0_40, %c0_41] : memref<1x1x8xf32, #tpu.memory_space<vmem>>, vector<1x1x8xf32>
    tpu.vector_store %arg4[%c0_39, %c0_40, %c0_41], %25 {strides = array<i32>} : memref<1x1x8xf32, #tpu.memory_space<vmem>>, vector<1x1x8xf32>,
    %27 = arith.mulf %21, %21 : vector<256x8xf32>
    %cst_42 = arith.constant dense<0.000000e+00> : vector<8xf32>
    %28 = vector.multi_reduction <add>, %27, %cst_42 [0] : vector<256x8xf32> to vector<8xf32>
    %29 = vector.shape_cast %28 : vector<8xf32> to vector<1x1x8xf32>
    %c0_43 = arith.constant 0 : index
    %c0_44 = arith.constant 0 : index
    %c0_45 = arith.constant 0 : index
    %30 = vector.load %arg5[%c0_43, %c0_44, %c0_45] : memref<1x1x8xf32, #tpu.memory_space<vmem>>, vector<1x1x8xf32>
    tpu.vector_store %arg5[%c0_43, %c0_44, %c0_45], %29 {strides = array<i32>} : memref<1x1x8xf32, #tpu.memory_space<vmem>>, vector<1x1x8xf32>,
    return
  }
  func.func @transform_0(%arg0: i32) -> (i32, i32, i32, i32) {
    %c0_i32 = arith.constant 0 : i32
    %c0_i32_0 = arith.constant 0 : i32
    %c0_i32_1 = arith.constant 0 : i32
    %c0_i32_2 = arith.constant 0 : i32
    return %arg0, %c0_i32, %c0_i32_0, %c0_i32_1 : i32, i32, i32, i32
  }
  func.func @transform_1(%arg0: i32) -> (i32, i32) {
    %c0_i32 = arith.constant 0 : i32
    %c0_i32_0 = arith.constant 0 : i32
    %c0_i32_1 = arith.constant 0 : i32
    return %c0_i32, %c0_i32_0 : i32, i32
  }
  func.func @transform_2(%arg0: i32) -> (i32, i32, i32) {
    %c0_i32 = arith.constant 0 : i32
    %c0_i32_0 = arith.constant 0 : i32
    %c0_i32_1 = arith.constant 0 : i32
    return %arg0, %c0_i32, %c0_i32_0 : i32, i32, i32
  }
  func.func @transform_3(%arg0: i32) -> (i32, i32, i32) {
    %c0_i32 = arith.constant 0 : i32
    %c0_i32_0 = arith.constant 0 : i32
    %c0_i32_1 = arith.constant 0 : i32
    return %arg0, %c0_i32, %c0_i32_0 : i32, i32, i32
  }
  func.func @transform_4(%arg0: i32) -> (i32, i32, i32) {
    %c0_i32 = arith.constant 0 : i32
    %c0_i32_0 = arith.constant 0 : i32
    %c0_i32_1 = arith.constant 0 : i32
    return %arg0, %c0_i32, %c0_i32_0 : i32, i32, i32
  }
}

module attributes {stable_mosaic.version = 11 : i64} {
  func.func @_bn_act_kernel(%arg0: i32, %arg1: memref<1x8xf32, #tpu.memory_space<vmem>>, %arg2: memref<1x8xf32, #tpu.memory_space<vmem>>, %arg3: memref<512x8xf32, #tpu.memory_space<vmem>>, %arg4: memref<512x8xf32, #tpu.memory_space<vmem>>) attributes {dimension_semantics = [#tpu.dimension_semantics<parallel>], iteration_bounds = array<i64: 1>, scalar_prefetch = 0 : i64, scratch_operands = 0 : i64, tpu.core_type = #tpu.core_type<tc>, window_params = [{pipeline_mode = #tpu.pipeline_mode<synchronous>, transform_indices = @transform_0, window_bounds = array<i64: 1, 8>}, {pipeline_mode = #tpu.pipeline_mode<synchronous>, transform_indices = @transform_1, window_bounds = array<i64: 1, 8>}, {transform_indices = @transform_2, window_bounds = array<i64: 512, 8>}, {transform_indices = @transform_3, window_bounds = array<i64: 512, 8>}]} {
    %c0 = arith.constant 0 : index
    %c0_0 = arith.constant 0 : index
    %0 = vector.load %arg3[%c0, %c0_0] : memref<512x8xf32, #tpu.memory_space<vmem>>, vector<512x8xf32>
    %c0_1 = arith.constant 0 : index
    %c0_2 = arith.constant 0 : index
    %1 = vector.load %arg1[%c0_1, %c0_2] : memref<1x8xf32, #tpu.memory_space<vmem>>, vector<1x8xf32>
    %2 = vector.broadcast %1 : vector<1x8xf32> to vector<512x8xf32>
    %3 = arith.mulf %0, %2 : vector<512x8xf32>
    %c0_3 = arith.constant 0 : index
    %c0_4 = arith.constant 0 : index
    %4 = vector.load %arg2[%c0_3, %c0_4] : memref<1x8xf32, #tpu.memory_space<vmem>>, vector<1x8xf32>
    %5 = vector.broadcast %4 : vector<1x8xf32> to vector<512x8xf32>
    %6 = arith.addf %3, %5 : vector<512x8xf32>
    %cst = arith.constant 0.000000e+00 : f32
    %7 = vector.broadcast %cst : f32 to vector<512x8xf32>
    %8 = arith.maximumf %6, %7 : vector<512x8xf32>
    %c0_5 = arith.constant 0 : index
    %c0_6 = arith.constant 0 : index
    %9 = vector.load %arg4[%c0_5, %c0_6] : memref<512x8xf32, #tpu.memory_space<vmem>>, vector<512x8xf32>
    tpu.vector_store %arg4[%c0_5, %c0_6], %8 {strides = array<i32>} : memref<512x8xf32, #tpu.memory_space<vmem>>, vector<512x8xf32>,
    return
  }
  func.func @transform_0(%arg0: i32) -> (i32, i32) {
    %c0_i32 = arith.constant 0 : i32
    %c0_i32_0 = arith.constant 0 : i32
    %c0_i32_1 = arith.constant 0 : i32
    return %c0_i32, %c0_i32_0 : i32, i32
  }
  func.func @transform_1(%arg0: i32) -> (i32, i32) {
    %c0_i32 = arith.constant 0 : i32
    %c0_i32_0 = arith.constant 0 : i32
    %c0_i32_1 = arith.constant 0 : i32
    return %c0_i32, %c0_i32_0 : i32, i32
  }
  func.func @transform_2(%arg0: i32) -> (i32, i32) {
    %c0_i32 = arith.constant 0 : i32
    %c0_i32_0 = arith.constant 0 : i32
    return %arg0, %c0_i32 : i32, i32
  }
  func.func @transform_3(%arg0: i32) -> (i32, i32) {
    %c0_i32 = arith.constant 0 : i32
    %c0_i32_0 = arith.constant 0 : i32
    return %arg0, %c0_i32 : i32, i32
  }
}

</mosaic_0001>

<bundles_post_ra>
// kernel: conv_block_forward.3
= control target key start
LH: loop header
LB: loop body
LE: loop exit
PB: predicated region body
PF: predicated region fallthrough
CT: control target
= control target key end

     0   :  { %vm278_vm0 = vcmask 64512   ;;  %s958_s0 = inlined_call_operand.vmem [shape: f32[1,8], index: 0, kind: input, shape index: {}]   ;;  %s959_s1 = inlined_call_operand.vmem [shape: f32[1,8], index: 1, kind: input, shape index: {}]   ;;  %s960_s2 = inlined_call_operand.vmem [shape: f32[512,8], index: 2, kind: input, shape index: {}, may-alias: {2,3}]   ;;  %s961_s3 = inlined_call_operand.vmem [shape: f32[512,8], index: 3, kind: output, shape index: {}, may-alias: {2,3}]  }
   0x1   :  { %v14_v0 = vld [vmem:[%s960_s2] sm:$0xff]  ;;  %v15_v3 = vld [vmem:[%s960_s2 + $0x8] sm:$0xff]  ;;  %v16_v6 = vld [vmem:[%s960_s2 + $0x10] sm:$0xff] }
   0x2   :  { %v375_v1 = vld [vmem:[%s958_s0] ss:$0 sm:$0xff]  ;;  %v17_v7 = vld [vmem:[%s960_s2 + $0x18] sm:$0xff]  ;;  %v19_v12 = vld [vmem:[%s960_s2 + $0x28] sm:$0xff] }
   0x3   :  { %v380_v2 = vld [vmem:[%s959_s1] ss:$0 sm:$0xff]  ;;  %v82_v4 = vmul.f32 %v375_v1, %v14_v0  ;;  %v83_v5 = vmul.f32 %v375_v1, %v15_v3  ;;  %v84_v9 = vmul.f32 %v375_v1, %v16_v6  ;;  %v85_v10 = vmul.f32 %v375_v1, %v17_v7  ;;  %v20_v13 = vld [vmem:[%s960_s2 + $0x30] sm:$0xff]  ;;  %v21_v14 = vld [vmem:[%s960_s2 + $0x38] sm:$0xff] }
   0x4   :  { %v18_v8 = vld [vmem:[%s960_s2 + $0x20] sm:$0xff]  ;;  %v87_v17 = vmul.f32 %v375_v1, %v19_v12  ;;  %v88_v18 = vmul.f32 %v375_v1, %v20_v13  ;;  %v89_v22 = vmul.f32 %v375_v1, %v21_v14  ;;  %v23_v24 = vld [vmem:[%s960_s2 + $0x48] sm:$0xff]  ;;  %v24_v29 = vld [vmem:[%s960_s2 + $0x50] sm:$0xff] }
   0x5   :  { %v86_v11 = vmul.f32 %v375_v1, %v18_v8  ;;  %v150_v15 = vadd.f32 %v380_v2, %v82_v4  ;;  %v151_v16 = vadd.f32 %v380_v2, %v83_v5  ;;  %v152_v19 = vadd.f32 %v380_v2, %v84_v9  ;;  %v22_v23 = vld [vmem:[%s960_s2 + $0x40] sm:$0xff]  ;;  %v25_v30 = vld [vmem:[%s960_s2 + $0x58] sm:$0xff]  ;;  %v27_v35 = vld [vmem:[%s960_s2 + $0x68] sm:$0xff] }
   0x6   :  { %v153_v20 = vadd.f32 %v380_v2, %v85_v10  ;;  %v155_v27 = vadd.f32 %v380_v2, %v87_v17  ;;  %v156_v28 = vadd.f32 %v380_v2, %v88_v18  ;;  %v26_v31 = vld [vmem:[%s960_s2 + $0x60] sm:$0xff]  ;;  %v157_v34 = vadd.f32 %v380_v2, %v89_v22  ;;  %v28_v36 = vld [vmem:[%s960_s2 + $0x70] sm:$0xff] }
   0x7   :  { %v154_v21 = vadd.f32 %v380_v2, %v86_v11  ;;  %v214_v25 = vmax.f32 %v150_v15, 0.0  ;;  %v215_v26 = vmax.f32 %v151_v16, 0.0  ;;  %v216_v32 = vmax.f32 %v152_v19, 0.0 }
   0x8   :  { %v217_v33 = vmax.f32 %v153_v20, 0.0  ;;  %v219_v38 = vmax.f32 %v155_v27, 0.0  ;;  %v90_v39 = vmul.f32 %v375_v1, %v22_v23  ;;  %v91_v40 = vmul.f32 %v375_v1, %v23_v24 }
   0x9   :  { %279 = vst.msk [vmem:[%s961_s3] sm:$0xff] %vm278_vm0, %v214_v25  ;;  %v218_v37 = vmax.f32 %v154_v21, 0.0  ;;  %v220_v42 = vmax.f32 %v156_v28, 0.0  ;;  %v92_v43 = vmul.f32 %v375_v1, %v24_v29  ;;  %v93_v44 = vmul.f32 %v375_v1, %v25_v30 }
   0xa   :  { %v94_v45 = vmul.f32 %v375_v1, %v26_v31  ;;  %v158_v46 = vadd.f32 %v380_v2, %v90_v39  ;;  %v159_v47 = vadd.f32 %v380_v2, %v91_v40  ;;  %v95_v48 = vmul.f32 %v375_v1, %v27_v35 }
   0xb   :  { %v96_v49 = vmul.f32 %v375_v1, %v28_v36  ;;  %v221_v50 = vmax.f32 %v157_v34, 0.0  ;;  %v160_v51 = vadd.f32 %v380_v2, %v92_v43  ;;  %v161_v52 = vadd.f32 %v380_v2, %v93_v44 }
   0xc   :  { %v222_v56 = vmax.f32 %v158_v46, 0.0  ;;  %v162_v57 = vadd.f32 %v380_v2, %v94_v45  ;;  %v223_v60 = vmax.f32 %v159_v47, 0.0  ;;  %v163_v61 = vadd.f32 %v380_v2, %v95_v48 }
   0xd   :  { %v224_v63 = vmax.f32 %v160_v51, 0.0  ;;  %v164_v0 = vadd.f32 %v380_v2, %v96_v49  ;;  %v225_v6 = vmax.f32 %v161_v52, 0.0 }
   0xe   :  { %v226_v11 = vmax.f32 %v162_v57, 0.0  ;;  %v227_v15 = vmax.f32 %v163_v61, 0.0 }
   0xf   :  { %v228_v19 = vmax.f32 %v164_v0, 0.0 }
  0x10   :  { %v29_v41 = vld [vmem:[%s960_s2 + $0x78] sm:$0xff] }
  0x11   :  { %280 = vst.msk [vmem:[%s961_s3 + $0x8] sm:$0xff] %vm278_vm0, %v215_v26  ;;  %v97_v53 = vmul.f32 %v375_v1, %v29_v41 }
  0x12   :  { %281 = vst.msk [vmem:[%s961_s3 + $0x10] sm:$0xff] %vm278_vm0, %v216_v32 }
  0x13   :  { %282 = vst.msk [vmem:[%s961_s3 + $0x18] sm:$0xff] %vm278_vm0, %v217_v33  ;;  %v165_v7 = vadd.f32 %v380_v2, %v97_v53 }
  0x15   :  { %v229_v23 = vmax.f32 %v165_v7, 0.0 }
  0x1a   :  { %v30_v54 = vld [vmem:[%s960_s2 + $0x80] sm:$0xff]  ;;  %v31_v55 = vld [vmem:[%s960_s2 + $0x88] sm:$0xff] }
  0x1b   :  { %283 = vst.msk [vmem:[%s961_s3 + $0x20] sm:$0xff] %vm278_vm0, %v218_v37  ;;  %v98_v3 = vmul.f32 %v375_v1, %v30_v54  ;;  %v99_v4 = vmul.f32 %v375_v1, %v31_v55 }
  0x1d   :  { %v166_v12 = vadd.f32 %v380_v2, %v98_v3  ;;  %v167_v16 = vadd.f32 %v380_v2, %v99_v4 }
  0x1f   :  { %v230_v27 = vmax.f32 %v166_v12, 0.0  ;;  %v231_v31 = vmax.f32 %v167_v16, 0.0 }
  0x22   :  { %v32_v58 = vld [vmem:[%s960_s2 + $0x90] sm:$0xff]  ;;  %v33_v59 = vld [vmem:[%s960_s2 + $0x98] sm:$0xff] }
  0x23   :  { %284 = vst.msk [vmem:[%s961_s3 + $0x28] sm:$0xff] %vm278_vm0, %v219_v38  ;;  %v100_v8 = vmul.f32 %v375_v1, %v32_v58  ;;  %v101_v9 = vmul.f32 %v375_v1, %v33_v59 }
  0x25   :  { %v168_v20 = vadd.f32 %v380_v2, %v100_v8  ;;  %v169_v24 = vadd.f32 %v380_v2, %v101_v9 }
  0x27   :  { %v232_v35 = vmax.f32 %v168_v20, 0.0  ;;  %v233_v39 = vmax.f32 %v169_v24, 0.0 }
  0x2a   :  { %v34_v62 = vld [vmem:[%s960_s2 + $0xa0] sm:$0xff] }
  0x2b   :  { %285 = vst.msk [vmem:[%s961_s3 + $0x30] sm:$0xff] %vm278_vm0, %v220_v42  ;;  %v102_v13 = vmul.f32 %v375_v1, %v34_v62 }
  0x2d   :  { %v170_v28 = vadd.f32 %v380_v2, %v102_v13 }
  0x2f   :  { %v234_v43 = vmax.f32 %v170_v28, 0.0 }
  0x32   :  { %v35_v5 = vld [vmem:[%s960_s2 + $0xa8] sm:$0xff] }
  0x33   :  { %286 = vst.msk [vmem:[%s961_s3 + $0x38] sm:$0xff] %vm278_vm0, %v221_v50  ;;  %v103_v17 = vmul.f32 %v375_v1, %v35_v5 }
  0x35   :  { %v171_v32 = vadd.f32 %v380_v2, %v103_v17 }
  0x37   :  { %v235_v47 = vmax.f32 %v171_v32, 0.0 }
  0x3a   :  { %v36_v10 = vld [vmem:[%s960_s2 + $0xb0] sm:$0xff] }
  0x3b   :  { %287 = vst.msk [vmem:[%s961_s3 + $0x40] sm:$0xff] %vm278_vm0, %v222_v56  ;;  %v104_v21 = vmul.f32 %v375_v1, %v36_v10 }
  0x3d   :  { %v172_v36 = vadd.f32 %v380_v2, %v104_v21 }
  0x3f   :  { %v236_v51 = vmax.f32 %v172_v36, 0.0 }
  0x42   :  { %v37_v14 = vld [vmem:[%s960_s2 + $0xb8] sm:$0xff] }
  0x43   :  { %288 = vst.msk [vmem:[%s961_s3 + $0x48] sm:$0xff] %vm278_vm0, %v223_v60  ;;  %v105_v25 = vmul.f32 %v375_v1, %v37_v14 }
  0x45   :  { %v173_v40 = vadd.f32 %v380_v2, %v105_v25 }
  0x47   :  { %v237_v55 = vmax.f32 %v173_v40, 0.0 }
  0x4a   :  { %v38_v18 = vld [vmem:[%s960_s2 + $0xc0] sm:$0xff] }
  0x4b   :  { %289 = vst.msk [vmem:[%s961_s3 + $0x50] sm:$0xff] %vm278_vm0, %v224_v63  ;;  %v106_v29 = vmul.f32 %v375_v1, %v38_v18 }
  0x4d   :  { %v174_v44 = vadd.f32 %v380_v2, %v106_v29 }
  0x4f   :  { %v238_v59 = vmax.f32 %v174_v44, 0.0 }
  0x52   :  { %v39_v22 = vld [vmem:[%s960_s2 + $0xc8] sm:$0xff] }
  0x53   :  { %290 = vst.msk [vmem:[%s961_s3 + $0x58] sm:$0xff] %vm278_vm0, %v225_v6  ;;  %v107_v33 = vmul.f32 %v375_v1, %v39_v22 }
  0x55   :  { %v175_v48 = vadd.f32 %v380_v2, %v107_v33 }
  0x57   :  { %v239_v63 = vmax.f32 %v175_v48, 0.0 }
  0x5a   :  { %v40_v26 = vld [vmem:[%s960_s2 + $0xd0] sm:$0xff] }
  0x5b   :  { %291 = vst.msk [vmem:[%s961_s3 + $0x60] sm:$0xff] %vm278_vm0, %v226_v11  ;;  %v108_v37 = vmul.f32 %v375_v1, %v40_v26 }
  0x5d   :  { %v176_v52 = vadd.f32 %v380_v2, %v108_v37 }
  0x5f   :  { %v240_v5 = vmax.f32 %v176_v52, 0.0 }
  0x62   :  { %v41_v30 = vld [vmem:[%s960_s2 + $0xd8] sm:$0xff] }
  0x63   :  { %292 = vst.msk [vmem:[%s961_s3 + $0x68] sm:$0xff] %vm278_vm0, %v227_v15  ;;  %v109_v41 = vmul.f32 %v375_v1, %v41_v30 }
  0x65   :  { %v177_v56 = vadd.f32 %v380_v2, %v109_v41 }
  0x67   :  { %v241_v9 = vmax.f32 %v177_v56, 0.0 }
  0x6a   :  { %v42_v34 = vld [vmem:[%s960_s2 + $0xe0] sm:$0xff] }
  0x6b   :  { %293 = vst.msk [vmem:[%s961_s3 + $0x70] sm:$0xff] %vm278_vm0, %v228_v19  ;;  %v110_v45 = vmul.f32 %v375_v1, %v42_v34 }
  0x6d   :  { %v178_v60 = vadd.f32 %v380_v2, %v110_v45 }
  0x6f   :  { %v242_v13 = vmax.f32 %v178_v60, 0.0 }
  0x72   :  { %v43_v38 = vld [vmem:[%s960_s2 + $0xe8] sm:$0xff] }
  0x73   :  { %294 = vst.msk [vmem:[%s961_s3 + $0x78] sm:$0xff] %vm278_vm0, %v229_v23  ;;  %v111_v49 = vmul.f32 %v375_v1, %v43_v38 }
  0x75   :  { %v179_v0 = vadd.f32 %v380_v2, %v111_v49 }
  0x77   :  { %v243_v17 = vmax.f32 %v179_v0, 0.0 }
  0x7a   :  { %v44_v42 = vld [vmem:[%s960_s2 + $0xf0] sm:$0xff] }
  0x7b   :  { %295 = vst.msk [vmem:[%s961_s3 + $0x80] sm:$0xff] %vm278_vm0, %v230_v27  ;;  %v112_v53 = vmul.f32 %v375_v1, %v44_v42 }
  0x7d   :  { %v180_v6 = vadd.f32 %v380_v2, %v112_v53 }
  0x7f   :  { %v244_v21 = vmax.f32 %v180_v6, 0.0 }
  0x82   :  { %v45_v46 = vld [vmem:[%s960_s2 + $0xf8] sm:$0xff] }
  0x83   :  { %296 = vst.msk [vmem:[%s961_s3 + $0x88] sm:$0xff] %vm278_vm0, %v231_v31  ;;  %v113_v57 = vmul.f32 %v375_v1, %v45_v46 }
  0x85   :  { %v181_v10 = vadd.f32 %v380_v2, %v113_v57 }
  0x87   :  { %v245_v25 = vmax.f32 %v181_v10, 0.0 }
  0x8a   :  { %v46_v50 = vld [vmem:[%s960_s2 + $0x100] sm:$0xff] }
  0x8b   :  { %297 = vst.msk [vmem:[%s961_s3 + $0x90] sm:$0xff] %vm278_vm0, %v232_v35  ;;  %v114_v61 = vmul.f32 %v375_v1, %v46_v50 }
  0x8d   :  { %v182_v14 = vadd.f32 %v380_v2, %v114_v61 }
  0x8f   :  { %v246_v29 = vmax.f32 %v182_v14, 0.0 }
  0x92   :  { %v47_v54 = vld [vmem:[%s960_s2 + $0x108] sm:$0xff] }
  0x93   :  { %298 = vst.msk [vmem:[%s961_s3 + $0x98] sm:$0xff] %vm278_vm0, %v233_v39  ;;  %v115_v3 = vmul.f32 %v375_v1, %v47_v54 }
  0x95   :  { %v183_v18 = vadd.f32 %v380_v2, %v115_v3 }
  0x97   :  { %v247_v33 = vmax.f32 %v183_v18, 0.0 }
  0x9a   :  { %v48_v58 = vld [vmem:[%s960_s2 + $0x110] sm:$0xff] }
  0x9b   :  { %299 = vst.msk [vmem:[%s961_s3 + $0xa0] sm:$0xff] %vm278_vm0, %v234_v43  ;;  %v116_v7 = vmul.f32 %v375_v1, %v48_v58 }
  0x9d   :  { %v184_v22 = vadd.f32 %v380_v2, %v116_v7 }
  0x9f   :  { %v248_v37 = vmax.f32 %v184_v22, 0.0 }
  0xa2   :  { %v49_v62 = vld [vmem:[%s960_s2 + $0x118] sm:$0xff] }
  0xa3   :  { %300 = vst.msk [vmem:[%s961_s3 + $0xa8] sm:$0xff] %vm278_vm0, %v235_v47  ;;  %v117_v11 = vmul.f32 %v375_v1, %v49_v62 }
  0xa5   :  { %v185_v26 = vadd.f32 %v380_v2, %v117_v11 }
  0xa7   :  { %v249_v41 = vmax.f32 %v185_v26, 0.0 }
  0xaa   :  { %v50_v4 = vld [vmem:[%s960_s2 + $0x120] sm:$0xff] }
  0xab   :  { %301 = vst.msk [vmem:[%s961_s3 + $0xb0] sm:$0xff] %vm278_vm0, %v236_v51  ;;  %v118_v15 = vmul.f32 %v375_v1, %v50_v4 }
  0xad   :  { %v186_v30 = vadd.f32 %v380_v2, %v118_v15 }
  0xaf   :  { %v250_v45 = vmax.f32 %v186_v30, 0.0 }
  0xb2   :  { %v51_v8 = vld [vmem:[%s960_s2 + $0x128] sm:$0xff] }
  0xb3   :  { %302 = vst.msk [vmem:[%s961_s3 + $0xb8] sm:$0xff] %vm278_vm0, %v237_v55  ;;  %v119_v19 = vmul.f32 %v375_v1, %v51_v8 }
  0xb5   :  { %v187_v34 = vadd.f32 %v380_v2, %v119_v19 }
  0xb7   :  { %v251_v49 = vmax.f32 %v187_v34, 0.0 }
  0xba   :  { %v52_v12 = vld [vmem:[%s960_s2 + $0x130] sm:$0xff] }
  0xbb   :  { %303 = vst.msk [vmem:[%s961_s3 + $0xc0] sm:$0xff] %vm278_vm0, %v238_v59  ;;  %v120_v23 = vmul.f32 %v375_v1, %v52_v12 }
  0xbd   :  { %v188_v38 = vadd.f32 %v380_v2, %v120_v23 }
  0xbf   :  { %v252_v53 = vmax.f32 %v188_v38, 0.0 }
  0xc2   :  { %v53_v16 = vld [vmem:[%s960_s2 + $0x138] sm:$0xff] }
  0xc3   :  { %304 = vst.msk [vmem:[%s961_s3 + $0xc8] sm:$0xff] %vm278_vm0, %v239_v63  ;;  %v121_v27 = vmul.f32 %v375_v1, %v53_v16 }
  0xc5   :  { %v189_v42 = vadd.f32 %v380_v2, %v121_v27 }
  0xc7   :  { %v253_v57 = vmax.f32 %v189_v42, 0.0 }
  0xca   :  { %v54_v20 = vld [vmem:[%s960_s2 + $0x140] sm:$0xff] }
  0xcb   :  { %305 = vst.msk [vmem:[%s961_s3 + $0xd0] sm:$0xff] %vm278_vm0, %v240_v5  ;;  %v122_v31 = vmul.f32 %v375_v1, %v54_v20 }
  0xcd   :  { %v190_v46 = vadd.f32 %v380_v2, %v122_v31 }
  0xcf   :  { %v254_v61 = vmax.f32 %v190_v46, 0.0 }
  0xd2   :  { %v55_v24 = vld [vmem:[%s960_s2 + $0x148] sm:$0xff] }
  0xd3   :  { %306 = vst.msk [vmem:[%s961_s3 + $0xd8] sm:$0xff] %vm278_vm0, %v241_v9  ;;  %v123_v35 = vmul.f32 %v375_v1, %v55_v24 }
  0xd5   :  { %v191_v50 = vadd.f32 %v380_v2, %v123_v35 }
  0xd7   :  { %v255_v4 = vmax.f32 %v191_v50, 0.0 }
  0xda   :  { %v56_v28 = vld [vmem:[%s960_s2 + $0x150] sm:$0xff] }
  0xdb   :  { %307 = vst.msk [vmem:[%s961_s3 + $0xe0] sm:$0xff] %vm278_vm0, %v242_v13  ;;  %v124_v39 = vmul.f32 %v375_v1, %v56_v28 }
  0xdd   :  { %v192_v54 = vadd.f32 %v380_v2, %v124_v39 }
  0xdf   :  { %v256_v8 = vmax.f32 %v192_v54, 0.0 }
  0xe2   :  { %v57_v32 = vld [vmem:[%s960_s2 + $0x158] sm:$0xff] }
  0xe3   :  { %308 = vst.msk [vmem:[%s961_s3 + $0xe8] sm:$0xff] %vm278_vm0, %v243_v17  ;;  %v125_v43 = vmul.f32 %v375_v1, %v57_v32 }
  0xe5   :  { %v193_v58 = vadd.f32 %v380_v2, %v125_v43 }
  0xe7   :  { %v257_v12 = vmax.f32 %v193_v58, 0.0 }
  0xea   :  { %v58_v36 = vld [vmem:[%s960_s2 + $0x160] sm:$0xff] }
  0xeb   :  { %309 = vst.msk [vmem:[%s961_s3 + $0xf0] sm:$0xff] %vm278_vm0, %v244_v21  ;;  %v126_v47 = vmul.f32 %v375_v1, %v58_v36 }
  0xed   :  { %v194_v62 = vadd.f32 %v380_v2, %v126_v47 }
  0xef   :  { %v258_v17 = vmax.f32 %v194_v62, 0.0 }
  0xf2   :  { %v59_v40 = vld [vmem:[%s960_s2 + $0x168] sm:$0xff] }
  0xf3   :  { %310 = vst.msk [vmem:[%s961_s3 + $0xf8] sm:$0xff] %vm278_vm0, %v245_v25  ;;  %v127_v51 = vmul.f32 %v375_v1, %v59_v40 }
  0xf5   :  { %v195_v5 = vadd.f32 %v380_v2, %v127_v51 }
  0xf7   :  { %v259_v21 = vmax.f32 %v195_v5, 0.0 }
  0xfa   :  { %v60_v44 = vld [vmem:[%s960_s2 + $0x170] sm:$0xff] }
  0xfb   :  { %311 = vst.msk [vmem:[%s961_s3 + $0x100] sm:$0xff] %vm278_vm0, %v246_v29  ;;  %v128_v55 = vmul.f32 %v375_v1, %v60_v44 }
  0xfd   :  { %v196_v9 = vadd.f32 %v380_v2, %v128_v55 }
  0xff   :  { %v260_v26 = vmax.f32 %v196_v9, 0.0 }
 0x102   :  { %v61_v48 = vld [vmem:[%s960_s2 + $0x178] sm:$0xff] }
 0x103   :  { %312 = vst.msk [vmem:[%s961_s3 + $0x108] sm:$0xff] %vm278_vm0, %v247_v33  ;;  %v129_v59 = vmul.f32 %v375_v1, %v61_v48 }
 0x105   :  { %v197_v13 = vadd.f32 %v380_v2, %v129_v59 }
 0x107   :  { %v261_v30 = vmax.f32 %v197_v13, 0.0 }
 0x10a   :  { %v62_v52 = vld [vmem:[%s960_s2 + $0x180] sm:$0xff] }
 0x10b   :  { %313 = vst.msk [vmem:[%s961_s3 + $0x110] sm:$0xff] %vm278_vm0, %v248_v37  ;;  %v130_v63 = vmul.f32 %v375_v1, %v62_v52 }
 0x10d   :  { %v198_v18 = vadd.f32 %v380_v2, %v130_v63 }
 0x10f   :  { %v262_v34 = vmax.f32 %v198_v18, 0.0 }
 0x112   :  { %v63_v56 = vld [vmem:[%s960_s2 + $0x188] sm:$0xff] }
 0x113   :  { %314 = vst.msk [vmem:[%s961_s3 + $0x118] sm:$0xff] %vm278_vm0, %v249_v41  ;;  %v131_v6 = vmul.f32 %v375_v1, %v63_v56 }
 0x115   :  { %v199_v22 = vadd.f32 %v380_v2, %v131_v6 }
 0x117   :  { %v263_v38 = vmax.f32 %v199_v22, 0.0 }
 0x11a   :  { %v64_v60 = vld [vmem:[%s960_s2 + $0x190] sm:$0xff] }
 0x11b   :  { %315 = vst.msk [vmem:[%s961_s3 + $0x120] sm:$0xff] %vm278_vm0, %v250_v45  ;;  %v132_v10 = vmul.f32 %v375_v1, %v64_v60 }
 0x11d   :  { %v200_v27 = vadd.f32 %v380_v2, %v132_v10 }
 0x11f   :  { %v264_v42 = vmax.f32 %v200_v27, 0.0 }
 0x122   :  { %v65_v0 = vld [vmem:[%s960_s2 + $0x198] sm:$0xff] }
 0x123   :  { %v77_v3 = vld [vmem:[%s960_s2 + $0x1f8] sm:$0xff]  ;;  %v133_v14 = vmul.f32 %v375_v1, %v65_v0 }
 0x124   :  { %316 = vst.msk [vmem:[%s961_s3 + $0x128] sm:$0xff] %vm278_vm0, %v251_v49  ;;  %v145_v16 = vmul.f32 %v375_v1, %v77_v3 }
 0x125   :  { %v201_v31 = vadd.f32 %v380_v2, %v133_v14 }
 0x126   :  { %v827_v25 = vadd.f32 %v380_v2, %v145_v16 }
 0x127   :  { %v265_v46 = vmax.f32 %v201_v31, 0.0 }
 0x12b   :  { %v66_v7 = vld [vmem:[%s960_s2 + $0x1a0] sm:$0xff] }
 0x12c   :  { %317 = vst.msk [vmem:[%s961_s3 + $0x130] sm:$0xff] %vm278_vm0, %v252_v53  ;;  %v134_v19 = vmul.f32 %v375_v1, %v66_v7  ;;  %v277_v7 = vmax.f32 %v827_v25, 0.0 }
 0x12e   :  { %v202_v35 = vadd.f32 %v380_v2, %v134_v19 }
 0x130   :  { %v266_v50 = vmax.f32 %v202_v35, 0.0 }
 0x133   :  { %v67_v11 = vld [vmem:[%s960_s2 + $0x1a8] sm:$0xff] }
 0x134   :  { %318 = vst.msk [vmem:[%s961_s3 + $0x138] sm:$0xff] %vm278_vm0, %v253_v57  ;;  %v135_v23 = vmul.f32 %v375_v1, %v67_v11 }
 0x136   :  { %v203_v39 = vadd.f32 %v380_v2, %v135_v23 }
 0x138   :  { %v267_v53 = vmax.f32 %v203_v39, 0.0 }
 0x13b   :  { %v68_v15 = vld [vmem:[%s960_s2 + $0x1b0] sm:$0xff] }
 0x13c   :  { %319 = vst.msk [vmem:[%s961_s3 + $0x140] sm:$0xff] %vm278_vm0, %v254_v61  ;;  %v136_v28 = vmul.f32 %v375_v1, %v68_v15 }
 0x13e   :  { %v204_v43 = vadd.f32 %v380_v2, %v136_v28 }
 0x140   :  { %v268_v56 = vmax.f32 %v204_v43, 0.0 }
 0x143   :  { %v69_v20 = vld [vmem:[%s960_s2 + $0x1b8] sm:$0xff] }
 0x144   :  { %320 = vst.msk [vmem:[%s961_s3 + $0x148] sm:$0xff] %vm278_vm0, %v255_v4  ;;  %v137_v32 = vmul.f32 %v375_v1, %v69_v20 }
 0x146   :  { %v205_v47 = vadd.f32 %v380_v2, %v137_v32 }
 0x148   :  { %v269_v59 = vmax.f32 %v205_v47, 0.0 }
 0x14b   :  { %v70_v24 = vld [vmem:[%s960_s2 + $0x1c0] sm:$0xff] }
 0x14c   :  { %321 = vst.msk [vmem:[%s961_s3 + $0x150] sm:$0xff] %vm278_vm0, %v256_v8  ;;  %v138_v36 = vmul.f32 %v375_v1, %v70_v24 }
 0x14e   :  { %v206_v51 = vadd.f32 %v380_v2, %v138_v36 }
 0x150   :  { %v270_v61 = vmax.f32 %v206_v51, 0.0 }
 0x153   :  { %v71_v29 = vld [vmem:[%s960_s2 + $0x1c8] sm:$0xff] }
 0x154   :  { %322 = vst.msk [vmem:[%s961_s3 + $0x158] sm:$0xff] %vm278_vm0, %v257_v12  ;;  %v139_v40 = vmul.f32 %v375_v1, %v71_v29 }
 0x156   :  { %v207_v54 = vadd.f32 %v380_v2, %v139_v40 }
 0x15b   :  { %v72_v33 = vld [vmem:[%s960_s2 + $0x1d0] sm:$0xff] }
 0x15c   :  { %323 = vst.msk [vmem:[%s961_s3 + $0x160] sm:$0xff] %vm278_vm0, %v258_v17  ;;  %v140_v44 = vmul.f32 %v375_v1, %v72_v33 }
 0x15e   :  { %v208_v57 = vadd.f32 %v380_v2, %v140_v44 }
 0x160   :  { %v272_v0 = vmax.f32 %v208_v57, 0.0 }
 0x163   :  { %v73_v37 = vld [vmem:[%s960_s2 + $0x1d8] sm:$0xff] }
 0x164   :  { %324 = vst.msk [vmem:[%s961_s3 + $0x168] sm:$0xff] %vm278_vm0, %v259_v21  ;;  %v141_v48 = vmul.f32 %v375_v1, %v73_v37 }
 0x166   :  { %v209_v60 = vadd.f32 %v380_v2, %v141_v48 }
 0x168   :  { %v273_v4 = vmax.f32 %v209_v60, 0.0 }
 0x16b   :  { %v74_v41 = vld [vmem:[%s960_s2 + $0x1e0] sm:$0xff] }
 0x16c   :  { %325 = vst.msk [vmem:[%s961_s3 + $0x170] sm:$0xff] %vm278_vm0, %v260_v26  ;;  %v142_v52 = vmul.f32 %v375_v1, %v74_v41 }
 0x16e   :  { %v210_v62 = vadd.f32 %v380_v2, %v142_v52 }
 0x170   :  { %v274_v5 = vmax.f32 %v210_v62, 0.0 }
 0x173   :  { %v75_v45 = vld [vmem:[%s960_s2 + $0x1e8] sm:$0xff] }
 0x174   :  { %326 = vst.msk [vmem:[%s961_s3 + $0x178] sm:$0xff] %vm278_vm0, %v261_v30  ;;  %v143_v55 = vmul.f32 %v375_v1, %v75_v45 }
 0x176   :  { %v211_v63 = vadd.f32 %v380_v2, %v143_v55 }
 0x178   :  { %v275_v6 = vmax.f32 %v211_v63, 0.0 }
 0x17b   :  { %v76_v49 = vld [vmem:[%s960_s2 + $0x1f0] sm:$0xff] }
 0x17c   :  { %327 = vst.msk [vmem:[%s961_s3 + $0x180] sm:$0xff] %vm278_vm0, %v262_v34  ;;  %v144_v58 = vmul.f32 %v375_v1, %v76_v49  ;;  %v271_v1 = vmax.f32 %v207_v54, 0.0 }
 0x17d   :  { %328 = vst.msk [vmem:[%s961_s3 + $0x188] sm:$0xff] %vm278_vm0, %v263_v38 }
 0x17e   :  { %329 = vst.msk [vmem:[%s961_s3 + $0x190] sm:$0xff] %vm278_vm0, %v264_v42  ;;  %v212_v3 = vadd.f32 %v380_v2, %v144_v58 }
 0x17f   :  { %330 = vst.msk [vmem:[%s961_s3 + $0x198] sm:$0xff] %vm278_vm0, %v265_v46 }
 0x180   :  { %331 = vst.msk [vmem:[%s961_s3 + $0x1a0] sm:$0xff] %vm278_vm0, %v266_v50  ;;  %v276_v2 = vmax.f32 %v212_v3, 0.0 }
 0x181   :  { %332 = vst.msk [vmem:[%s961_s3 + $0x1a8] sm:$0xff] %vm278_vm0, %v267_v53 }
 0x182   :  { %333 = vst.msk [vmem:[%s961_s3 + $0x1b0] sm:$0xff] %vm278_vm0, %v268_v56 }
 0x183   :  { %334 = vst.msk [vmem:[%s961_s3 + $0x1b8] sm:$0xff] %vm278_vm0, %v269_v59 }
 0x184   :  { %335 = vst.msk [vmem:[%s961_s3 + $0x1c0] sm:$0xff] %vm278_vm0, %v270_v61 }
 0x185   :  { %336 = vst.msk [vmem:[%s961_s3 + $0x1c8] sm:$0xff] %vm278_vm0, %v271_v1 }
 0x186   :  { %337 = vst.msk [vmem:[%s961_s3 + $0x1d0] sm:$0xff] %vm278_vm0, %v272_v0 }
 0x187   :  { %338 = vst.msk [vmem:[%s961_s3 + $0x1d8] sm:$0xff] %vm278_vm0, %v273_v4 }
 0x188   :  { %339 = vst.msk [vmem:[%s961_s3 + $0x1e0] sm:$0xff] %vm278_vm0, %v274_v5 }
 0x189   :  { %340 = vst.msk [vmem:[%s961_s3 + $0x1e8] sm:$0xff] %vm278_vm0, %v275_v6 }
 0x18a   :  { %341 = vst.msk [vmem:[%s961_s3 + $0x1f0] sm:$0xff] %vm278_vm0, %v276_v2 }
 0x18b   :  { %342 = vst.msk [vmem:[%s961_s3 + $0x1f8] sm:$0xff] %vm278_vm0, %v277_v7 }

// kernel: conv_block_forward.2
= control target key start
LH: loop header
LB: loop body
LE: loop exit
PB: predicated region body
PF: predicated region fallthrough
CT: control target
= control target key end

     0   :  { %s2638_s15 = smov 0   ;;  %s4492_s0 = inlined_call_operand.vmem [shape: f32[2,18,18,4], index: 0, kind: input, shape index: {}]   ;;  %s4493_s1 = inlined_call_operand.vmem [shape: f32[36,8], index: 1, kind: input, shape index: {}]   ;;  %s4494_s2 = inlined_call_operand.vmem [shape: f32[2,256,8], index: 2, kind: output, shape index: {0}]   ;;  %s4495_s3 = inlined_call_operand.vmem [shape: f32[2,1,8], index: 3, kind: output, shape index: {1}]   ;;  %s4496_s4 = inlined_call_operand.vmem [shape: f32[2,1,8], index: 4, kind: output, shape index: {2}]  }
   0x1 LB: > { %s2322_s16 = sadd.s32 4294967295, %s2603_s15   ;;  %p2326_p0 = scmp.ge.s32.totalorder %s2603_s15, 1  ;;  %s2603_s15 = sphi %s2638_s15, %s15_s15  }
   0x2   : > { %p167_p1 = scmp.lt.s32.totalorder %s2603_s15, 3 }
   0x4   : > { %p168_p2 = pnand %p2326_p0, %p167_p1 }
   0x6   : > { %171 = sbr.rel (%p168_p2) target bundleno = 965 (0x3c5), region = 28 }
   0xb   : > { %p199_p3 = scmp.lt.s32.totalorder %s2322_s16, 1  ;;  %s2605_s21 = smov 4   ;;  %vm1529_vm0 = vcmask 31744   ;;  %vm1562_vm1 = vcmask 64512   ;;  %vm1595_vm2 = vcmask 97280   ;;  %vm1628_vm3 = vcmask 130048  }
   0xc   : > { %s2606_s22 = smov 8   ;;  %s2607_s23 = smov 12   ;;  %vm1661_vm4 = vcmask 162816   ;;  %vm1895_vm5 = vcmask 1043456   ;;  %vm1694_vm6 = vcmask 195584   ;;  %vm1727_vm7 = vcmask 228352  }
   0xd   : > { %s4731_s16 = smov (!%p199_p3, %s2322_s16), 1  ;;  %s2608_s24 = smov 16   ;;  %vm1760_vm8 = vcmask 261120   ;;  %vm1798_vm9 = vcmask 293888   ;;  %vm2113_vm10 = vcmask 57344  }
   0xe   : > { %s2573_s17 = smul.u32 432, %s4731_s16  ;;  %s2609_s25 = smov 20  }
   0xf   : > { %s2610_s26 = smov 28   ;;  %s2611_s27 = smov 24  }
  0x10   : > { %s2652_s20 = scalar_lea.vmem %s4492_s0, %s2573_s17  ;;  %s2612_s28 = smov 32  }
  0x11   : > { %v2655_v0 = vld [vmem:[%s2652_s20 + $0x31] sm:$0xff]  ;;  %v2658_v1 = vld [vmem:[%s2652_s20 + $0x19] sm:$0xff]  ;;  %v247_v2 = vld [vmem:[%s2652_s20 + $0x1] sm:$0xff]  ;;  %s2557_s13 = sshll.u32 %s4731_s16, 8 }
  0x12   : > { %545 = vrot.lane.b32.xlu2 %v2655_v0, %s2605_s21  ;;  %541 = vrot.lane.b32.xlu1 %v2658_v1, %s2605_s21  ;;  %v2667_v3 = vld [vmem:[%s2652_s20 + $0x39] sm:$0xff]  ;;  %v2670_v4 = vld [vmem:[%s2652_s20 + $0x21] sm:$0xff]  ;;  %s4200_s18 = scalar_lea.vmem %s4494_s2, %s2557_s13 }
  0x13   : > { %537 = vrot.lane.b32.xlu0 %v247_v2, %s2605_s21  ;;  %v248_v5 = vld [vmem:[%s2652_s20 + $0x9] sm:$0xff]  ;;  %v2679_v6 = vld [vmem:[%s2652_s20 + $0x61] sm:$0xff]  ;;  %v2682_v7 = vld [vmem:[%s2652_s20 + $0x51] sm:$0xff] }
  0x14   : > { %v2685_v8 = vld [vmem:[%s2652_s20 + $0x49] sm:$0xff]  ;;  %v2694_v9 = vld [vmem:[%s2652_s20 + $0x81] sm:$0xff]  ;;  %v2697_v10 = vld [vmem:[%s2652_s20 + $0x79] sm:$0xff] }
  0x15   : > { %v2700_v11 = vld [vmem:[%s2652_s20 + $0x69] sm:$0xff]  ;;  %v2712_v13 = vld [vmem:[%s2652_s20 + $0x99] sm:$0xff]  ;;  %v2715_v14 = vld [vmem:[%s2652_s20 + $0x91] sm:$0xff] }
  0x16   : > { %v2709_v12 = vld [vmem:[%s2652_s20 + $0xa9] sm:$0xff]  ;;  %v2727_v16 = vld [vmem:[%s2652_s20 + $0xc1] sm:$0xff]  ;;  %v2730_v17 = vld [vmem:[%s2652_s20 + $0xb1] sm:$0xff] }
  0x17   : > { %v2724_v15 = vld [vmem:[%s2652_s20 + $0xc9] sm:$0xff]  ;;  %v2739_v18 = vld [vmem:[%s2652_s20 + $0xf1] sm:$0xff]  ;;  %v2742_v19 = vld [vmem:[%s2652_s20 + $0xe1] sm:$0xff] }
  0x18   : > { %v2745_v20 = vld [vmem:[%s2652_s20 + $0xd9] sm:$0xff]  ;;  %v2754_v21 = vld [vmem:[%s2652_s20 + $0x111] sm:$0xff]  ;;  %v2757_v22 = vld [vmem:[%s2652_s20 + $0x109] sm:$0xff] }
  0x19   : > { %v2760_v23 = vld [vmem:[%s2652_s20 + $0xf9] sm:$0xff]  ;;  %v2772_v25 = vld [vmem:[%s2652_s20 + $0x129] sm:$0xff]  ;;  %v2775_v26 = vld [vmem:[%s2652_s20 + $0x121] sm:$0xff] }
  0x1a   : > { %547 = vrot.lane.b32.xlu2 %v2667_v3, %s2605_s21  ;;  %543 = vrot.lane.b32.xlu1 %v2670_v4, %s2605_s21  ;;  %v2769_v24 = vld [vmem:[%s2652_s20 + $0x139] sm:$0xff]  ;;  %v2787_v28 = vld [vmem:[%s2652_s20 + $0x151] sm:$0xff] }
  0x1b   : > { %539 = vrot.lane.b32.xlu0 %v248_v5, %s2605_s21  ;;  %v2784_v27 = vld [vmem:[%s2652_s20 + $0x159] sm:$0xff]  ;;  %v2790_v29 = vld [vmem:[%s2652_s20 + $0x141] sm:$0xff]  ;;  %v2800_v31 = vld [vmem:[%s2652_s20 + $0x171] sm:$0xff] }
  0x1c   : > { %v279_v30 = vld [vmem:[%s2652_s20 + $0x2] sm:$0xff]  ;;  %v2814_v34 = vld [vmem:[%s2652_s20 + $0x1a] sm:$0xff]  ;;  %v280_v35 = vld [vmem:[%s2652_s20 + $0xa] sm:$0xff] }
  0x1d   : > { %v2803_v32 = vld [vmem:[%s2652_s20 + $0x169] sm:$0xff]  ;;  %v2828_v38 = vld [vmem:[%s2652_s20 + $0x3a] sm:$0xff]  ;;  %v2831_v39 = vld [vmem:[%s2652_s20 + $0x32] sm:$0xff] }
  0x1e   : > { %v2811_v33 = vld [vmem:[%s2652_s20 + $0x22] sm:$0xff]  ;;  %v2825_v37 = vld [vmem:[%s2652_s20 + $0x4a] sm:$0xff]  ;;  %v2848_v43 = vld [vmem:[%s2652_s20 + $0x52] sm:$0xff] }
  0x1f   : > { %v2842_v41 = vld [vmem:[%s2652_s20 + $0x6a] sm:$0xff]  ;;  %v2845_v42 = vld [vmem:[%s2652_s20 + $0x62] sm:$0xff]  ;;  %v2859_v45 = vld [vmem:[%s2652_s20 + $0x92] sm:$0xff] }
  0x20   : > { %v2862_v46 = vld [vmem:[%s2652_s20 + $0x82] sm:$0xff]  ;;  %v2865_v47 = vld [vmem:[%s2652_s20 + $0x7a] sm:$0xff]  ;;  %v2880_v51 = vld [vmem:[%s2652_s20 + $0xb2] sm:$0xff] }
  0x21   : > { %v2883_v52 = vld [vmem:[%s2652_s20 + $0xaa] sm:$0xff]  ;;  %v2886_v53 = vld [vmem:[%s2652_s20 + $0x9a] sm:$0xff]  ;;  %v2907_v59 = vld [vmem:[%s2652_s20 + $0xc2] sm:$0xff] }
  0x22   : > { %553 = vrot.lane.b32.xlu2 %v2679_v6, %s2605_s21  ;;  %551 = vrot.lane.b32.xlu1 %v2682_v7, %s2605_s21  ;;  %v2901_v57 = vld [vmem:[%s2652_s20 + $0xda] sm:$0xff]  ;;  %v2904_v58 = vld [vmem:[%s2652_s20 + $0xca] sm:$0xff] }
  0x23   : > { %549 = vrot.lane.b32.xlu0 %v2685_v8, %s2605_s21  ;;  %v2922_v63 = vld [vmem:[%s2652_s20 + $0xfa] sm:$0xff]  ;;  %v2925_v2 = vld [vmem:[%s2652_s20 + $0xf2] sm:$0xff]  ;;  %v2928_v5 = vld [vmem:[%s2652_s20 + $0xe2] sm:$0xff] }
  0x2a   : > { %559 = vrot.lane.b32.xlu2 %v2694_v9, %s2605_s21  ;;  %557 = vrot.lane.b32.xlu1 %v2697_v10, %s2605_s21 }
  0x2b   : > { %555 = vrot.lane.b32.xlu0 %v2700_v11, %s2605_s21 }
  0x32   : > { %565 = vrot.lane.b32.xlu2 %v2709_v12, %s2605_s21  ;;  %563 = vrot.lane.b32.xlu1 %v2712_v13, %s2605_s21 }
  0x33   : > { %561 = vrot.lane.b32.xlu0 %v2715_v14, %s2605_s21 }
  0x3a   : > { %571 = vrot.lane.b32.xlu2 %v2724_v15, %s2605_s21  ;;  %569 = vrot.lane.b32.xlu1 %v2727_v16, %s2605_s21 }
  0x3b   : > { %567 = vrot.lane.b32.xlu0 %v2730_v17, %s2605_s21 }
  0x42   : > { %577 = vrot.lane.b32.xlu2 %v2739_v18, %s2605_s21  ;;  %575 = vrot.lane.b32.xlu1 %v2742_v19, %s2605_s21 }
  0x43   : > { %573 = vrot.lane.b32.xlu0 %v2745_v20, %s2605_s21 }
  0x4a   : > { %583 = vrot.lane.b32.xlu2 %v2754_v21, %s2605_s21  ;;  %581 = vrot.lane.b32.xlu1 %v2757_v22, %s2605_s21 }
  0x4b   : > { %579 = vrot.lane.b32.xlu0 %v2760_v23, %s2605_s21 }
  0x52   : > { %589 = vrot.lane.b32.xlu2 %v2769_v24, %s2605_s21  ;;  %587 = vrot.lane.b32.xlu1 %v2772_v25, %s2605_s21 }
  0x53   : > { %585 = vrot.lane.b32.xlu0 %v2775_v26, %s2605_s21 }
  0x5a   : > { %595 = vrot.lane.b32.xlu2 %v2784_v27, %s2605_s21  ;;  %593 = vrot.lane.b32.xlu1 %v2787_v28, %s2605_s21 }
  0x5b   : > { %591 = vrot.lane.b32.xlu0 %v2790_v29, %s2605_s21 }
  0x62   : > { %665 = vrot.lane.b32.xlu2 %v279_v30, %s2606_s22  ;;  %599 = vrot.lane.b32.xlu1 %v2800_v31, %s2605_s21 }
  0x63   : > { %597 = vrot.lane.b32.xlu0 %v2803_v32, %s2605_s21  ;;  %s211_s21 = scalar_lea.vmem %s4495_s3, %s4731_s16 }
  0x6a   : > { %671 = vrot.lane.b32.xlu2 %v2811_v33, %s2606_s22  ;;  %669 = vrot.lane.b32.xlu1 %v2814_v34, %s2606_s22 }
  0x6b   : > { %667 = vrot.lane.b32.xlu0 %v280_v35, %s2606_s22 }
  0x6c   : > { %v2822_v36 = vpop.permute.xlu2 %545 }
  0x6d   : > { %4532 = vst [vmem:[#allocation2_spill] sm:$0xff] %v2822_v36  ;;  %v2949_v36 = vld [vmem:[%s2652_s20 + $0x10a] sm:$0xff] }
  0x72   : > { %677 = vrot.lane.b32.xlu2 %v2825_v37, %s2606_s22  ;;  %675 = vrot.lane.b32.xlu1 %v2828_v38, %s2606_s22 }
  0x73   : > { %673 = vrot.lane.b32.xlu0 %v2831_v39, %s2606_s22 }
  0x74   : > { %v2839_v40 = vpop.permute.xlu2 %547 }
  0x75   : > { %4533 = vst [vmem:[#allocation3_spill] sm:$0xff] %v2839_v40  ;;  %v2943_v40 = vld [vmem:[%s2652_s20 + $0x122] sm:$0xff] }
  0x7a   : > { %683 = vrot.lane.b32.xlu2 %v2842_v41, %s2606_s22  ;;  %681 = vrot.lane.b32.xlu1 %v2845_v42, %s2606_s22 }
  0x7b   : > { %679 = vrot.lane.b32.xlu0 %v2848_v43, %s2606_s22 }
  0x7c   : > { %v2856_v44 = vpop.permute.xlu2 %553 }
  0x7d   : > { %4534 = vst [vmem:[#allocation4_spill] sm:$0xff] %v2856_v44 }
  0x82   : > { %689 = vrot.lane.b32.xlu2 %v2859_v45, %s2606_s22  ;;  %687 = vrot.lane.b32.xlu1 %v2862_v46, %s2606_s22 }
  0x83   : > { %685 = vrot.lane.b32.xlu0 %v2865_v47, %s2606_s22 }
  0x84   : > { %v2873_v48 = vpop.permute.xlu2 %559  ;;  %v2875_v49 = vpop.permute.xlu1 %541 }
  0x85   : > { %4535 = vst [vmem:[#allocation5_spill] sm:$0xff] %v2873_v48  ;;  %v2877_v50 = vpop.permute.xlu0 %537  ;;  %v2946_v48 = vld [vmem:[%s2652_s20 + $0x112] sm:$0xff] }
  0x86   : > { %4536 = vst [vmem:[#allocation6_spill] sm:$0xff] %v2875_v49  ;;  %v2991_v49 = vld [vmem:[%s2652_s20 + $0x152] sm:$0xff] }
  0x87   : > { %4537 = vst [vmem:[#allocation7_spill] sm:$0xff] %v2877_v50 }
  0x88   : > { %4556 = vst [vmem:[#allocation26_spill] sm:$0xff] %v2991_v49 }
  0x8a   : > { %695 = vrot.lane.b32.xlu2 %v2880_v51, %s2606_s22  ;;  %693 = vrot.lane.b32.xlu1 %v2883_v52, %s2606_s22 }
  0x8b   : > { %691 = vrot.lane.b32.xlu0 %v2886_v53, %s2606_s22 }
  0x8c   : > { %v2894_v54 = vpop.permute.xlu2 %565  ;;  %v2896_v55 = vpop.permute.xlu1 %543 }
  0x8d   : > { %4538 = vst [vmem:[#allocation8_spill] sm:$0xff] %v2894_v54  ;;  %v2898_v56 = vpop.permute.xlu0 %539  ;;  %v2970_v54 = vld [vmem:[%s2652_s20 + $0x12a] sm:$0xff] }
  0x8e   : > { %4539 = vst [vmem:[#allocation9_spill] sm:$0xff] %v2896_v55 }
  0x8f   : > { %4540 = vst [vmem:[#allocation10_spill] sm:$0xff] %v2898_v56 }
  0x92   : > { %701 = vrot.lane.b32.xlu2 %v2901_v57, %s2606_s22  ;;  %699 = vrot.lane.b32.xlu1 %v2904_v58, %s2606_s22 }
  0x93   : > { %697 = vrot.lane.b32.xlu0 %v2907_v59, %s2606_s22 }
  0x94   : > { %v2915_v60 = vpop.permute.xlu2 %571  ;;  %v2917_v61 = vpop.permute.xlu1 %551 }
  0x95   : > { %4541 = vst [vmem:[#allocation11_spill] sm:$0xff] %v2915_v60  ;;  %v2919_v62 = vpop.permute.xlu0 %549  ;;  %v2967_v60 = vld [vmem:[%s2652_s20 + $0x13a] sm:$0xff] }
  0x96   : > { %4542 = vst [vmem:[#allocation12_spill] sm:$0xff] %v2917_v61  ;;  %v2988_v61 = vld [vmem:[%s2652_s20 + $0x15a] sm:$0xff] }
  0x97   : > { %4543 = vst [vmem:[#allocation13_spill] sm:$0xff] %v2919_v62 }
  0x98   : > { %4555 = vst [vmem:[#allocation25_spill] sm:$0xff] %v2988_v61 }
  0x9a   : > { %707 = vrot.lane.b32.xlu2 %v2922_v63, %s2606_s22  ;;  %705 = vrot.lane.b32.xlu1 %v2925_v2, %s2606_s22 }
  0x9b   : > { %703 = vrot.lane.b32.xlu0 %v2928_v5, %s2606_s22 }
  0x9c   : > { %v2936_v30 = vpop.permute.xlu2 %577  ;;  %v2938_v35 = vpop.permute.xlu1 %557 }
  0x9d   : > { %4544 = vst [vmem:[#allocation14_spill] sm:$0xff] %v2936_v30  ;;  %v2940_v62 = vpop.permute.xlu0 %555  ;;  %v2964_v30 = vld [vmem:[%s2652_s20 + $0x142] sm:$0xff] }
  0x9e   : > { %4545 = vst [vmem:[#allocation15_spill] sm:$0xff] %v2938_v35  ;;  %v2985_v35 = vld [vmem:[%s2652_s20 + $0x16a] sm:$0xff] }
  0x9f   : > { %4546 = vst [vmem:[#allocation16_spill] sm:$0xff] %v2940_v62 }
  0xa0   : > { %4550 = vst [vmem:[#allocation20_spill] sm:$0xff] %v2964_v30 }
  0xa1   : > { %4554 = vst [vmem:[#allocation24_spill] sm:$0xff] %v2985_v35 }
  0xa2   : > { %713 = vrot.lane.b32.xlu2 %v2943_v40, %s2606_s22  ;;  %711 = vrot.lane.b32.xlu1 %v2946_v48, %s2606_s22 }
  0xa3   : > { %709 = vrot.lane.b32.xlu0 %v2949_v36, %s2606_s22 }
  0xa4   : > { %v2957_v44 = vpop.permute.xlu2 %583  ;;  %v2959_v56 = vpop.permute.xlu1 %563 }
  0xa5   : > { %4547 = vst [vmem:[#allocation17_spill] sm:$0xff] %v2957_v44  ;;  %v2961_v50 = vpop.permute.xlu0 %561 }
  0xa6   : > { %4548 = vst [vmem:[#allocation18_spill] sm:$0xff] %v2959_v56 }
  0xa7   : > { %4549 = vst [vmem:[#allocation19_spill] sm:$0xff] %v2961_v50 }
  0xaa   : > { %719 = vrot.lane.b32.xlu2 %v2964_v30, %s2606_s22  ;;  %717 = vrot.lane.b32.xlu1 %v2967_v60, %s2606_s22  ;;  %v3006_v30 = vld [vmem:[%s2652_s20 + $0x172] sm:$0xff] }
  0xab   : > { %715 = vrot.lane.b32.xlu0 %v2970_v54, %s2606_s22  ;;  %4560 = vst [vmem:[#allocation30_spill] sm:$0xff] %v3006_v30 }
  0xac   : > { %v2978_v44 = vpop.permute.xlu2 %589  ;;  %v2980_v50 = vpop.permute.xlu1 %569 }
  0xad   : > { %4551 = vst [vmem:[#allocation21_spill] sm:$0xff] %v2978_v44  ;;  %v2982_v56 = vpop.permute.xlu0 %567 }
  0xae   : > { %4552 = vst [vmem:[#allocation22_spill] sm:$0xff] %v2980_v50  ;;  %v219_v50 = vld [vmem:[%s2652_s20 + $0x30] sm:$0xff] }
  0xaf   : > { %4553 = vst [vmem:[#allocation23_spill] sm:$0xff] %v2982_v56  ;;  %v3009_v56 = vld [vmem:[%s2652_s20 + $0x18] sm:$0xff] }
  0xb0   : > { %4561 = vst [vmem:[#allocation31_spill] sm:$0xff] %v3009_v56 }
  0xb2   : > { %725 = vrot.lane.b32.xlu2 %v2985_v35, %s2606_s22  ;;  %723 = vrot.lane.b32.xlu1 %v2988_v61, %s2606_s22  ;;  %v3012_v35 = vld [vmem:[%s2652_s20 + $0x20] sm:$0xff]  ;;  %v3028_v61 = vld [vmem:[%s2652_s20 + $0x48] sm:$0xff] }
  0xb3   : > { %721 = vrot.lane.b32.xlu0 %v2991_v49, %s2606_s22  ;;  %4562 = vst [vmem:[#allocation32_spill] sm:$0xff] %v3012_v35  ;;  %v220_v49 = vld [vmem:[%s2652_s20 + $0x38] sm:$0xff] }
  0xb4   : > { %v2999_v44 = vpop.permute.xlu2 %595  ;;  %v3001_v62 = vpop.permute.xlu1 %575  ;;  %4566 = vst [vmem:[#allocation36_spill] sm:$0xff] %v3028_v61 }
  0xb5   : > { %4557 = vst [vmem:[#allocation27_spill] sm:$0xff] %v2999_v44  ;;  %v3003_v55 = vpop.permute.xlu0 %573 }
  0xb6   : > { %4558 = vst [vmem:[#allocation28_spill] sm:$0xff] %v3001_v62 }
  0xb7   : > { %4559 = vst [vmem:[#allocation29_spill] sm:$0xff] %v3003_v55 }
  0xba   : > { %795 = vrot.lane.b32.xlu2 %v3012_v35, %s2607_s23  ;;  %793 = vrot.lane.b32.xlu1 %v3009_v56, %s2607_s23 }
  0xbb   : > { %727 = vrot.lane.b32.xlu0 %v3006_v30, %s2606_s22  ;;  %v3046_v30 = vld [vmem:[%s2652_s20 + $0x50] sm:$0xff] }
  0xbc   : > { %v3020_v44 = vpop.permute.xlu2 %665  ;;  %v3022_v55 = vpop.permute.xlu1 %581  ;;  %4571 = vst [vmem:[#allocation41_spill] sm:$0xff] %v3046_v30 }
  0xbd   : > { %4563 = vst [vmem:[#allocation33_spill] sm:$0xff] %v3020_v44  ;;  %v3024_v62 = vpop.permute.xlu0 %579 }
  0xbe   : > { %4564 = vst [vmem:[#allocation34_spill] sm:$0xff] %v3022_v55  ;;  %v3043_v55 = vld [vmem:[%s2652_s20 + $0x68] sm:$0xff] }
  0xbf   : > { %4565 = vst [vmem:[#allocation35_spill] sm:$0xff] %v3024_v62  ;;  %v223_v62 = vld [vmem:[%s2652_s20 + $0x60] sm:$0xff] }
  0xc0   : > { %4570 = vst [vmem:[#allocation40_spill] sm:$0xff] %v3043_v55 }
  0xc2   : > { %801 = vrot.lane.b32.xlu2 %v3028_v61, %s2607_s23  ;;  %799 = vrot.lane.b32.xlu1 %v220_v49, %s2607_s23 }
  0xc3   : > { %797 = vrot.lane.b32.xlu0 %v219_v50, %s2607_s23 }
  0xc4   : > { %v3035_v56 = vpop.permute.xlu2 %671  ;;  %v3037_v44 = vpop.permute.xlu1 %587 }
  0xc5   : > { %4567 = vst [vmem:[#allocation37_spill] sm:$0xff] %v3035_v56  ;;  %v3039_v35 = vpop.permute.xlu0 %585  ;;  %v3064_v56 = vld [vmem:[%s2652_s20 + $0x78] sm:$0xff] }
  0xc6   : > { %4568 = vst [vmem:[#allocation38_spill] sm:$0xff] %v3037_v44  ;;  %v3061_v44 = vld [vmem:[%s2652_s20 + $0x90] sm:$0xff] }
  0xc7   : > { %4569 = vst [vmem:[#allocation39_spill] sm:$0xff] %v3039_v35  ;;  %v226_v35 = vld [vmem:[%s2652_s20 + $0x80] sm:$0xff] }
  0xc8   : > { %4575 = vst [vmem:[#allocation45_spill] sm:$0xff] %v3061_v44 }
  0xc9   : > { %4576 = vst [vmem:[#allocation46_spill] sm:$0xff] %v3064_v56 }
  0xca   : > { %807 = vrot.lane.b32.xlu2 %v3043_v55, %s2607_s23  ;;  %805 = vrot.lane.b32.xlu1 %v223_v62, %s2607_s23  ;;  %v3081_v55 = vld [vmem:[%s2652_s20 + $0xb0] sm:$0xff] }
  0xcb   : > { %803 = vrot.lane.b32.xlu0 %v3046_v30, %s2607_s23  ;;  %v3078_v30 = vld [vmem:[%s2652_s20 + $0xa8] sm:$0xff]  ;;  %4581 = vst [vmem:[#allocation51_spill] sm:$0xff] %v3081_v55 }
  0xcc   : > { %v3053_v49 = vpop.permute.xlu2 %677  ;;  %v3055_v50 = vpop.permute.xlu1 %593  ;;  %4580 = vst [vmem:[#allocation50_spill] sm:$0xff] %v3078_v30 }
  0xcd   : > { %4572 = vst [vmem:[#allocation42_spill] sm:$0xff] %v3053_v49  ;;  %v3057_v61 = vpop.permute.xlu0 %591 }
  0xce   : > { %4573 = vst [vmem:[#allocation43_spill] sm:$0xff] %v3055_v50 }
  0xcf   : > { %4574 = vst [vmem:[#allocation44_spill] sm:$0xff] %v3057_v61  ;;  %v3084_v61 = vld [vmem:[%s2652_s20 + $0x98] sm:$0xff] }
  0xd0   : > { %4582 = vst [vmem:[#allocation52_spill] sm:$0xff] %v3084_v61 }
  0xd2   : > { %813 = vrot.lane.b32.xlu2 %v3061_v44, %s2607_s23  ;;  %811 = vrot.lane.b32.xlu1 %v226_v35, %s2607_s23  ;;  %v3105_v44 = vld [vmem:[%s2652_s20 + $0xc0] sm:$0xff] }
  0xd3   : > { %809 = vrot.lane.b32.xlu0 %v3064_v56, %s2607_s23  ;;  %4588 = vst [vmem:[#allocation58_spill] sm:$0xff] %v3105_v44 }
  0xd4   : > { %v3071_v62 = vpop.permute.xlu2 %683  ;;  %v3073_v49 = vpop.permute.xlu1 %599 }
  0xd5   : > { %4577 = vst [vmem:[#allocation47_spill] sm:$0xff] %v3071_v62  ;;  %v3075_v50 = vpop.permute.xlu0 %597  ;;  %v3102_v62 = vld [vmem:[%s2652_s20 + $0xd8] sm:$0xff] }
  0xd6   : > { %4578 = vst [vmem:[#allocation48_spill] sm:$0xff] %v3073_v49  ;;  %v3099_v49 = vld [vmem:[%s2652_s20 + $0xc8] sm:$0xff] }
  0xd7   : > { %4579 = vst [vmem:[#allocation49_spill] sm:$0xff] %v3075_v50 }
  0xd8   : > { %4586 = vst [vmem:[#allocation56_spill] sm:$0xff] %v3099_v49 }
  0xd9   : > { %4587 = vst [vmem:[#allocation57_spill] sm:$0xff] %v3102_v62 }
  0xda   : > { %819 = vrot.lane.b32.xlu2 %v3081_v55, %s2607_s23  ;;  %817 = vrot.lane.b32.xlu1 %v3078_v30, %s2607_s23  ;;  %v3126_v55 = vld [vmem:[%s2652_s20 + $0xe0] sm:$0xff] }
  0xdb   : > { %815 = vrot.lane.b32.xlu0 %v3084_v61, %s2607_s23  ;;  %v3120_v61 = vld [vmem:[%s2652_s20 + $0xf0] sm:$0xff]  ;;  %4594 = vst [vmem:[#allocation64_spill] sm:$0xff] %v3126_v55 }
  0xdc   : > { %v3092_v35 = vpop.permute.xlu2 %689  ;;  %v3094_v56 = vpop.permute.xlu1 %669  ;;  %4592 = vst [vmem:[#allocation62_spill] sm:$0xff] %v3120_v61 }
  0xdd   : > { %4583 = vst [vmem:[#allocation53_spill] sm:$0xff] %v3092_v35  ;;  %v3096_v50 = vpop.permute.xlu0 %667 }
  0xde   : > { %4584 = vst [vmem:[#allocation54_spill] sm:$0xff] %v3094_v56  ;;  %v3123_v56 = vld [vmem:[%s2652_s20 + $0xf8] sm:$0xff] }
  0xdf   : > { %4585 = vst [vmem:[#allocation55_spill] sm:$0xff] %v3096_v50 }
  0xe0   : > { %4593 = vst [vmem:[#allocation63_spill] sm:$0xff] %v3123_v56 }
  0xe2   : > { %825 = vrot.lane.b32.xlu2 %v3102_v62, %s2607_s23  ;;  %823 = vrot.lane.b32.xlu1 %v3099_v49, %s2607_s23  ;;  %v3141_v62 = vld [vmem:[%s2652_s20 + $0x110] sm:$0xff] }
  0xe3   : > { %821 = vrot.lane.b32.xlu0 %v3105_v44, %s2607_s23  ;;  %4598 = vst [vmem:[#allocation68_spill] sm:$0xff] %v3141_v62  ;;  %v3147_v44 = vld [vmem:[%s2652_s20 + $0x108] sm:$0xff] }
  0xe4   : > { %v3113_v35 = vpop.permute.xlu2 %695  ;;  %v3115_v50 = vpop.permute.xlu1 %675  ;;  %4600 = vst [vmem:[#allocation70_spill] sm:$0xff] %v3147_v44 }
  0xe5   : > { %4589 = vst [vmem:[#allocation59_spill] sm:$0xff] %v3113_v35  ;;  %v3117_v30 = vpop.permute.xlu0 %673  ;;  %v3144_v35 = vld [vmem:[%s2652_s20 + $0x120] sm:$0xff] }
  0xe6   : > { %4590 = vst [vmem:[#allocation60_spill] sm:$0xff] %v3115_v50 }
  0xe7   : > { %4591 = vst [vmem:[#allocation61_spill] sm:$0xff] %v3117_v30 }
  0xe8   : > { %4599 = vst [vmem:[#allocation69_spill] sm:$0xff] %v3144_v35 }
  0xea   : > { %831 = vrot.lane.b32.xlu2 %v3123_v56, %s2607_s23  ;;  %829 = vrot.lane.b32.xlu1 %v3120_v61, %s2607_s23 }
  0xeb   : > { %827 = vrot.lane.b32.xlu0 %v3126_v55, %s2607_s23  ;;  %v3168_v55 = vld [vmem:[%s2652_s20 + $0x128] sm:$0xff] }
  0xec   : > { %v3134_v50 = vpop.permute.xlu2 %701  ;;  %v3136_v30 = vpop.permute.xlu1 %681  ;;  %4606 = vst [vmem:[#allocation76_spill] sm:$0xff] %v3168_v55 }
  0xed   : > { %4595 = vst [vmem:[#allocation65_spill] sm:$0xff] %v3134_v50  ;;  %v3138_v49 = vpop.permute.xlu0 %679  ;;  %v3165_v50 = vld [vmem:[%s2652_s20 + $0x140] sm:$0xff] }
  0xee   : > { %4596 = vst [vmem:[#allocation66_spill] sm:$0xff] %v3136_v30 }
  0xef   : > { %4597 = vst [vmem:[#allocation67_spill] sm:$0xff] %v3138_v49  ;;  %v3162_v49 = vld [vmem:[%s2652_s20 + $0x138] sm:$0xff] }
  0xf0   : > { %4604 = vst [vmem:[#allocation74_spill] sm:$0xff] %v3162_v49 }
  0xf1   : > { %4605 = vst [vmem:[#allocation75_spill] sm:$0xff] %v3165_v50 }
  0xf2   : > { %837 = vrot.lane.b32.xlu2 %v3144_v35, %s2607_s23  ;;  %835 = vrot.lane.b32.xlu1 %v3141_v62, %s2607_s23  ;;  %v3186_v35 = vld [vmem:[%s2652_s20 + $0x168] sm:$0xff] }
  0xf3   : > { %833 = vrot.lane.b32.xlu0 %v3147_v44, %s2607_s23  ;;  %4611 = vst [vmem:[#allocation81_spill] sm:$0xff] %v3186_v35  ;;  %v3189_v44 = vld [vmem:[%s2652_s20 + $0x150] sm:$0xff] }
  0xf4   : > { %v3155_v30 = vpop.permute.xlu2 %707  ;;  %v3157_v61 = vpop.permute.xlu1 %687  ;;  %4612 = vst [vmem:[#allocation82_spill] sm:$0xff] %v3189_v44 }
  0xf5   : > { %4601 = vst [vmem:[#allocation71_spill] sm:$0xff] %v3155_v30  ;;  %v3159_v56 = vpop.permute.xlu0 %685  ;;  %v3183_v30 = vld [vmem:[%s2652_s20 + $0x158] sm:$0xff] }
  0xf6   : > { %4602 = vst [vmem:[#allocation72_spill] sm:$0xff] %v3157_v61 }
  0xf7   : > { %4603 = vst [vmem:[#allocation73_spill] sm:$0xff] %v3159_v56 }
  0xf8   : > { %4610 = vst [vmem:[#allocation80_spill] sm:$0xff] %v3183_v30 }
  0xfa   : > { %843 = vrot.lane.b32.xlu2 %v3165_v50, %s2607_s23  ;;  %841 = vrot.lane.b32.xlu1 %v3162_v49, %s2607_s23  ;;  %v2361_v50 = vld [vmem:[%s2652_s20 + $0x188] sm:$0xff] }
  0xfb   : > { %839 = vrot.lane.b32.xlu0 %v3168_v55, %s2607_s23  ;;  %v3206_v55 = vld [vmem:[%s2652_s20 + $0x170] sm:$0xff] }
  0xfc   : > { %v3176_v61 = vpop.permute.xlu2 %713  ;;  %v3178_v62 = vpop.permute.xlu1 %693 }
  0xfd   : > { %4607 = vst [vmem:[#allocation77_spill] sm:$0xff] %v3176_v61  ;;  %v3180_v56 = vpop.permute.xlu0 %691  ;;  %v2360_v61 = vld [vmem:[%s2652_s20 + $0x180] sm:$0xff] }
  0xfe   : > { %4608 = vst [vmem:[#allocation78_spill] sm:$0xff] %v3178_v62 }
  0xff   : > { %4609 = vst [vmem:[#allocation79_spill] sm:$0xff] %v3180_v56 }
 0x102   : > { %849 = vrot.lane.b32.xlu2 %v3186_v35, %s2607_s23  ;;  %847 = vrot.lane.b32.xlu1 %v3183_v30, %s2607_s23 }
 0x103   : > { %845 = vrot.lane.b32.xlu0 %v3189_v44, %s2607_s23 }
 0x104   : > { %v3197_v49 = vpop.permute.xlu2 %719  ;;  %v3199_v62 = vpop.permute.xlu1 %699 }
 0x105   : > { %4613 = vst [vmem:[#allocation83_spill] sm:$0xff] %v3199_v62  ;;  %v3201_v56 = vpop.permute.xlu0 %697 }
 0x10a   : > { %855 = vrot.lane.b32.xlu2 %v2361_v50, %s2607_s23  ;;  %853 = vrot.lane.b32.xlu1 %v2360_v61, %s2607_s23 }
 0x10b   : > { %851 = vrot.lane.b32.xlu0 %v3206_v55, %s2607_s23 }
 0x10c   : > { %v3212_v30 = vpop.permute.xlu2 %725  ;;  %v3214_v44 = vpop.permute.xlu1 %705 }
 0x10d   : > { %v3216_v35 = vpop.permute.xlu0 %703 }
 0x112   : > { %925 = vrot.lane.b32.xlu2 %v2655_v0, %s2608_s24  ;;  %923 = vrot.lane.b32.xlu1 %v2670_v4, %s2608_s24 }
 0x113   : > { %921 = vrot.lane.b32.xlu0 %v2658_v1, %s2608_s24 }
 0x114   : > { %v3224_v61 = vpop.permute.xlu2 %795  ;;  %v3226_v50 = vpop.permute.xlu1 %711 }
 0x115   : > { %4614 = vst [vmem:[#allocation84_spill] sm:$0xff] %v3224_v61  ;;  %v3228_v62 = vpop.permute.xlu0 %709 }
 0x11a   : > { %931 = vrot.lane.b32.xlu2 %v2682_v7, %s2608_s24  ;;  %929 = vrot.lane.b32.xlu1 %v2685_v8, %s2608_s24 }
 0x11b   : > { %927 = vrot.lane.b32.xlu0 %v2667_v3, %s2608_s24 }
 0x11c   : > { %v3236_v0 = vpop.permute.xlu2 %801  ;;  %v3238_v4 = vpop.permute.xlu1 %717 }
 0x11d   : > { %4615 = vst [vmem:[#allocation85_spill] sm:$0xff] %v3236_v0  ;;  %v3240_v1 = vpop.permute.xlu0 %715 }
 0x122   : > { %937 = vrot.lane.b32.xlu2 %v2697_v10, %s2608_s24  ;;  %935 = vrot.lane.b32.xlu1 %v2700_v11, %s2608_s24 }
 0x123   : > { %933 = vrot.lane.b32.xlu0 %v2679_v6, %s2608_s24 }
 0x124   : > { %v3248_v7 = vpop.permute.xlu2 %807  ;;  %v3250_v8 = vpop.permute.xlu1 %723 }
 0x125   : > { %v3252_v3 = vpop.permute.xlu0 %721 }
 0x12a   : > { %943 = vrot.lane.b32.xlu2 %v2712_v13, %s2608_s24  ;;  %941 = vrot.lane.b32.xlu1 %v2715_v14, %s2608_s24 }
 0x12b   : > { %939 = vrot.lane.b32.xlu0 %v2694_v9, %s2608_s24 }
 0x12c   : > { %v3260_v10 = vpop.permute.xlu2 %813  ;;  %v3262_v11 = vpop.permute.xlu1 %793 }
 0x12d   : > { %v3264_v6 = vpop.permute.xlu0 %727 }
 0x132   : > { %949 = vrot.lane.b32.xlu2 %v2727_v16, %s2608_s24  ;;  %947 = vrot.lane.b32.xlu1 %v2730_v17, %s2608_s24 }
 0x133   : > { %945 = vrot.lane.b32.xlu0 %v2709_v12, %s2608_s24 }
 0x134   : > { %v3272_v13 = vpop.permute.xlu2 %819  ;;  %v3274_v14 = vpop.permute.xlu1 %799 }
 0x135   : > { %v3276_v9 = vpop.permute.xlu0 %797 }
 0x13a   : > { %955 = vrot.lane.b32.xlu2 %v2742_v19, %s2608_s24  ;;  %953 = vrot.lane.b32.xlu1 %v2745_v20, %s2608_s24 }
 0x13b   : > { %951 = vrot.lane.b32.xlu0 %v2724_v15, %s2608_s24 }
 0x13c   : > { %v3284_v16 = vpop.permute.xlu2 %825  ;;  %v3286_v17 = vpop.permute.xlu1 %805 }
 0x13d   : > { %4616 = vst [vmem:[#allocation86_spill] sm:$0xff] %v3286_v17  ;;  %v3288_v12 = vpop.permute.xlu0 %803  ;;  %v2393_v17 = vld [vmem:[%s2652_s20 + $0x189] sm:$0xff] }
 0x13e   : > { %4617 = vst [vmem:[#allocation87_spill] sm:$0xff] %v3288_v12 }
 0x142   : > { %961 = vrot.lane.b32.xlu2 %v2757_v22, %s2608_s24  ;;  %959 = vrot.lane.b32.xlu1 %v2760_v23, %s2608_s24 }
 0x143   : > { %957 = vrot.lane.b32.xlu0 %v2739_v18, %s2608_s24 }
 0x144   : > { %v3296_v19 = vpop.permute.xlu2 %831  ;;  %v3298_v20 = vpop.permute.xlu1 %811 }
 0x145   : > { %v3300_v15 = vpop.permute.xlu0 %809 }
 0x146   : > { %4618 = vst [vmem:[#allocation88_spill] sm:$0xff] %v3300_v15  ;;  %v4649_v15 = vld [vmem:[#allocation32_spill] sm:$0xff] }
 0x14a   : > { %967 = vrot.lane.b32.xlu2 %v2772_v25, %s2608_s24  ;;  %965 = vrot.lane.b32.xlu1 %v2775_v26, %s2608_s24 }
 0x14b   : > { %963 = vrot.lane.b32.xlu0 %v2754_v21, %s2608_s24 }
 0x14c   : > { %v3308_v22 = vpop.permute.xlu2 %837  ;;  %v3310_v18 = vpop.permute.xlu1 %817 }
 0x14d   : > { %4619 = vst [vmem:[#allocation89_spill] sm:$0xff] %v3310_v18  ;;  %v3312_v23 = vpop.permute.xlu0 %815  ;;  %v2392_v18 = vld [vmem:[%s2652_s20 + $0x181] sm:$0xff] }
 0x14e   : > { %4620 = vst [vmem:[#allocation90_spill] sm:$0xff] %v3312_v23 }
 0x152   : > { %973 = vrot.lane.b32.xlu2 %v2787_v28, %s2608_s24  ;;  %971 = vrot.lane.b32.xlu1 %v2790_v29, %s2608_s24 }
 0x153   : > { %969 = vrot.lane.b32.xlu0 %v2769_v24, %s2608_s24 }
 0x154   : > { %v3320_v25 = vpop.permute.xlu2 %843  ;;  %v3322_v21 = vpop.permute.xlu1 %823 }
 0x155   : > { %v3324_v26 = vpop.permute.xlu0 %821 }
 0x15a   : > { %979 = vrot.lane.b32.xlu2 %v2800_v31, %s2608_s24  ;;  %977 = vrot.lane.b32.xlu1 %v2803_v32, %s2608_s24 }
 0x15b   : > { %975 = vrot.lane.b32.xlu0 %v2784_v27, %s2608_s24 }
 0x15c   : > { %v3332_v28 = vpop.permute.xlu2 %849  ;;  %v3334_v29 = vpop.permute.xlu1 %829 }
 0x15d   : > { %v3336_v24 = vpop.permute.xlu0 %827 }
 0x162   : > { %1049 = vrot.lane.b32.xlu2 %v2814_v34, %s2609_s25  ;;  %983 = vrot.lane.b32.xlu1 %v2393_v17, %s2608_s24 }
 0x163   : > { %981 = vrot.lane.b32.xlu0 %v2392_v18, %s2608_s24  ;;  %s214_s24 = scalar_lea.vmem %s4496_s4, %s4731_s16 }
 0x164   : > { %v3344_v31 = vpop.permute.xlu2 %855  ;;  %v3346_v32 = vpop.permute.xlu1 %835 }
 0x165   : > { %v3348_v27 = vpop.permute.xlu0 %833 }
 0x16a   : > { %1055 = vrot.lane.b32.xlu2 %v2828_v38, %s2609_s25  ;;  %1053 = vrot.lane.b32.xlu1 %v2831_v39, %s2609_s25 }
 0x16b   : > { %1051 = vrot.lane.b32.xlu0 %v2811_v33, %s2609_s25 }
 0x16c   : > { %v3356_v34 = vpop.permute.xlu2 %925  ;;  %v3358_v17 = vpop.permute.xlu1 %841 }
 0x16d   : > { %v3360_v18 = vpop.permute.xlu0 %839 }
 0x172   : > { %1061 = vrot.lane.b32.xlu2 %v2845_v42, %s2609_s25  ;;  %1059 = vrot.lane.b32.xlu1 %v2848_v43, %s2609_s25 }
 0x173   : > { %1057 = vrot.lane.b32.xlu0 %v2825_v37, %s2609_s25 }
 0x174   : > { %v3368_v38 = vpop.permute.xlu2 %931  ;;  %v3370_v39 = vpop.permute.xlu1 %847 }
 0x175   : > { %4621 = vst [vmem:[#allocation91_spill] sm:$0xff] %v3368_v38  ;;  %v3372_v33 = vpop.permute.xlu0 %845  ;;  %v4629_v38 = vld [vmem:[#allocation58_spill] sm:$0xff] }
 0x17a   : > { %1067 = vrot.lane.b32.xlu2 %v2862_v46, %s2609_s25  ;;  %1065 = vrot.lane.b32.xlu1 %v2865_v47, %s2609_s25 }
 0x17b   : > { %1063 = vrot.lane.b32.xlu0 %v2842_v41, %s2609_s25 }
 0x17c   : > { %v3380_v42 = vpop.permute.xlu2 %937  ;;  %v3382_v43 = vpop.permute.xlu1 %853 }
 0x17d   : > { %4622 = vst [vmem:[#allocation92_spill] sm:$0xff] %v3380_v42  ;;  %v3384_v37 = vpop.permute.xlu0 %851 }
 0x182   : > { %1073 = vrot.lane.b32.xlu2 %v2883_v52, %s2609_s25  ;;  %1071 = vrot.lane.b32.xlu1 %v2886_v53, %s2609_s25 }
 0x183   : > { %1069 = vrot.lane.b32.xlu0 %v2859_v45, %s2609_s25 }
 0x184   : > { %v3392_v46 = vpop.permute.xlu2 %943  ;;  %v3394_v47 = vpop.permute.xlu1 %923 }
 0x185   : > { %4623 = vst [vmem:[#allocation93_spill] sm:$0xff] %v3392_v46  ;;  %v3396_v41 = vpop.permute.xlu0 %921  ;;  %v4633_v46 = vld [vmem:[#allocation51_spill] sm:$0xff] }
 0x186   : > { %4624 = vst [vmem:[#allocation94_spill] sm:$0xff] %v3394_v47  ;;  %v4651_v47 = vld [vmem:[#allocation38_spill] sm:$0xff] }
 0x18a   : > { %1079 = vrot.lane.b32.xlu2 %v2904_v58, %s2609_s25  ;;  %1077 = vrot.lane.b32.xlu1 %v2907_v59, %s2609_s25 }
 0x18b   : > { %1075 = vrot.lane.b32.xlu0 %v2880_v51, %s2609_s25 }
 0x18c   : > { %v3404_v52 = vpop.permute.xlu2 %949  ;;  %v3406_v53 = vpop.permute.xlu1 %929 }
 0x18d   : > { %4625 = vst [vmem:[#allocation95_spill] sm:$0xff] %v3406_v53  ;;  %v3408_v45 = vpop.permute.xlu0 %927  ;;  %v4634_v53 = vld [vmem:[#allocation20_spill] sm:$0xff] }
 0x192   : > { %1085 = vrot.lane.b32.xlu2 %v2925_v2, %s2609_s25  ;;  %1083 = vrot.lane.b32.xlu1 %v2928_v5, %s2609_s25 }
 0x193   : > { %1081 = vrot.lane.b32.xlu0 %v2901_v57, %s2609_s25 }
 0x194   : > { %v3416_v58 = vpop.permute.xlu2 %955  ;;  %v3418_v59 = vpop.permute.xlu1 %935 }
 0x195   : > { %v3420_v51 = vpop.permute.xlu0 %933 }
 0x196   : > { %4626 = vst [vmem:[#allocation96_spill] sm:$0xff] %v3420_v51  ;;  %v4628_v51 = vld [vmem:[#allocation22_spill] sm:$0xff] }
 0x197   : > { %v1546_v12 = vsel %vm1529_vm0, %v4629_v38, %v4628_v51  ;;  %v4635_v38 = vld [vmem:[#allocation59_spill] sm:$0xff] }
 0x19a   : > { %1091 = vrot.lane.b32.xlu2 %v2946_v48, %s2609_s25  ;;  %1089 = vrot.lane.b32.xlu1 %v2949_v36, %s2609_s25 }
 0x19b   : > { %1087 = vrot.lane.b32.xlu0 %v2922_v63, %s2609_s25 }
 0x19c   : > { %v3428_v2 = vpop.permute.xlu2 %961  ;;  %v3430_v5 = vpop.permute.xlu1 %941 }
 0x19d   : > { %v3432_v57 = vpop.permute.xlu0 %939 }
 0x1a2   : > { %1097 = vrot.lane.b32.xlu2 %v2967_v60, %s2609_s25  ;;  %1095 = vrot.lane.b32.xlu1 %v2970_v54, %s2609_s25  ;;  %v4630_v60 = vld [vmem:[#allocation25_spill] sm:$0xff]  ;;  %v4631_v54 = vld [vmem:[#allocation26_spill] sm:$0xff] }
 0x1a3   : > { %1093 = vrot.lane.b32.xlu0 %v2943_v40, %s2609_s25  ;;  %v4632_v40 = vld [vmem:[#allocation23_spill] sm:$0xff] }
 0x1a4   : > { %v3440_v48 = vpop.permute.xlu2 %967  ;;  %v3442_v36 = vpop.permute.xlu1 %947  ;;  %v1545_v23 = vsel %vm1529_vm0, %v4633_v46, %v4632_v40 }
 0x1a5   : > { %v3444_v63 = vpop.permute.xlu0 %945  ;;  %v1578_v51 = vsel %vm1562_vm1, %v1545_v23, %v4635_v38  ;;  %v4637_v23 = vld [vmem:[#allocation28_spill] sm:$0xff] }
 0x1a6   : > { %4627 = vst [vmem:[#allocation97_spill] sm:$0xff] %v3444_v63  ;;  %v1579_v63 = vsel %vm1562_vm1, %v1546_v12, %v3201_v56  ;;  %v1611_v46 = vsel %vm1595_vm2, %v1578_v51, %v3322_v21  ;;  %v4638_v38 = vld [vmem:[#allocation64_spill] sm:$0xff]  ;;  %v4639_v21 = vld [vmem:[#allocation30_spill] sm:$0xff]  ;;  %v4641_v51 = vld [vmem:[#allocation57_spill] sm:$0xff] }
 0x1aa   : > { %1103 = vrot.lane.b32.xlu2 %v4630_v60, %s2609_s25  ;;  %1101 = vrot.lane.b32.xlu1 %v4631_v54, %s2609_s25  ;;  %v1612_v60 = vsel %vm1595_vm2, %v1579_v63, %v3284_v16  ;;  %v1549_v16 = vsel %vm1529_vm0, %v4638_v38, %v4637_v23  ;;  %v4640_v63 = vld [vmem:[#allocation29_spill] sm:$0xff] }
 0x1ab   : > { %1099 = vrot.lane.b32.xlu0 %v4634_v53, %s2609_s25  ;;  %v3475_v53 = vld [vmem:[%s2652_s20 + $0x182] sm:$0xff] }
 0x1ac   : > { %v3464_v0 = vpop.permute.xlu2 %973  ;;  %v954_v54 = vpop.permute.xlu1 %953  ;;  %4636 = vst [vmem:[#allocation22_spill] sm:$0xff] %v3475_v53 }
 0x1ad   : > { %v3469_v40 = vsel %vm1628_vm3, %v1612_v60, %v954_v54  ;;  %v952_v56 = vpop.permute.xlu0 %951  ;;  %v1548_v60 = vsel %vm1529_vm0, %v4641_v51, %v4640_v63  ;;  %v1582_v54 = vsel %vm1562_vm1, %v1549_v16, %v3216_v35  ;;  %v2458_v16 = vld [vmem:[%s2652_s20 + $0x31] sm:$0xff] }
 0x1ae   : > { %v3472_v12 = vsel %vm1628_vm3, %v1611_v46, %v952_v56  ;;  %v4642_v46 = vld [vmem:[#allocation24_spill] sm:$0xff]  ;;  %v4643_v56 = vld [vmem:[#allocation65_spill] sm:$0xff]  ;;  %v1615_v38 = vsel %vm1595_vm2, %v1582_v54, %v3296_v19  ;;  %v4645_v19 = vld [vmem:[#allocation34_spill] sm:$0xff] }
 0x1af   : > { %v1581_v23 = vsel %vm1562_vm1, %v1548_v60, %v4643_v56  ;;  %v2426_v60 = vld [vmem:[%s2652_s20 + $0x30] sm:$0xff]  ;;  %v4646_v54 = vld [vmem:[#allocation70_spill] sm:$0xff] }
 0x1b0   : > { %v1552_v56 = vsel %vm1529_vm0, %v4646_v54, %v4645_v19  ;;  %v2427_v19 = vld [vmem:[%s2652_s20 + $0x38] sm:$0xff] }
 0x1b1   : > { %v4648_v54 = vld [vmem:[#allocation9_spill] sm:$0xff] }
 0x1b2   : > { %1109 = vrot.lane.b32.xlu2 %v3475_v53, %s2609_s25  ;;  %1107 = vrot.lane.b32.xlu1 %v4639_v21, %s2609_s25  ;;  %v1614_v21 = vsel %vm1595_vm2, %v1581_v23, %v3334_v29  ;;  %v1585_v29 = vsel %vm1562_vm1, %v1552_v56, %v3228_v62  ;;  %v1533_v62 = vsel %vm1529_vm0, %v4649_v15, %v4648_v54  ;;  %v4650_v56 = vld [vmem:[#allocation37_spill] sm:$0xff] }
 0x1b3   : > { %1105 = vrot.lane.b32.xlu0 %v4642_v46, %s2609_s25  ;;  %v3508_v46 = vld [vmem:[%s2652_s20 + $0x18a] sm:$0xff]  ;;  %v4655_v54 = vld [vmem:[#allocation77_spill] sm:$0xff] }
 0x1b4   : > { %v3495_v53 = vpop.permute.xlu2 %979  ;;  %v960_v42 = vpop.permute.xlu1 %959  ;;  %4644 = vst [vmem:[#allocation58_spill] sm:$0xff] %v3508_v46 }
 0x1b5   : > { %v3500_v63 = vsel %vm1628_vm3, %v1615_v38, %v960_v42  ;;  %v958_v51 = vpop.permute.xlu0 %957  ;;  %v1618_v42 = vsel %vm1595_vm2, %v1585_v29, %v3308_v22  ;;  %v4652_v22 = vld [vmem:[#allocation76_spill] sm:$0xff] }
 0x1b6   : > { %v3503_v35 = vsel %vm1628_vm3, %v1614_v21, %v958_v51  ;;  %v1555_v29 = vsel %vm1529_vm0, %v4652_v22, %v4651_v47  ;;  %v4659_v22 = vld [vmem:[#allocation75_spill] sm:$0xff] }
 0x1ba   : > { %1305 = vrot.lane.b32.xlu2 %v2458_v16, %s2610_s26  ;;  %1177 = vrot.lane.b32.xlu1 %v2426_v60, %s2611_s27  ;;  %v2459_v16 = vld [vmem:[%s2652_s20 + $0x39] sm:$0xff] }
 0x1bb   : > { %1111 = vrot.lane.b32.xlu0 %v3508_v46, %s2609_s25  ;;  %v2490_v60 = vld [vmem:[%s2652_s20 + $0x32] sm:$0xff]  ;;  %v1566_v46 = vsel %vm1562_vm1, %v1533_v62, %v4650_v56 }
 0x1bc   : > { %v3521_v23 = vpop.permute.xlu2 %1049  ;;  %v966_v38 = vpop.permute.xlu1 %965  ;;  %v1599_v15 = vsel %vm1595_vm2, %v1566_v46, %v3274_v14 }
 0x1bd   : > { %4647 = vst [vmem:[#allocation25_spill] sm:$0xff] %v3521_v23  ;;  %v3524_v21 = vsel %vm1628_vm3, %v1618_v42, %v966_v38  ;;  %v3526_v51 = vpop.permute.xlu0 %963  ;;  %v4653_v42 = vld [vmem:[#allocation39_spill] sm:$0xff]  ;;  %v4654_v38 = vld [vmem:[#allocation69_spill] sm:$0xff]  ;;  %v1588_v23 = vsel %vm1562_vm1, %v1555_v29, %v3240_v1 }
 0x1be   : > { %v1554_v61 = vsel %vm1529_vm0, %v4654_v38, %v4653_v42 }
 0x1bf   : > { %v1587_v47 = vsel %vm1562_vm1, %v1554_v61, %v4655_v54 }
 0x1c0   : > { %v1620_v1 = vsel %vm1595_vm2, %v1587_v47, %v3358_v17  ;;  %v4658_v17 = vld [vmem:[#allocation44_spill] sm:$0xff] }
 0x1c1   : > { %v1557_v29 = vsel %vm1529_vm0, %v4659_v22, %v4658_v17  ;;  %v4665_v22 = vld [vmem:[#allocation81_spill] sm:$0xff] }
 0x1c2   : > { %1307 = vrot.lane.b32.xlu2 %v2459_v16, %s2610_s26  ;;  %1179 = vrot.lane.b32.xlu1 %v2427_v19, %s2611_s27  ;;  %v1621_v16 = vsel %vm1595_vm2, %v1588_v23, %v3320_v25  ;;  %v1632_v19 = vsel %vm1628_vm3, %v1599_v15, %v3408_v45  ;;  %v2491_v45 = vld [vmem:[%s2652_s20 + $0x3a] sm:$0xff]  ;;  %v1590_v42 = vsel %vm1562_vm1, %v1557_v29, %v3197_v49 }
 0x1c3   : > { %1433 = vrot.lane.b32.xlu0 %v2490_v60, %s2612_s28  ;;  %v4656_v23 = vld [vmem:[#allocation45_spill] sm:$0xff]  ;;  %v4657_v60 = vld [vmem:[#allocation36_spill] sm:$0xff]  ;;  %v1623_v54 = vsel %vm1595_vm2, %v1590_v42, %v3370_v39 }
 0x1c4   : > { %v1056_v62 = vpop.permute.xlu2 %1055  ;;  %v972_v56 = vpop.permute.xlu1 %971  ;;  %v4664_v39 = vld [vmem:[#allocation49_spill] sm:$0xff] }
 0x1c5   : > { %v3558_v14 = vsel %vm1661_vm4, %v1632_v19, %v1056_v62  ;;  %v3561_v46 = vsel %vm1628_vm3, %v1621_v16, %v972_v56  ;;  %v970_v61 = vpop.permute.xlu0 %969  ;;  %v2492_v19 = vld [vmem:[%s2652_s20 + $0x4a] sm:$0xff]  ;;  %v1560_v29 = vsel %vm1529_vm0, %v4665_v22, %v4664_v39 }
 0x1c6   : > { %v3564_v25 = vsel %vm1628_vm3, %v1620_v1, %v970_v61  ;;  %v2466_v62 = vld [vmem:[%s2652_s20 + $0x91] sm:$0xff]  ;;  %v2460_v56 = vld [vmem:[%s2652_s20 + $0x49] sm:$0xff] }
 0x1c7   : > { %v4660_v1 = vld [vmem:[#allocation16_spill] sm:$0xff] }
 0x1c8   : > { %v4661_v61 = vld [vmem:[#allocation40_spill] sm:$0xff] }
 0x1ca   : > { %1193 = vrot.lane.b32.xlu2 %v4656_v23, %s2611_s27  ;;  %1181 = vrot.lane.b32.xlu1 %v4657_v60, %s2611_s27  ;;  %v4662_v23 = vld [vmem:[#allocation47_spill] sm:$0xff]  ;;  %v4663_v60 = vld [vmem:[#allocation48_spill] sm:$0xff] }
 0x1cb   : > { %1435 = vrot.lane.b32.xlu0 %v2491_v45, %s2612_s28  ;;  %v1539_v45 = vsel %vm1529_vm0, %v4661_v61, %v4660_v1  ;;  %v1561_v17 = vsel %vm1529_vm0, %v3206_v55, %v4663_v60  ;;  %v1593_v55 = vsel %vm1562_vm1, %v1560_v29, %v3212_v30 }
 0x1cc   : > { %v3577_v38 = vpop.permute.xlu2 %1061  ;;  %v3579_v15 = vpop.permute.xlu1 %977  ;;  %v1572_v49 = vsel %vm1562_vm1, %v1539_v45, %v4662_v23  ;;  %v1594_v42 = vsel %vm1562_vm1, %v1561_v17, %v3264_v6  ;;  %v1626_v61 = vsel %vm1595_vm2, %v1593_v55, %v3382_v43  ;;  %v4666_v45 = vld [vmem:[#allocation6_spill] sm:$0xff]  ;;  %v4667_v23 = vld [vmem:[#allocation31_spill] sm:$0xff]  ;;  %v4669_v17 = vld [vmem:[#allocation52_spill] sm:$0xff] }
 0x1cd   : > { %v976_v47 = vpop.permute.xlu0 %975  ;;  %v4668_v43 = vld [vmem:[#allocation54_spill] sm:$0xff] }
 0x1ce   : > { %v3584_v16 = vsel %vm1628_vm3, %v1623_v54, %v976_v47  ;;  %v1605_v54 = vsel %vm1595_vm2, %v1572_v49, %v3298_v20  ;;  %v1627_v47 = vsel %vm1595_vm2, %v1594_v42, %v3344_v31  ;;  %v2429_v31 = vld [vmem:[%s2652_s20 + $0x50] sm:$0xff]  ;;  %v1532_v49 = vsel %vm1529_vm0, %v4667_v23, %v4666_v45  ;;  %v4671_v23 = vld [vmem:[#allocation41_spill] sm:$0xff] }
 0x1cf   : > { %v1565_v60 = vsel %vm1562_vm1, %v1532_v49, %v4668_v43  ;;  %v4670_v45 = vld [vmem:[#allocation12_spill] sm:$0xff]  ;;  %v4672_v43 = vld [vmem:[#allocation67_spill] sm:$0xff] }
 0x1d0   : > { %v1598_v39 = vsel %vm1595_vm2, %v1565_v60, %v3276_v9  ;;  %v1537_v49 = vsel %vm1529_vm0, %v4671_v23, %v4670_v45  ;;  %v4674_v45 = vld [vmem:[#allocation63_spill] sm:$0xff] }
 0x1d1   : > { %v1631_v22 = vsel %vm1628_vm3, %v1598_v39, %v3356_v34  ;;  %v4675_v23 = vld [vmem:[#allocation15_spill] sm:$0xff] }
 0x1d2   : > { %1437 = vrot.lane.b32.xlu2 %v2492_v19, %s2612_s28  ;;  %1321 = vrot.lane.b32.xlu1 %v2466_v62, %s2610_s26  ;;  %v1638_v19 = vsel %vm1628_vm3, %v1605_v54, %v3432_v57  ;;  %v2498_v57 = vld [vmem:[%s2652_s20 + $0x92] sm:$0xff] }
 0x1d3   : > { %1309 = vrot.lane.b32.xlu0 %v2460_v56, %s2610_s26 }
 0x1d4   : > { %v1068_v62 = vpop.permute.xlu2 %1067  ;;  %v984_v1 = vpop.permute.xlu1 %983 }
 0x1d5   : > { %v3616_v6 = vsel %vm1661_vm4, %v1638_v19, %v1068_v62  ;;  %v3619_v20 = vsel %vm1628_vm3, %v1627_v47, %v984_v1  ;;  %v982_v56 = vpop.permute.xlu0 %981  ;;  %v2442_v47 = vld [vmem:[%s2652_s20 + $0xf0] sm:$0xff]  ;;  %v2467_v19 = vld [vmem:[%s2652_s20 + $0x99] sm:$0xff] }
 0x1d6   : > { %v3622_v30 = vsel %vm1628_vm3, %v1626_v61, %v982_v56  ;;  %v2461_v62 = vld [vmem:[%s2652_s20 + $0x51] sm:$0xff] }
 0x1d7   : > { %v2474_v56 = vld [vmem:[%s2652_s20 + $0xf1] sm:$0xff] }
 0x1da   : > { %1195 = vrot.lane.b32.xlu2 %v4669_v17, %s2611_s27  ;;  %1183 = vrot.lane.b32.xlu1 %v2429_v31, %s2611_s27  ;;  %v2499_v31 = vld [vmem:[%s2652_s20 + $0x9a] sm:$0xff] }
 0x1db   : > { %1449 = vrot.lane.b32.xlu0 %v2498_v57, %s2612_s28  ;;  %v2493_v57 = vld [vmem:[%s2652_s20 + $0x52] sm:$0xff] }
 0x1dc   : > { %v3639_v29 = vpop.permute.xlu2 %1073  ;;  %v1054_v42 = vpop.permute.xlu1 %1053 }
 0x1dd   : > { %v3642_v54 = vsel %vm1661_vm4, %v1631_v22, %v1054_v42  ;;  %v3644_v55 = vpop.permute.xlu0 %1051 }
 0x1e2   : > { %1209 = vrot.lane.b32.xlu2 %v2442_v47, %s2611_s27  ;;  %1323 = vrot.lane.b32.xlu1 %v2467_v19, %s2610_s26 }
 0x1e3   : > { %1311 = vrot.lane.b32.xlu0 %v2461_v62, %s2610_s26 }
 0x1e4   : > { %v1080_v9 = vpop.permute.xlu2 %1079  ;;  %v3652_v34 = vpop.permute.xlu1 %1059 }
 0x1e5   : > { %v3656_v1 = vsel %vm1661_vm4, %v3472_v12, %v1080_v9  ;;  %v3658_v61 = vpop.permute.xlu0 %1057  ;;  %v1570_v12 = vsel %vm1562_vm1, %v1537_v49, %v4672_v43  ;;  %v2436_v9 = vld [vmem:[%s2652_s20 + $0xa8] sm:$0xff]  ;;  %v4676_v49 = vld [vmem:[#allocation46_spill] sm:$0xff] }
 0x1e6   : > { %v1603_v60 = vsel %vm1595_vm2, %v1570_v12, %v3248_v7  ;;  %v4677_v43 = vld [vmem:[#allocation71_spill] sm:$0xff]  ;;  %v4678_v12 = vld [vmem:[#allocation73_spill] sm:$0xff] }
 0x1e7   : > { %v1636_v42 = vsel %vm1628_vm3, %v1603_v60, %v3418_v59  ;;  %v1540_v59 = vsel %vm1529_vm0, %v4676_v49, %v4675_v23  ;;  %v2462_v49 = vld [vmem:[%s2652_s20 + $0x61] sm:$0xff] }
 0x1e8   : > { %v1573_v60 = vsel %vm1562_vm1, %v1540_v59, %v4678_v12  ;;  %v4679_v59 = vld [vmem:[#allocation8_spill] sm:$0xff]  ;;  %v4682_v12 = vld [vmem:[#allocation78_spill] sm:$0xff] }
 0x1ea   : > { %1337 = vrot.lane.b32.xlu2 %v2474_v56, %s2610_s26  ;;  %1451 = vrot.lane.b32.xlu1 %v2499_v31, %s2612_s28  ;;  %v2430_v56 = vld [vmem:[%s2652_s20 + $0x60] sm:$0xff]  ;;  %v2506_v31 = vld [vmem:[%s2652_s20 + $0xf2] sm:$0xff] }
 0x1eb   : > { %1439 = vrot.lane.b32.xlu0 %v2493_v57, %s2612_s28  ;;  %v4673_v57 = vld [vmem:[#allocation35_spill] sm:$0xff] }
 0x1ec   : > { %v1086_v39 = vpop.permute.xlu2 %1085  ;;  %v3673_v22 = vpop.permute.xlu1 %1065  ;;  %v1551_v7 = vsel %vm1529_vm0, %v4674_v45, %v4673_v57 }
 0x1ed   : > { %v3679_v47 = vsel %vm1661_vm4, %v3503_v35, %v1086_v39  ;;  %v1064_v19 = vpop.permute.xlu0 %1063  ;;  %v1584_v35 = vsel %vm1562_vm1, %v1551_v7, %v4677_v43 }
 0x1ee   : > { %v3682_v62 = vsel %vm1661_vm4, %v1636_v42, %v1064_v19  ;;  %v1617_v39 = vsel %vm1595_vm2, %v1584_v35, %v3346_v32  ;;  %v1606_v42 = vsel %vm1595_vm2, %v1573_v60, %v3260_v10  ;;  %v4680_v10 = vld [vmem:[#allocation50_spill] sm:$0xff]  ;;  %v4683_v60 = vld [vmem:[#allocation79_spill] sm:$0xff] }
 0x1ef   : > { %v1650_v19 = vsel %vm1628_vm3, %v1617_v39, %v3526_v51  ;;  %v1544_v43 = vsel %vm1529_vm0, %v4680_v10, %v4679_v59  ;;  %v4681_v51 = vld [vmem:[#allocation18_spill] sm:$0xff]  ;;  %v2500_v59 = vld [vmem:[%s2652_s20 + $0xaa] sm:$0xff] }
 0x1f0   : > { %v1543_v35 = vsel %vm1529_vm0, %v4669_v17, %v4681_v51  ;;  %v4684_v10 = vld [vmem:[#allocation11_spill] sm:$0xff] }
 0x1f1   : > { %v1576_v39 = vsel %vm1562_vm1, %v1543_v35, %v4683_v60  ;;  %v4686_v51 = vld [vmem:[#allocation83_spill] sm:$0xff] }
 0x1f2   : > { %1197 = vrot.lane.b32.xlu2 %v2436_v9, %s2611_s27  ;;  %1185 = vrot.lane.b32.xlu1 %v2430_v56, %s2611_s27  ;;  %v1639_v9 = vsel %vm1628_vm3, %v1606_v42, %v3430_v5  ;;  %v1577_v5 = vsel %vm1562_vm1, %v1544_v43, %v4682_v12  ;;  %v1609_v17 = vsel %vm1595_vm2, %v1576_v39, %v3272_v13  ;;  %v2475_v13 = vld [vmem:[%s2652_s20 + $0xf9] sm:$0xff]  ;;  %v4685_v43 = vld [vmem:[#allocation56_spill] sm:$0xff] }
 0x1f3   : > { %1465 = vrot.lane.b32.xlu0 %v2506_v31, %s2612_s28  ;;  %v2468_v31 = vld [vmem:[%s2652_s20 + $0xa9] sm:$0xff]  ;;  %v1610_v42 = vsel %vm1595_vm2, %v1577_v5, %v3324_v26 }
 0x1f4   : > { %v1092_v57 = vpop.permute.xlu2 %1091  ;;  %v3706_v7 = vpop.permute.xlu1 %1071 }
 0x1f5   : > { %v3711_v56 = vsel %vm1661_vm4, %v1650_v19, %v1092_v57  ;;  %v1070_v23 = vpop.permute.xlu0 %1069  ;;  %v1643_v19 = vsel %vm1628_vm3, %v1610_v42, %v3404_v52  ;;  %v2494_v52 = vld [vmem:[%s2652_s20 + $0x62] sm:$0xff] }
 0x1f6   : > { %v3714_v32 = vsel %vm1661_vm4, %v1639_v9, %v1070_v23 }
 0x1fa   : > { %1211 = vrot.lane.b32.xlu2 %v4674_v45, %s2611_s27  ;;  %1325 = vrot.lane.b32.xlu1 %v2468_v31, %s2610_s26  ;;  %v1642_v45 = vsel %vm1628_vm3, %v1609_v17, %v3442_v36  ;;  %v1547_v36 = vsel %vm1529_vm0, %v4685_v43, %v4684_v10 }
 0x1fb   : > { %1313 = vrot.lane.b32.xlu0 %v2462_v49, %s2610_s26 }
 0x1fc   : > { %v1098_v57 = vpop.permute.xlu2 %1097  ;;  %v1078_v9 = vpop.permute.xlu1 %1077 }
 0x1fd   : > { %v3742_v23 = vsel %vm1661_vm4, %v3564_v25, %v1098_v57  ;;  %v3745_v31 = vsel %vm1661_vm4, %v1643_v19, %v1078_v9  ;;  %v1076_v26 = vpop.permute.xlu0 %1075  ;;  %v1580_v25 = vsel %vm1562_vm1, %v1547_v36, %v4686_v51  ;;  %v2431_v57 = vld [vmem:[%s2652_s20 + $0x68] sm:$0xff]  ;;  %v2507_v9 = vld [vmem:[%s2652_s20 + $0xfa] sm:$0xff]  ;;  %v2469_v51 = vld [vmem:[%s2652_s20 + $0xb1] sm:$0xff] }
 0x1fe   : > { %v3748_v49 = vsel %vm1661_vm4, %v1642_v45, %v1076_v26  ;;  %v1613_v35 = vsel %vm1595_vm2, %v1580_v25, %v3336_v24  ;;  %v2437_v24 = vld [vmem:[%s2652_s20 + $0xb0] sm:$0xff]  ;;  %v4687_v45 = vld [vmem:[#allocation14_spill] sm:$0xff] }
 0x1ff   : > { %v1646_v12 = vsel %vm1628_vm3, %v1613_v35, %v3416_v58  ;;  %v4688_v26 = vld [vmem:[#allocation62_spill] sm:$0xff]  ;;  %v2463_v25 = vld [vmem:[%s2652_s20 + $0x69] sm:$0xff] }
 0x200   : > { %v1550_v58 = vsel %vm1529_vm0, %v4688_v26, %v4687_v45  ;;  %v1795_v35 = vld [vmem:[%s4493_s1 + $0x10] sm:$0xff]  ;;  %v1793_v26 = vld [vmem:[%s4493_s1] sm:$0xff] }
 0x202   : > { %1339 = vrot.lane.b32.xlu2 %v2475_v13, %s2610_s26  ;;  %1453 = vrot.lane.b32.xlu1 %v2500_v59, %s2612_s28  ;;  %v1583_v13 = vsel %vm1562_vm1, %v1550_v58, %v3214_v44 }
 0x203   : > { %1441 = vrot.lane.b32.xlu0 %v2494_v52, %s2612_s28 }
 0x204   : > { %v1104_v5 = vpop.permute.xlu2 %1103  ;;  %v1084_v60 = vpop.permute.xlu1 %1083 }
 0x205   : > { %v3767_v39 = vsel %vm1661_vm4, %v3584_v16, %v1104_v5  ;;  %v3770_v42 = vsel %vm1661_vm4, %v1646_v12, %v1084_v60  ;;  %v1082_v17 = vpop.permute.xlu0 %1081  ;;  %v4689_v12 = vld [vmem:[#allocation17_spill] sm:$0xff] }
 0x206   : > { %v3774_v19 = vsel %vm1661_vm4, %v3469_v40, %v1082_v17  ;;  %v1616_v40 = vsel %vm1595_vm2, %v1583_v13, %v3348_v27  ;;  %v1797_v27 = vld [vmem:[%s4493_s1 + $0x20] sm:$0xf]  ;;  %v2495_v13 = vld [vmem:[%s2652_s20 + $0x6a] sm:$0xff] }
 0x207   : > { %v1649_v16 = vsel %vm1628_vm3, %v1616_v40, %v3428_v2  ;;  %2522 = vmatpush.msk.msra.mxu0 %vm1895_vm5, %v1797_v27  ;;  %v1796_v2 = vld [vmem:[%s4493_s1 + $0x18] sm:$0xff]  ;;  %2558 = vmatpush.msk.msra.mxu1 %vm1895_vm5, %v1797_v27 }
 0x208   : > { %2559 = vmatpush.msk.msra.mxu2 %vm1895_vm5, %v1797_v27  ;;  %2560 = vmatpush.msk.msra.mxu3 %vm1895_vm5, %v1797_v27  ;;  %v4691_v40 = vld [vmem:[#allocation21_spill] sm:$0xff] }
 0x209   : > { %1911 = vmatpush.msra.mxu0 %v1796_v2  ;;  %2561 = vmatpush.msra.mxu1 %v1796_v2 }
 0x20a   : > { %1199 = vrot.lane.b32.xlu2 %v2437_v24, %s2611_s27  ;;  %1187 = vrot.lane.b32.xlu1 %v2431_v57, %s2611_s27  ;;  %v1794_v24 = vld [vmem:[%s4493_s1 + $0x8] sm:$0xff] }
 0x20b   : > { %1467 = vrot.lane.b32.xlu0 %v2507_v9, %s2612_s28  ;;  %2562 = vmatpush.msra.mxu2 %v1796_v2 }
 0x20c   : > { %v1110_v59 = vpop.permute.xlu2 %1109  ;;  %v1090_v52 = vpop.permute.xlu1 %1089  ;;  %2563 = vmatpush.msra.mxu3 %v1796_v2  ;;  %1912 = vmatpush.msra.mxu0 %v1795_v35 }
 0x20d   : > { %v3793_v44 = vsel %vm1661_vm4, %v3622_v30, %v1110_v59  ;;  %v3796_v10 = vsel %vm1661_vm4, %v1649_v16, %v1090_v52  ;;  %v1088_v43 = vpop.permute.xlu0 %1087  ;;  %v2444_v30 = vld [vmem:[%s2652_s20 + $0x108] sm:$0xff]  ;;  %2564 = vmatpush.msra.mxu1 %v1795_v35  ;;  %2565 = vmatpush.msra.mxu2 %v1795_v35  ;;  %v4692_v16 = vld [vmem:[#allocation74_spill] sm:$0xff] }
 0x20e   : > { %v3803_v36 = vsel %vm1661_vm4, %v3500_v63, %v1088_v43  ;;  %v4690_v63 = vld [vmem:[#allocation68_spill] sm:$0xff]  ;;  %1913 = vmatpush.msra.mxu0 %v1794_v24  ;;  %2566 = vmatpush.msra.mxu3 %v1795_v35  ;;  %v1556_v59 = vsel %vm1529_vm0, %v4692_v16, %v4691_v40  ;;  %v4693_v43 = vld [vmem:[#allocation82_spill] sm:$0xff] }
 0x20f   : > { %v1553_v5 = vsel %vm1529_vm0, %v4690_v63, %v4689_v12  ;;  %2567 = vmatpush.msra.mxu1 %v1794_v24  ;;  %2568 = vmatpush.msra.mxu2 %v1794_v24  ;;  %v2508_v35 = vld [vmem:[%s2652_s20 + $0x10a] sm:$0xff]  ;;  %v2438_v40 = vld [vmem:[%s2652_s20 + $0xc0] sm:$0xff]  ;;  %v2514_v16 = vld [vmem:[%s2652_s20 + $0x152] sm:$0xff] }
 0x210   : > { %v1586_v60 = vsel %vm1562_vm1, %v1553_v5, %v3226_v50  ;;  %1914 = vmatpush.msra.mxu0 %v1793_v26  ;;  %2569 = vmatpush.msra.mxu3 %v1794_v24  ;;  %v2482_v12 = vld [vmem:[%s2652_s20 + $0x151] sm:$0xff]  ;;  %v4694_v63 = vld [vmem:[#allocation27_spill] sm:$0xff] }
 0x211   : > { %v1619_v17 = vsel %vm1595_vm2, %v1586_v60, %v3360_v18  ;;  %2570 = vmatpush.msra.mxu1 %v1793_v26  ;;  %2571 = vmatpush.msra.mxu2 %v1793_v26  ;;  %v4695_v5 = vld [vmem:[#allocation80_spill] sm:$0xff] }
 0x212   : > { %1213 = vrot.lane.b32.xlu2 %v2444_v30, %s2611_s27  ;;  %1327 = vrot.lane.b32.xlu1 %v2469_v51, %s2610_s26  ;;  %v1652_v57 = vsel %vm1628_vm3, %v1619_v17, %v3440_v48  ;;  %v2501_v48 = vld [vmem:[%s2652_s20 + $0xb2] sm:$0xff]  ;;  %v1559_v60 = vsel %vm1529_vm0, %v4695_v5, %v4694_v63  ;;  %v4696_v17 = vld [vmem:[#allocation43_spill] sm:$0xff] }
 0x213   : > { %1315 = vrot.lane.b32.xlu0 %v2463_v25, %s2610_s26  ;;  %2572 = vmatpush.msra.mxu3 %v1793_v26  ;;  %v1592_v24 = vsel %vm1562_vm1, %v1559_v60, %v3250_v8  ;;  %v2464_v5 = vld [vmem:[%s2652_s20 + $0x79] sm:$0xff] }
 0x214   : > { %v3829_v50 = vpop.permute.xlu2 %1305  ;;  %v1096_v9 = vpop.permute.xlu1 %1095  ;;  %v4699_v60 = vld [vmem:[#allocation25_spill] sm:$0xff] }
 0x215   : > { %v3832_v45 = vsel %vm1661_vm4, %v1652_v57, %v1096_v9  ;;  %v1094_v18 = vpop.permute.xlu0 %1093  ;;  %v1625_v57 = vsel %vm1595_vm2, %v1592_v24, %v3384_v37 }
 0x216   : > { %v3839_v58 = vsel %vm1661_vm4, %v3524_v21, %v1094_v18  ;;  %v1589_v21 = vsel %vm1562_vm1, %v1556_v59, %v3238_v4  ;;  %v1658_v8 = vsel %vm1628_vm3, %v1625_v57, %v3495_v53  ;;  %v215_v53 = vld [vmem:[%s2652_s20] sm:$0xff] }
 0x217   : > { %v1622_v52 = vsel %vm1595_vm2, %v1589_v21, %v3372_v33  ;;  %v2476_v33 = vld [vmem:[%s2652_s20 + $0x109] sm:$0xff] }
 0x218   : > { %v1655_v27 = vsel %vm1628_vm3, %v1622_v52, %v3464_v0  ;;  %v1558_v0 = vsel %vm1529_vm0, %v4693_v43, %v4696_v17  ;;  %v4697_v21 = vld [vmem:[#allocation7_spill] sm:$0xff] }
 0x219   : > { %v1530_v52 = vsel %vm1529_vm0, %v215_v53, %v4697_v21  ;;  %v4703_v53 = vld [vmem:[#allocation94_spill] sm:$0xff]  ;;  %v2451_v21 = vld [vmem:[%s2652_s20 + $0x158] sm:$0xff] }
 0x21a   : > { %1455 = vrot.lane.b32.xlu2 %v2501_v48, %s2612_s28  ;;  %1443 = vrot.lane.b32.xlu1 %v2495_v13, %s2612_s28 }
 0x21b   : > { %1225 = vrot.lane.b32.xlu0 %v4693_v43, %s2611_s27 }
 0x21c   : > { %v3856_v2 = vpop.permute.xlu2 %1307  ;;  %v1102_v30 = vpop.permute.xlu1 %1101 }
 0x21d   : > { %v3859_v51 = vsel %vm1661_vm4, %v1655_v27, %v1102_v30  ;;  %v1100_v4 = vpop.permute.xlu0 %1099  ;;  %v4698_v27 = vld [vmem:[#allocation33_spill] sm:$0xff] }
 0x21e   : > { %v3863_v25 = vsel %vm1661_vm4, %v3561_v46, %v1100_v4  ;;  %v1591_v46 = vsel %vm1562_vm1, %v1558_v0, %v3252_v3  ;;  %v1563_v30 = vsel %vm1562_vm1, %v1530_v52, %v4698_v27  ;;  %v216_v0 = vld [vmem:[%s2652_s20 + $0x8] sm:$0xff] }
 0x21f   : > { %v1624_v9 = vsel %vm1595_vm2, %v1591_v46, %v3332_v28  ;;  %v2432_v28 = vld [vmem:[%s2652_s20 + $0x78] sm:$0xff] }
 0x220   : > { %v1657_v48 = vsel %vm1628_vm3, %v1624_v9, %v3579_v15 }
 0x222   : > { %1469 = vrot.lane.b32.xlu2 %v2508_v35, %s2612_s28  ;;  %1353 = vrot.lane.b32.xlu1 %v2482_v12, %s2610_s26  ;;  %v1596_v35 = vsel %vm1595_vm2, %v1563_v30, %v3262_v11  ;;  %v2445_v12 = vld [vmem:[%s2652_s20 + $0x110] sm:$0xff] }
 0x223   : > { %1341 = vrot.lane.b32.xlu0 %v2476_v33, %s2610_s26  ;;  %v2470_v33 = vld [vmem:[%s2652_s20 + $0xc1] sm:$0xff]  ;;  %v1629_v63 = vsel %vm1628_vm3, %v1596_v35, %v3396_v41 }
 0x224   : > { %v3887_v18 = vpop.permute.xlu2 %1193  ;;  %v1108_v26 = vpop.permute.xlu1 %1107  ;;  %v1662_v17 = vsel %vm1661_vm4, %v1629_v63, %v4699_v60  ;;  %v2477_v63 = vld [vmem:[%s2652_s20 + $0x111] sm:$0xff] }
 0x225   : > { %v3892_v13 = vsel %vm1661_vm4, %v1658_v8, %v1108_v26  ;;  %v1106_v3 = vpop.permute.xlu0 %1105  ;;  %v4701_v8 = vld [vmem:[#allocation55_spill] sm:$0xff] }
 0x226   : > { %v3895_v37 = vsel %vm1661_vm4, %v1657_v48, %v1106_v3  ;;  %v4702_v3 = vld [vmem:[#allocation84_spill] sm:$0xff] }
 0x22a   : > { %1201 = vrot.lane.b32.xlu2 %v2438_v40, %s2611_s27  ;;  %1189 = vrot.lane.b32.xlu1 %v2432_v28, %s2611_s27  ;;  %v2502_v28 = vld [vmem:[%s2652_s20 + $0xc2] sm:$0xff] }
 0x22b   : > { %1481 = vrot.lane.b32.xlu0 %v2514_v16, %s2612_s28  ;;  %v2496_v16 = vld [vmem:[%s2652_s20 + $0x7a] sm:$0xff] }
 0x22c   : > { %v1438_v15 = vpop.permute.xlu2 %1437  ;;  %v1178_v59 = vpop.permute.xlu1 %1177 }
 0x22d   : > { %v1112_v43 = vpop.permute.xlu0 %1111  ;;  %v1695_v24 = vsel %vm1694_vm6, %v1662_v17, %v1178_v59 }
 0x22e   : > { %v3910_v4 = vsel %vm1661_vm4, %v3619_v20, %v1112_v43  ;;  %v4700_v20 = vld [vmem:[#allocation10_spill] sm:$0xff]  ;;  %v1728_v9 = vsel %vm1727_vm7, %v1695_v24, %v3829_v50 }
 0x22f   : > { %v1531_v46 = vsel %vm1529_vm0, %v216_v0, %v4700_v20  ;;  %v2590_v24 = vld [vmem:[%s2652_s20 + $0x60] sm:$0xff] }
 0x230   : > { %v1564_v26 = vsel %vm1562_vm1, %v1531_v46, %v4701_v8  ;;  %v4705_v8 = vld [vmem:[#allocation66_spill] sm:$0xff] }
 0x231   : > { %v1597_v40 = vsel %vm1595_vm2, %v1564_v26, %v4702_v3 }
 0x232   : > { %1215 = vrot.lane.b32.xlu2 %v2445_v12, %s2611_s27  ;;  %1329 = vrot.lane.b32.xlu1 %v2470_v33, %s2610_s26  ;;  %v1630_v59 = vsel %vm1628_vm3, %v1597_v40, %v4703_v53  ;;  %v2483_v33 = vld [vmem:[%s2652_s20 + $0x159] sm:$0xff]  ;;  %v4707_v40 = vld [vmem:[#allocation92_spill] sm:$0xff] }
 0x233   : > { %1317 = vrot.lane.b32.xlu0 %v2464_v5, %s2610_s26  ;;  %v1663_v50 = vsel %vm1661_vm4, %v1630_v59, %v3644_v55  ;;  %v2509_v55 = vld [vmem:[%s2652_s20 + $0x112] sm:$0xff] }
 0x234   : > { %v3926_v11 = vpop.permute.xlu2 %1195  ;;  %v1180_v41 = vpop.permute.xlu1 %1179 }
 0x235   : > { %v1434_v57 = vpop.permute.xlu0 %1433  ;;  %v1696_v52 = vsel %vm1694_vm6, %v1663_v50, %v1180_v41  ;;  %v4704_v41 = vld [vmem:[#allocation4_spill] sm:$0xff] }
 0x236   : > { %v1761_v48 = vsel %vm1760_vm8, %v1728_v9, %v1434_v57  ;;  %v1729_v35 = vsel %vm1727_vm7, %v1696_v52, %v3856_v2  ;;  %v1538_v20 = vsel %vm1529_vm0, %v2590_v24, %v4704_v41  ;;  %v2439_v57 = vld [vmem:[%s2652_s20 + $0xc8] sm:$0xff]  ;;  %v2433_v9 = vld [vmem:[%s2652_s20 + $0x80] sm:$0xff] }
 0x237   : > { %2523 = vmatmul.msk.f32.vlgmr.msra.gmra.mxu0 %vm1798_vm9, %v1761_v48  ;;  %v1571_v26 = vsel %vm1562_vm1, %v1538_v20, %v4705_v8  ;;  %v2515_v48 = vld [vmem:[%s2652_s20 + $0x15a] sm:$0xff] }
 0x23a   : > { %1457 = vrot.lane.b32.xlu2 %v2502_v28, %s2612_s28  ;;  %1445 = vrot.lane.b32.xlu1 %v2496_v16, %s2612_s28 }
 0x23b   : > { %1227 = vrot.lane.b32.xlu0 %v2451_v21, %s2611_s27 }
 0x23c   : > { %v3949_v43 = vpop.permute.xlu2 %1209  ;;  %v1182_v27 = vpop.permute.xlu1 %1181 }
 0x23d   : > { %v1436_v30 = vpop.permute.xlu0 %1435  ;;  %v1697_v2 = vsel %vm1694_vm6, %v3642_v54, %v1182_v27  ;;  %v4706_v54 = vld [vmem:[#allocation88_spill] sm:$0xff]  ;;  %v2446_v27 = vld [vmem:[%s2652_s20 + $0x120] sm:$0xff] }
 0x23e   : > { %v1762_v12 = vsel %vm1760_vm8, %v1729_v35, %v1436_v30  ;;  %v1604_v3 = vsel %vm1595_vm2, %v1571_v26, %v4706_v54  ;;  %v2465_v30 = vld [vmem:[%s2652_s20 + $0x81] sm:$0xff] }
 0x23f   : > { %2524 = vmatmul.msk.f32.gmra.mxu0 %vm1798_vm9, %v1762_v12  ;;  %v1637_v28 = vsel %vm1628_vm3, %v1604_v3, %v4707_v40  ;;  %v2472_v40 = vld [vmem:[%s2652_s20 + $0xd9] sm:$0xff] }
 0x242   : > { %1471 = vrot.lane.b32.xlu2 %v2509_v55, %s2612_s28  ;;  %1355 = vrot.lane.b32.xlu1 %v2483_v33, %s2610_s26  ;;  %v2503_v55 = vld [vmem:[%s2652_s20 + $0xca] sm:$0xff]  ;;  %v2497_v33 = vld [vmem:[%s2652_s20 + $0x82] sm:$0xff] }
 0x243   : > { %1343 = vrot.lane.b32.xlu0 %v2477_v63, %s2610_s26  ;;  %v2452_v63 = vld [vmem:[%s2652_s20 + $0x168] sm:$0xff] }
 0x244   : > { %v1338_v5 = vpop.permute.xlu2 %1337  ;;  %v1322_v60 = vpop.permute.xlu1 %1321 }
 0x245   : > { %v1310_v17 = vpop.permute.xlu0 %1309 }
 0x246   : > { %v1730_v0 = vsel %vm1727_vm7, %v1697_v2, %v1310_v17 }
 0x247   : > { %v1763_v46 = vsel %vm1760_vm8, %v1730_v0, %v1438_v15  ;;  %v1670_v15 = vsel %vm1661_vm4, %v1637_v28, %v3673_v22  ;;  %v2471_v22 = vld [vmem:[%s2652_s20 + $0xc9] sm:$0xff]  ;;  %v2440_v28 = vld [vmem:[%s2652_s20 + $0xd8] sm:$0xff] }
 0x248   : > { %2525 = vmatmul.msk.f32.gmra.mxu0 %vm1798_vm9, %v1763_v46  ;;  %v1703_v16 = vsel %vm1694_vm6, %v1670_v15, %v3887_v18  ;;  %v2516_v15 = vld [vmem:[%s2652_s20 + $0x16a] sm:$0xff] }
 0x249   : > { %v1736_v21 = vsel %vm1727_vm7, %v1703_v16, %v1322_v60  ;;  %v1704_v60 = vsel %vm1694_vm6, %v3616_v6, %v3926_v11  ;;  %v2484_v6 = vld [vmem:[%s2652_s20 + $0x169] sm:$0xff]  ;;  %v2478_v11 = vld [vmem:[%s2652_s20 + $0x121] sm:$0xff] }
 0x24a   : > { %1203 = vrot.lane.b32.xlu2 %v2439_v57, %s2611_s27  ;;  %1191 = vrot.lane.b32.xlu1 %v2433_v9, %s2611_s27  ;;  %v1711_v9 = vsel %vm1694_vm6, %v3774_v19, %v3949_v43  ;;  %v2591_v16 = vld [vmem:[%s2652_s20 + $0x30] sm:$0xff] }
 0x24b   : > { %1483 = vrot.lane.b32.xlu0 %v2515_v48, %s2612_s28  ;;  %v1744_v48 = vsel %vm1727_vm7, %v1711_v9, %v1338_v5 }
 0x24c   : > { %v3985_v53 = vpop.permute.xlu2 %1197  ;;  %v1184_v59 = vpop.permute.xlu1 %1183 }
 0x24d   : > { %v1450_v50 = vpop.permute.xlu0 %1449  ;;  %v1698_v2 = vsel %vm1694_vm6, %v3558_v14, %v1184_v59  ;;  %v2510_v14 = vld [vmem:[%s2652_s20 + $0x122] sm:$0xff] }
 0x24e   : > { %v1769_v52 = vsel %vm1760_vm8, %v1736_v21, %v1450_v50  ;;  %v4708_v59 = vld [vmem:[#allocation2_spill] sm:$0xff] }
 0x24f   : > { %2531 = vmatmul.msk.f32.vlgmr.msra.gmra.mxu1 %vm1798_vm9, %v1769_v52  ;;  %v1534_v21 = vsel %vm1529_vm0, %v2591_v16, %v4708_v59  ;;  %v2504_v50 = vld [vmem:[%s2652_s20 + $0xda] sm:$0xff]  ;;  %v2453_v52 = vld [vmem:[%s2652_s20 + $0x170] sm:$0xff] }
 0x250   : > { %v4714_v16 = vld [vmem:[#allocation90_spill] sm:$0xff] }
 0x252   : > { %1217 = vrot.lane.b32.xlu2 %v2446_v27, %s2611_s27  ;;  %1331 = vrot.lane.b32.xlu1 %v2471_v22, %s2610_s26  ;;  %v4709_v27 = vld [vmem:[#allocation61_spill] sm:$0xff] }
 0x253   : > { %1319 = vrot.lane.b32.xlu0 %v2465_v30, %s2610_s26  ;;  %v1567_v22 = vsel %vm1562_vm1, %v1534_v21, %v4709_v27  ;;  %v2447_v30 = vld [vmem:[%s2652_s20 + $0x128] sm:$0xff] }
 0x254   : > { %v3996_v18 = vpop.permute.xlu2 %1211  ;;  %v1324_v35 = vpop.permute.xlu1 %1323 }
 0x255   : > { %v1312_v12 = vpop.permute.xlu0 %1311  ;;  %v1737_v17 = vsel %vm1727_vm7, %v1704_v60, %v1324_v35  ;;  %v4710_v35 = vld [vmem:[#allocation85_spill] sm:$0xff]  ;;  %v1705_v60 = vsel %vm1694_vm6, %v3714_v32, %v3985_v53  ;;  %v2511_v32 = vld [vmem:[%s2652_s20 + $0x12a] sm:$0xff] }
 0x256   : > { %v1731_v41 = vsel %vm1727_vm7, %v1698_v2, %v1312_v12  ;;  %v1600_v12 = vsel %vm1595_vm2, %v1567_v22, %v4710_v35  ;;  %v2485_v53 = vld [vmem:[%s2652_s20 + $0x171] sm:$0xff] }
 0x25a   : > { %1459 = vrot.lane.b32.xlu2 %v2503_v55, %s2612_s28  ;;  %1447 = vrot.lane.b32.xlu1 %v2497_v33, %s2612_s28  ;;  %v4711_v55 = vld [vmem:[#allocation95_spill] sm:$0xff] }
 0x25b   : > { %1229 = vrot.lane.b32.xlu0 %v2452_v63, %s2611_s27  ;;  %v1633_v33 = vsel %vm1628_vm3, %v1600_v12, %v4711_v55  ;;  %v2593_v12 = vld [vmem:[%s2652_s20 + $0x38] sm:$0xff]  ;;  %v4716_v55 = vld [vmem:[#allocation3_spill] sm:$0xff] }
 0x25c   : > { %v4010_v0 = vpop.permute.xlu2 %1339  ;;  %v1452_v24 = vpop.permute.xlu1 %1451  ;;  %v1666_v63 = vsel %vm1661_vm4, %v1633_v33, %v3658_v61  ;;  %v1535_v33 = vsel %vm1529_vm0, %v2593_v12, %v4716_v55  ;;  %v4723_v55 = vld [vmem:[#allocation89_spill] sm:$0xff] }
 0x25d   : > { %v1440_v20 = vpop.permute.xlu0 %1439  ;;  %v1770_v46 = vsel %vm1760_vm8, %v1737_v17, %v1452_v24 }
 0x25e   : > { %v1764_v57 = vsel %vm1760_vm8, %v1731_v41, %v1440_v20  ;;  %2532 = vmatmul.msk.f32.gmra.mxu1 %vm1798_vm9, %v1770_v46 }
 0x25f   : > { %2526 = vmatmul.msk.f32.gmra.mxu0 %vm1798_vm9, %v1764_v57 }
 0x262   : > { %1473 = vrot.lane.b32.xlu2 %v2510_v14, %s2612_s28  ;;  %1357 = vrot.lane.b32.xlu1 %v2484_v6, %s2610_s26  ;;  %v2479_v14 = vld [vmem:[%s2652_s20 + $0x129] sm:$0xff]  ;;  %v1712_v6 = vsel %vm1694_vm6, %v3770_v42, %v3996_v18  ;;  %v2517_v18 = vld [vmem:[%s2652_s20 + $0x172] sm:$0xff] }
 0x263   : > { %1345 = vrot.lane.b32.xlu0 %v2478_v11, %s2610_s26 }
 0x264   : > { %v4026_v8 = vpop.permute.xlu2 %1199  ;;  %v1186_v26 = vpop.permute.xlu1 %1185 }
 0x265   : > { %v1466_v54 = vpop.permute.xlu0 %1465  ;;  %v1699_v2 = vsel %vm1694_vm6, %v1666_v63, %v1186_v26  ;;  %v1745_v26 = vsel %vm1727_vm7, %v1712_v6, %v4010_v0  ;;  %v4715_v0 = vld [vmem:[#allocation93_spill] sm:$0xff] }
 0x266   : > { %v1777_v3 = vsel %vm1760_vm8, %v1744_v48, %v1466_v54 }
 0x267   : > { %2539 = vmatmul.msk.f32.vlgmr.msra.gmra.mxu2 %vm1798_vm9, %v1777_v3  ;;  %v2592_v3 = vld [vmem:[%s2652_s20 + $0x80] sm:$0xff] }
 0x26a   : > { %1333 = vrot.lane.b32.xlu2 %v2472_v40, %s2610_s26  ;;  %1205 = vrot.lane.b32.xlu1 %v2440_v28, %s2611_s27  ;;  %v4712_v40 = vld [vmem:[#allocation5_spill] sm:$0xff] }
 0x26b   : > { %1485 = vrot.lane.b32.xlu0 %v2516_v15, %s2612_s28  ;;  %v1541_v28 = vsel %vm1529_vm0, %v2592_v3, %v4712_v40  ;;  %v2473_v15 = vld [vmem:[%s2652_s20 + $0xe1] sm:$0xff] }
 0x26c   : > { %v4037_v19 = vpop.permute.xlu2 %1213  ;;  %v1326_v43 = vpop.permute.xlu1 %1325 }
 0x26d   : > { %v1314_v5 = vpop.permute.xlu0 %1313  ;;  %v1738_v17 = vsel %vm1727_vm7, %v1705_v60, %v1326_v43  ;;  %v2441_v43 = vld [vmem:[%s2652_s20 + $0xe0] sm:$0xff]  ;;  %v4717_v60 = vld [vmem:[#allocation60_spill] sm:$0xff]  ;;  %v1713_v40 = vsel %vm1694_vm6, %v3679_v47, %v4037_v19 }
 0x26e   : > { %v1732_v20 = vsel %vm1727_vm7, %v1699_v2, %v1314_v5  ;;  %v4713_v5 = vld [vmem:[#allocation72_spill] sm:$0xff]  ;;  %v2505_v2 = vld [vmem:[%s2652_s20 + $0xe2] sm:$0xff] }
 0x26f   : > { %v1574_v42 = vsel %vm1562_vm1, %v1541_v28, %v4713_v5  ;;  %v2455_v5 = vld [vmem:[%s2652_s20 + $0x188] sm:$0xff] }
 0x270   : > { %v1607_v59 = vsel %vm1595_vm2, %v1574_v42, %v4714_v16  ;;  %v2449_v42 = vld [vmem:[%s2652_s20 + $0x140] sm:$0xff] }
 0x271   : > { %v1640_v21 = vsel %vm1628_vm3, %v1607_v59, %v4715_v0 }
 0x272   : > { %1461 = vrot.lane.b32.xlu2 %v2504_v50, %s2612_s28  ;;  %1231 = vrot.lane.b32.xlu1 %v2453_v52, %s2611_s27  ;;  %v1673_v50 = vsel %vm1661_vm4, %v1640_v21, %v3706_v7  ;;  %v1568_v7 = vsel %vm1562_vm1, %v1535_v33, %v4717_v60  ;;  %v2595_v21 = vld [vmem:[%s2652_s20 + $0x90] sm:$0xff] }
 0x273   : > { %1219 = vrot.lane.b32.xlu0 %v2447_v30, %s2611_s27  ;;  %v1706_v52 = vsel %vm1694_vm6, %v1673_v50, %v4026_v8  ;;  %v2454_v8 = vld [vmem:[%s2652_s20 + $0x180] sm:$0xff]  ;;  %v4721_v50 = vld [vmem:[#allocation19_spill] sm:$0xff] }
 0x274   : > { %v1456_v24 = vpop.permute.xlu2 %1455  ;;  %v1454_v41 = vpop.permute.xlu1 %1453 }
 0x275   : > { %v1442_v46 = vpop.permute.xlu0 %1441  ;;  %v1771_v57 = vsel %vm1760_vm8, %v1738_v17, %v1454_v41  ;;  %v4718_v17 = vld [vmem:[#allocation87_spill] sm:$0xff] }
 0x276   : > { %v1765_v61 = vsel %vm1760_vm8, %v1732_v20, %v1442_v46  ;;  %2533 = vmatmul.msk.f32.gmra.mxu1 %vm1798_vm9, %v1771_v57  ;;  %v1601_v41 = vsel %vm1595_vm2, %v1568_v7, %v4718_v17  ;;  %v2448_v20 = vld [vmem:[%s2652_s20 + $0x138] sm:$0xff]  ;;  %v4719_v46 = vld [vmem:[#allocation91_spill] sm:$0xff] }
 0x277   : > { %2527 = vmatmul.msk.f32.gmra.mxu0 %vm1798_vm9, %v1765_v61  ;;  %v1634_v57 = vsel %vm1628_vm3, %v1601_v41, %v4719_v46  ;;  %v4725_v46 = vld [vmem:[#allocation13_spill] sm:$0xff] }
 0x27a   : > { %1475 = vrot.lane.b32.xlu2 %v2511_v32, %s2612_s28  ;;  %1359 = vrot.lane.b32.xlu1 %v2485_v53, %s2610_s26 }
 0x27b   : > { %1347 = vrot.lane.b32.xlu0 %v2479_v14, %s2610_s26 }
 0x27c   : > { %v1470_v11 = vpop.permute.xlu2 %1469  ;;  %v1188_v9 = vpop.permute.xlu1 %1187 }
 0x27d   : > { %v1468_v48 = vpop.permute.xlu0 %1467 }
 0x27e   : > { %v1778_v54 = vsel %vm1760_vm8, %v1745_v26, %v1468_v48  ;;  %v2480_v48 = vld [vmem:[%s2652_s20 + $0x139] sm:$0xff] }
 0x27f   : > { %2540 = vmatmul.msk.f32.gmra.mxu2 %vm1798_vm9, %v1778_v54  ;;  %v2594_v54 = vld [vmem:[%s2652_s20 + $0x181] sm:$0xff] }
 0x282   : > { %1335 = vrot.lane.b32.xlu2 %v2473_v15, %s2610_s26  ;;  %1207 = vrot.lane.b32.xlu1 %v2441_v43, %s2611_s27 }
 0x283   : > { %1487 = vrot.lane.b32.xlu0 %v2517_v18, %s2612_s28  ;;  %v4720_v18 = vld [vmem:[#allocation22_spill] sm:$0xff] }
 0x284   : > { %v4098_v27 = vpop.permute.xlu2 %1201  ;;  %v1328_v22 = vpop.permute.xlu1 %1327 }
 0x285   : > { %v1739_v30 = vsel %vm1727_vm7, %v1706_v52, %v1328_v22  ;;  %v1316_v35 = vpop.permute.xlu0 %1315  ;;  %v1542_v52 = vsel %vm1529_vm0, %v2595_v21, %v4721_v50  ;;  %v2487_v22 = vld [vmem:[%s2652_s20 + $0x189] sm:$0xff] }
 0x286   : > { %v1772_v63 = vsel %vm1760_vm8, %v1739_v30, %v1456_v24  ;;  %v1667_v24 = vsel %vm1661_vm4, %v1634_v57, %v3652_v34  ;;  %v2512_v34 = vld [vmem:[%s2652_s20 + $0x13a] sm:$0xff]  ;;  %v2513_v30 = vld [vmem:[%s2652_s20 + $0x142] sm:$0xff] }
 0x287   : > { %2534 = vmatmul.msk.f32.gmra.mxu1 %vm1798_vm9, %v1772_v63  ;;  %v1700_v61 = vsel %vm1694_vm6, %v1667_v24, %v1188_v9  ;;  %v4724_v63 = vld [vmem:[#allocation97_spill] sm:$0xff]  ;;  %v2521_v50 = vld [vmem:[%s2652_s20 + $0x1a2] sm:$0xff] }
 0x288   : > { %v1733_v32 = vsel %vm1727_vm7, %v1700_v61, %v1316_v35  ;;  %v4722_v35 = vld [vmem:[#allocation53_spill] sm:$0xff] }
 0x289   : > { %v1575_v12 = vsel %vm1562_vm1, %v1542_v52, %v4722_v35 }
 0x28a   : > { %1463 = vrot.lane.b32.xlu2 %v2505_v2, %s2612_s28  ;;  %1233 = vrot.lane.b32.xlu1 %v2454_v8, %s2611_s27  ;;  %v1608_v33 = vsel %vm1595_vm2, %v1575_v12, %v4723_v55 }
 0x28b   : > { %1221 = vrot.lane.b32.xlu0 %v2448_v20, %s2611_s27  ;;  %v1641_v60 = vsel %vm1628_vm3, %v1608_v33, %v4724_v63  ;;  %v2596_v20 = vld [vmem:[%s2652_s20 + $0x48] sm:$0xff] }
 0x28c   : > { %v4122_v53 = vpop.permute.xlu2 %1215  ;;  %v1444_v14 = vpop.permute.xlu1 %1443  ;;  %v1674_v7 = vsel %vm1661_vm4, %v1641_v60, %v3639_v29  ;;  %v1536_v57 = vsel %vm1529_vm0, %v2596_v20, %v4725_v46  ;;  %v2456_v29 = vld [vmem:[%s2652_s20 + $0x198] sm:$0xff] }
 0x28d   : > { %v1226_v6 = vpop.permute.xlu0 %1225  ;;  %v1766_v26 = vsel %vm1760_vm8, %v1733_v32, %v1444_v14  ;;  %v1707_v2 = vsel %vm1694_vm6, %v1674_v7, %v4098_v27  ;;  %v4726_v32 = vld [vmem:[#allocation42_spill] sm:$0xff] }
 0x28e   : > { %2528 = vmatmul.msk.f32.gmra.mxu0 %vm1798_vm9, %v1766_v26  ;;  %v1719_v47 = vsel %vm1694_vm6, %v3742_v23, %v1226_v6  ;;  %v2481_v23 = vld [vmem:[%s2652_s20 + $0x141] sm:$0xff]  ;;  %v1569_v14 = vsel %vm1562_vm1, %v1536_v57, %v4726_v32  ;;  %v2488_v27 = vld [vmem:[%s2652_s20 + $0x199] sm:$0xff] }
 0x28f   : > { %v4727_v6 = vld [vmem:[#allocation86_spill] sm:$0xff] }
 0x290   : > { %v1602_v26 = vsel %vm1595_vm2, %v1569_v14, %v4727_v6 }
 0x292   : > { %1477 = vrot.lane.b32.xlu2 %v2512_v34, %s2612_s28  ;;  %1361 = vrot.lane.b32.xlu1 %v2594_v54, %s2610_s26  ;;  %v4728_v34 = vld [vmem:[#allocation96_spill] sm:$0xff] }
 0x293   : > { %1349 = vrot.lane.b32.xlu0 %v2480_v48, %s2610_s26  ;;  %v1635_v48 = vsel %vm1628_vm3, %v1602_v26, %v4728_v34 }
 0x294   : > { %v1458_v9 = vpop.permute.xlu2 %1457  ;;  %v1354_v3 = vpop.permute.xlu1 %1353  ;;  %v1668_v54 = vsel %vm1661_vm4, %v1635_v48, %v3577_v38  ;;  %v2489_v38 = vld [vmem:[%s2652_s20 + $0x1a1] sm:$0xff] }
 0x295   : > { %v1342_v28 = vpop.permute.xlu0 %1341 }
 0x296   : > { %v1746_v15 = vsel %vm1727_vm7, %v1713_v40, %v1342_v28 }
 0x297   : > { %v1779_v43 = vsel %vm1760_vm8, %v1746_v15, %v1470_v11  ;;  %v1752_v11 = vsel %vm1727_vm7, %v1719_v47, %v1354_v3  ;;  %v4729_v3 = vld [vmem:[#allocation58_spill] sm:$0xff] }
 0x298   : > { %2541 = vmatmul.msk.f32.gmra.mxu2 %vm1798_vm9, %v1779_v43 }
 0x29a   : > { %1235 = vrot.lane.b32.xlu2 %v2455_v5, %s2611_s27  ;;  %1223 = vrot.lane.b32.xlu1 %v2449_v42, %s2611_s27  ;;  %v2457_v5 = vld [vmem:[%s2652_s20 + $0x1a0] sm:$0xff] }
 0x29b   : > { %1489 = vrot.lane.b32.xlu0 %v4720_v18, %s2612_s28  ;;  %v2520_v18 = vld [vmem:[%s2652_s20 + $0x19a] sm:$0xff] }
 0x29c   : > { %v1472_v19 = vpop.permute.xlu2 %1471  ;;  %v1190_v16 = vpop.permute.xlu1 %1189 }
 0x29d   : > { %v1482_v59 = vpop.permute.xlu0 %1481 }
 0x29e   : > { %v1785_v0 = vsel %vm1760_vm8, %v1752_v11, %v1482_v59 }
 0x29f   : > { %2547 = vmatmul.msk.f32.vlgmr.msra.gmra.mxu3 %vm1798_vm9, %v1785_v0 }
 0x2a2   : > { %1363 = vrot.lane.b32.xlu1 %v2487_v22, %s2610_s26  ;;  %1479 = vrot.lane.b32.xlu2 %v2513_v30, %s2612_s28 }
 0x2a3   : > { %1351 = vrot.lane.b32.xlu0 %v2481_v23, %s2610_s26 }
 0x2a4   : > { %v1330_v8 = vpop.permute.xlu1 %1329  ;;  %v1204_v24 = vpop.permute.xlu2 %1203 }
 0x2a5   : > { %v1740_v17 = vsel %vm1727_vm7, %v1707_v2, %v1330_v8  ;;  %v1318_v41 = vpop.permute.xlu0 %1317  ;;  %v1708_v8 = vsel %vm1694_vm6, %v3748_v49, %v1204_v24 }
 0x2a6   : > { %v1773_v61 = vsel %vm1760_vm8, %v1740_v17, %v1458_v9  ;;  %v1701_v9 = vsel %vm1694_vm6, %v1668_v54, %v1190_v16  ;;  %v1714_v16 = vsel %vm1694_vm6, %v3803_v36, %v4122_v53 }
 0x2a7   : > { %2535 = vmatmul.msk.f32.gmra.mxu1 %vm1798_vm9, %v1773_v61  ;;  %v1734_v40 = vsel %vm1727_vm7, %v1701_v9, %v1318_v41 }
 0x2aa   : > { %1237 = vrot.lane.b32.xlu1 %v2456_v29, %s2611_s27  ;;  %1365 = vrot.lane.b32.xlu2 %v2488_v27, %s2610_s26 }
 0x2ab   : > { %1491 = vrot.lane.b32.xlu0 %v4729_v3, %s2612_s28 }
 0x2ac   : > { %v1446_v28 = vpop.permute.xlu1 %1445  ;;  %v1218_v42 = vpop.permute.xlu2 %1217 }
 0x2ad   : > { %v1228_v15 = vpop.permute.xlu0 %1227  ;;  %v1767_v43 = vsel %vm1760_vm8, %v1734_v40, %v1446_v28  ;;  %v1715_v9 = vsel %vm1694_vm6, %v3796_v10, %v1218_v42 }
 0x2ae   : > { %2529 = vmatmul.msk.f32.gmra.mxu0 %vm1798_vm9, %v1767_v43  ;;  %v1720_v30 = vsel %vm1694_vm6, %v3863_v25, %v1228_v15 }
 0x2b2   : > { %1239 = vrot.lane.b32.xlu1 %v2457_v5, %s2611_s27  ;;  %1367 = vrot.lane.b32.xlu2 %v2489_v38, %s2610_s26 }
 0x2b3   : > { %1493 = vrot.lane.b32.xlu0 %v2520_v18, %s2612_s28 }
 0x2b4   : > { %v1916_v47 = vpop.f32.mrf.mxu0  ;;  %v1356_v11 = vpop.permute.xlu1 %1355 }
 0x2b5   : > { %2012 = vst.msk [vmem:[%s4200_s18] sm:$0xff] %vm1562_vm1, %v1916_v47  ;;  %v1344_v59 = vpop.permute.xlu0 %1343  ;;  %v1460_v52 = vpop.permute.xlu2 %1459  ;;  %v2115_v22 = vmul.f32 %v1916_v47, %v1916_v47  ;;  %v2044_v36 = vsel %vm1562_vm1, %v1916_v47, 0.0  ;;  %v1753_v53 = vsel %vm1727_vm7, %v1720_v30, %v1356_v11 }
 0x2b6   : > { %v1747_v0 = vsel %vm1727_vm7, %v1714_v16, %v1344_v59 }
 0x2b7   : > { %v1780_v21 = vsel %vm1760_vm8, %v1747_v0, %v1472_v19  ;;  %v2147_v60 = vsel %vm1562_vm1, %v2115_v22, 0.0 }
 0x2b8   : > { %2542 = vmatmul.msk.f32.gmra.mxu2 %vm1798_vm9, %v1780_v21 }
 0x2bb   : > { %1495 = vrot.lane.b32.xlu0 %v2521_v50, %s2612_s28 }
 0x2bc   : > { %v1919_v35 = vpop.f32.mrf.mxu0  ;;  %v1192_v23 = vpop.permute.xlu1 %1191 }
 0x2bd   : > { %2013 = vst.msk [vmem:[%s4200_s18 + $0x8] sm:$0xff] %vm1562_vm1, %v1919_v35  ;;  %v2045_v12 = vsel %vm1562_vm1, %v1919_v35, 0.0  ;;  %v2116_v19 = vmul.f32 %v1919_v35, %v1919_v35  ;;  %v1484_v55 = vpop.permute.xlu0 %1483  ;;  %v1474_v2 = vpop.permute.xlu2 %1473  ;;  %v1702_v49 = vsel %vm1694_vm6, %v3682_v62, %v1192_v23 }
 0x2be   : > { %v2046_v33 = vadd.f32 %v2045_v12, %v2044_v36  ;;  %v1786_v63 = vsel %vm1760_vm8, %v1753_v53, %v1484_v55 }
 0x2bf   : > { %v2148_v25 = vsel %vm1562_vm1, %v2116_v19, 0.0  ;;  %2548 = vmatmul.msk.f32.gmra.mxu3 %vm1798_vm9, %v1786_v63 }
 0x2c0   : > { %v2149_v7 = vadd.f32 %v2148_v25, %v2147_v60 }
 0x2c4   : > { %v1332_v17 = vpop.permute.xlu1 %1331 }
 0x2c5   : > { %v1320_v41 = vpop.permute.xlu0 %1319  ;;  %v1741_v20 = vsel %vm1727_vm7, %v1708_v8, %v1332_v17  ;;  %v1922_v46 = vpop.f32.mrf.mxu0 }
 0x2c6   : > { %2014 = vst.msk [vmem:[%s4200_s18 + $0x10] sm:$0xff] %vm1562_vm1, %v1922_v46  ;;  %v2047_v57 = vsel %vm1562_vm1, %v1922_v46, 0.0  ;;  %v2117_v61 = vmul.f32 %v1922_v46, %v1922_v46  ;;  %v1774_v32 = vsel %vm1760_vm8, %v1741_v20, %v1460_v52  ;;  %v1735_v6 = vsel %vm1727_vm7, %v1702_v49, %v1320_v41  ;;  %v1334_v48 = vpop.permute.xlu2 %1333 }
 0x2c7   : > { %v2048_v14 = vadd.f32 %v2047_v57, %v2046_v33  ;;  %2536 = vmatmul.msk.f32.gmra.mxu1 %vm1798_vm9, %v1774_v32 }
 0x2c8   : > { %v2150_v29 = vsel %vm1562_vm1, %v2117_v61, 0.0 }
 0x2c9   : > { %v2151_v27 = vadd.f32 %v2150_v29, %v2149_v7 }
 0x2cc   : > { %v4236_v24 = vpop.f32.mrf.mxu1  ;;  %v1448_v26 = vpop.permute.xlu1 %1447 }
 0x2cd   : > { %2020 = vst.msk [vmem:[%s4200_s18 + $0x40] sm:$0xff] %vm1562_vm1, %v4236_v24  ;;  %v1230_v34 = vpop.permute.xlu0 %1229  ;;  %v1768_v54 = vsel %vm1760_vm8, %v1735_v6, %v1448_v26 }
 0x2ce   : > { %2530 = vmatmul.msk.f32.gmra.mxu0 %vm1798_vm9, %v1768_v54  ;;  %v1462_v15 = vpop.permute.xlu2 %1461  ;;  %v1721_v5 = vsel %vm1694_vm6, %v3859_v51, %v1230_v34 }
 0x2d4   : > { %v1358_v62 = vpop.permute.xlu1 %1357 }
 0x2d5   : > { %v1346_v3 = vpop.permute.xlu0 %1345  ;;  %v1754_v10 = vsel %vm1727_vm7, %v1721_v5, %v1358_v62 }
 0x2d6   : > { %v1748_v40 = vsel %vm1727_vm7, %v1715_v9, %v1346_v3  ;;  %v1476_v22 = vpop.permute.xlu2 %1475 }
 0x2d7   : > { %v1781_v28 = vsel %vm1760_vm8, %v1748_v40, %v1474_v2 }
 0x2d8   : > { %2543 = vmatmul.msk.f32.gmra.mxu2 %vm1798_vm9, %v1781_v28 }
 0x2db   : > { %v4249_v43 = vpop.f32.mrf.mxu1 }
 0x2dc   : > { %v1925_v38 = vpop.f32.mrf.mxu0  ;;  %2021 = vst.msk [vmem:[%s4200_s18 + $0x48] sm:$0xff] %vm1562_vm1, %v4249_v43  ;;  %v1206_v47 = vpop.permute.xlu1 %1205 }
 0x2dd   : > { %2015 = vst.msk [vmem:[%s4200_s18 + $0x18] sm:$0xff] %vm1562_vm1, %v1925_v38  ;;  %v2049_v42 = vsel %vm1562_vm1, %v1925_v38, 0.0  ;;  %v2118_v18 = vmul.f32 %v1925_v38, %v1925_v38  ;;  %v1486_v16 = vpop.permute.xlu0 %1485  ;;  %v1709_v59 = vsel %vm1694_vm6, %v3745_v31, %v1206_v47 }
 0x2de   : > { %v2050_v11 = vadd.f32 %v2049_v42, %v2048_v14  ;;  %v1787_v51 = vsel %vm1760_vm8, %v1754_v10, %v1486_v16  ;;  %v1742_v21 = vsel %vm1727_vm7, %v1709_v59, %v1334_v48  ;;  %v1336_v31 = vpop.permute.xlu2 %1335 }
 0x2df   : > { %v2152_v0 = vsel %vm1562_vm1, %v2118_v18, 0.0  ;;  %2549 = vmatmul.msk.f32.gmra.mxu3 %vm1798_vm9, %v1787_v51  ;;  %v1775_v52 = vsel %vm1760_vm8, %v1742_v21, %v1462_v15 }
 0x2e0   : > { %v2153_v50 = vadd.f32 %v2152_v0, %v2151_v27  ;;  %2537 = vmatmul.msk.f32.gmra.mxu1 %vm1798_vm9, %v1775_v52 }
 0x2e4   : > { %v1232_v30 = vpop.permute.xlu1 %1231 }
 0x2e5   : > { %v1220_v35 = vpop.permute.xlu0 %1219  ;;  %v1722_v63 = vsel %vm1694_vm6, %v3767_v39, %v1232_v30 }
 0x2e6   : > { %v1716_v53 = vsel %vm1694_vm6, %v3711_v56, %v1220_v35  ;;  %v1464_v20 = vpop.permute.xlu2 %1463 }
 0x2ea   : > { %v4268_v36 = vpop.f32.mrf.mxu2 }
 0x2eb   : > { %2028 = vst.msk [vmem:[%s4200_s18 + $0x80] sm:$0xff] %vm1562_vm1, %v4268_v36 }
 0x2ec   : > { %v1360_v12 = vpop.permute.xlu1 %1359 }
 0x2ed   : > { %v1348_v19 = vpop.permute.xlu0 %1347  ;;  %v1755_v25 = vsel %vm1727_vm7, %v1722_v63, %v1360_v12 }
 0x2ee   : > { %v1749_v23 = vsel %vm1727_vm7, %v1716_v53, %v1348_v19  ;;  %v1478_v27 = vpop.permute.xlu2 %1477 }
 0x2ef   : > { %v1782_v55 = vsel %vm1760_vm8, %v1749_v23, %v1476_v22 }
 0x2f0   : > { %2544 = vmatmul.msk.f32.gmra.mxu2 %vm1798_vm9, %v1782_v55 }
 0x2f3   : > { %v4278_v33 = vpop.f32.mrf.mxu1 }
 0x2f4   : > { %v1928_v60 = vpop.f32.mrf.mxu0  ;;  %2022 = vst.msk [vmem:[%s4200_s18 + $0x50] sm:$0xff] %vm1562_vm1, %v4278_v33  ;;  %v1208_v2 = vpop.permute.xlu1 %1207 }
 0x2f5   : > { %2016 = vst.msk [vmem:[%s4200_s18 + $0x20] sm:$0xff] %vm1562_vm1, %v1928_v60  ;;  %v2051_v56 = vsel %vm1562_vm1, %v1928_v60, 0.0  ;;  %v2119_v7 = vmul.f32 %v1928_v60, %v1928_v60  ;;  %v1488_v8 = vpop.permute.xlu0 %1487  ;;  %v1710_v41 = vsel %vm1694_vm6, %v3656_v1, %v1208_v2 }
 0x2f6   : > { %v2052_v17 = vadd.f32 %v2051_v56, %v2050_v11  ;;  %v1788_v39 = vsel %vm1760_vm8, %v1755_v25, %v1488_v8  ;;  %v1743_v57 = vsel %vm1727_vm7, %v1710_v41, %v1336_v31  ;;  %v1236_v62 = vpop.permute.xlu2 %1235 }
 0x2f7   : > { %v2154_v46 = vsel %vm1562_vm1, %v2119_v7, 0.0  ;;  %2550 = vmatmul.msk.f32.gmra.mxu3 %vm1798_vm9, %v1788_v39  ;;  %v1776_v32 = vsel %vm1760_vm8, %v1743_v57, %v1464_v20  ;;  %v1724_v21 = vsel %vm1694_vm6, %v3892_v13, %v1236_v62  ;;  %v2123_v57 = vmul.f32 %v4236_v24, %v4236_v24 }
 0x2f8   : > { %v2155_v61 = vadd.f32 %v2154_v46, %v2153_v50  ;;  %2538 = vmatmul.msk.f32.gmra.mxu1 %vm1798_vm9, %v1776_v32 }
 0x2fc   : > { %v1234_v14 = vpop.permute.xlu1 %1233 }
 0x2fd   : > { %v1222_v29 = vpop.permute.xlu0 %1221  ;;  %v1723_v3 = vsel %vm1694_vm6, %v3895_v37, %v1234_v14 }
 0x2fe   : > { %v1717_v6 = vsel %vm1694_vm6, %v3839_v58, %v1222_v29  ;;  %v1480_v47 = vpop.permute.xlu2 %1479  ;;  %v2059_v29 = vsel %vm1562_vm1, %v4236_v24, 0.0  ;;  %v2063_v24 = vsel %vm1562_vm1, %v4278_v33, 0.0 }
 0x302   : > { %v4297_v1 = vpop.f32.mrf.mxu2 }
 0x303   : > { %2029 = vst.msk [vmem:[%s4200_s18 + $0x88] sm:$0xff] %vm1562_vm1, %v4297_v1 }
 0x304   : > { %v4302_v49 = vpop.f32.mrf.mxu1  ;;  %v1362_v26 = vpop.permute.xlu1 %1361 }
 0x305   : > { %v1350_v34 = vpop.permute.xlu0 %1349  ;;  %2023 = vst.msk [vmem:[%s4200_s18 + $0x58] sm:$0xff] %vm1562_vm1, %v4302_v49  ;;  %v1756_v28 = vsel %vm1727_vm7, %v1723_v3, %v1362_v26 }
 0x306   : > { %v1750_v48 = vsel %vm1727_vm7, %v1717_v6, %v1350_v34  ;;  %v1366_v30 = vpop.permute.xlu2 %1365 }
 0x307   : > { %v1783_v54 = vsel %vm1760_vm8, %v1750_v48, %v1478_v27  ;;  %v2124_v27 = vmul.f32 %v4249_v43, %v4249_v43  ;;  %v2162_v48 = vsel %vm1562_vm1, %v2123_v57, 0.0 }
 0x308   : > { %2545 = vmatmul.msk.f32.gmra.mxu2 %vm1798_vm9, %v1783_v54  ;;  %v2061_v54 = vsel %vm1562_vm1, %v4249_v43, 0.0  ;;  %v2065_v43 = vsel %vm1562_vm1, %v4302_v49, 0.0 }
 0x30b   : > { %v1931_v9 = vpop.f32.mrf.mxu0 }
 0x30c   : > { %2017 = vst.msk [vmem:[%s4200_s18 + $0x28] sm:$0xff] %vm1562_vm1, %v1931_v9  ;;  %v2053_v58 = vsel %vm1562_vm1, %v1931_v9, 0.0  ;;  %v2120_v40 = vmul.f32 %v1931_v9, %v1931_v9  ;;  %v1224_v5 = vpop.permute.xlu1 %1223  ;;  %v2125_v9 = vmul.f32 %v4278_v33, %v4278_v33 }
 0x30d   : > { %v2054_v15 = vadd.f32 %v2053_v58, %v2052_v17  ;;  %v1490_v38 = vpop.permute.xlu0 %1489  ;;  %v1718_v37 = vsel %vm1694_vm6, %v3832_v45, %v1224_v5  ;;  %v2164_v58 = vsel %vm1562_vm1, %v2124_v27, 0.0 }
 0x30e   : > { %v2156_v10 = vsel %vm1562_vm1, %v2120_v40, 0.0  ;;  %v1789_v42 = vsel %vm1760_vm8, %v1756_v28, %v1490_v38  ;;  %v1368_v55 = vpop.permute.xlu2 %1367  ;;  %v2126_v40 = vmul.f32 %v4302_v49, %v4302_v49  ;;  %v2166_v5 = vsel %vm1562_vm1, %v2125_v9, 0.0 }
 0x30f   : > { %v2157_v18 = vadd.f32 %v2156_v10, %v2155_v61  ;;  %2551 = vmatmul.msk.f32.gmra.mxu3 %vm1798_vm9, %v1789_v42 }
 0x314   : > { %v1364_v16 = vpop.permute.xlu1 %1363 }
 0x315   : > { %v1352_v11 = vpop.permute.xlu0 %1351  ;;  %v1757_v45 = vsel %vm1727_vm7, %v1724_v21, %v1364_v16 }
 0x316   : > { %v1751_v59 = vsel %vm1727_vm7, %v1718_v37, %v1352_v11 }
 0x317   : > { %v1784_v51 = vsel %vm1760_vm8, %v1751_v59, %v1480_v47 }
 0x318   : > { %2546 = vmatmul.msk.f32.gmra.mxu2 %vm1798_vm9, %v1784_v51 }
 0x31b   : > { %v4326_v0 = vpop.f32.mrf.mxu2 }
 0x31c   : > { %2030 = vst.msk [vmem:[%s4200_s18 + $0x90] sm:$0xff] %vm1562_vm1, %v4326_v0  ;;  %v1238_v50 = vpop.permute.xlu1 %1237 }
 0x31d   : > { %v1492_v52 = vpop.permute.xlu0 %1491  ;;  %v1725_v35 = vsel %vm1694_vm6, %v3793_v44, %v1238_v50 }
 0x31e   : > { %v1790_v22 = vsel %vm1760_vm8, %v1757_v45, %v1492_v52  ;;  %v1758_v53 = vsel %vm1727_vm7, %v1725_v35, %v1366_v30 }
 0x31f   : > { %2552 = vmatmul.msk.f32.gmra.mxu3 %vm1798_vm9, %v1790_v22 }
 0x322   : > { %v4338_v31 = vpop.f32.mrf.mxu3 }
 0x323   : > { %2036 = vst.msk [vmem:[%s4200_s18 + $0xc0] sm:$0xff] %vm1562_vm1, %v4338_v31 }
 0x324   : > { %v1952_v13 = vpop.f32.mrf.mxu1  ;;  %v1240_v23 = vpop.permute.xlu1 %1239 }
 0x325   : > { %v1494_v12 = vpop.permute.xlu0 %1493  ;;  %2024 = vst.msk [vmem:[%s4200_s18 + $0x60] sm:$0xff] %vm1562_vm1, %v1952_v13  ;;  %v1726_v44 = vsel %vm1694_vm6, %v3910_v4, %v1240_v23  ;;  %v2127_v38 = vmul.f32 %v1952_v13, %v1952_v13  ;;  %v2067_v33 = vsel %vm1562_vm1, %v1952_v13, 0.0  ;;  %v2131_v23 = vmul.f32 %v4268_v36, %v4268_v36 }
 0x326   : > { %v1791_v19 = vsel %vm1760_vm8, %v1758_v53, %v1494_v12  ;;  %v1759_v56 = vsel %vm1727_vm7, %v1726_v44, %v1368_v55 }
 0x327   : > { %2553 = vmatmul.msk.f32.gmra.mxu3 %vm1798_vm9, %v1791_v19  ;;  %v2170_v11 = vsel %vm1562_vm1, %v2127_v38, 0.0 }
 0x32b   : > { %v1934_v63 = vpop.f32.mrf.mxu0 }
 0x32c   : > { %2018 = vst.msk [vmem:[%s4200_s18 + $0x30] sm:$0xff] %vm1562_vm1, %v1934_v63  ;;  %v2055_v60 = vsel %vm1562_vm1, %v1934_v63, 0.0  ;;  %v2121_v25 = vmul.f32 %v1934_v63, %v1934_v63 }
 0x32d   : > { %v2056_v7 = vadd.f32 %v2055_v60, %v2054_v15  ;;  %v1496_v2 = vpop.permute.xlu0 %1495 }
 0x32e   : > { %v2158_v8 = vsel %vm1562_vm1, %v2121_v25, 0.0  ;;  %v1792_v17 = vsel %vm1760_vm8, %v1759_v56, %v1496_v2  ;;  %v2075_v25 = vsel %vm1562_vm1, %v4268_v36, 0.0  ;;  %v2132_v56 = vmul.f32 %v4297_v1, %v4297_v1 }
 0x32f   : > { %v2159_v41 = vadd.f32 %v2158_v8, %v2157_v18  ;;  %2554 = vmatmul.msk.f32.gmra.mxu3 %vm1798_vm9, %v1792_v17  ;;  %v2168_v18 = vsel %vm1562_vm1, %v2126_v40, 0.0 }
 0x33b   : > { %v4357_v4 = vpop.f32.mrf.mxu2 }
 0x33c   : > { %2031 = vst.msk [vmem:[%s4200_s18 + $0x98] sm:$0xff] %vm1562_vm1, %v4357_v4 }
 0x342   : > { %v4362_v39 = vpop.f32.mrf.mxu3 }
 0x343   : > { %2037 = vst.msk [vmem:[%s4200_s18 + $0xc8] sm:$0xff] %vm1562_vm1, %v4362_v39 }
 0x344   : > { %v1955_v20 = vpop.f32.mrf.mxu1 }
 0x345   : > { %2025 = vst.msk [vmem:[%s4200_s18 + $0x68] sm:$0xff] %vm1562_vm1, %v1955_v20  ;;  %v2128_v47 = vmul.f32 %v1955_v20, %v1955_v20  ;;  %v2069_v59 = vsel %vm1562_vm1, %v1955_v20, 0.0  ;;  %v2077_v20 = vsel %vm1562_vm1, %v4297_v1, 0.0 }
 0x347   : > { %v2172_v49 = vsel %vm1562_vm1, %v2128_v47, 0.0  ;;  %v2139_v47 = vmul.f32 %v4338_v31, %v4338_v31 }
 0x34b   : > { %v1937_v46 = vpop.f32.mrf.mxu0 }
 0x34c   : > { %2019 = vst.msk [vmem:[%s4200_s18 + $0x38] sm:$0xff] %vm1562_vm1, %v1937_v46  ;;  %v2057_v61 = vsel %vm1562_vm1, %v1937_v46, 0.0  ;;  %v2122_v32 = vmul.f32 %v1937_v46, %v1937_v46  ;;  %v2133_v46 = vmul.f32 %v4326_v0, %v4326_v0 }
 0x34d   : > { %v2058_v14 = vadd.f32 %v2057_v61, %v2056_v7  ;;  %v2180_v61 = vsel %vm1562_vm1, %v2132_v56, 0.0 }
 0x34e   : > { %v2160_v6 = vsel %vm1562_vm1, %v2122_v32, 0.0  ;;  %v2079_v32 = vsel %vm1562_vm1, %v4326_v0, 0.0  ;;  %v2182_v1 = vsel %vm1562_vm1, %v2133_v46, 0.0 }
 0x34f   : > { %v2060_v26 = vadd.f32 %v2059_v29, %v2058_v14  ;;  %v2161_v34 = vadd.f32 %v2160_v6, %v2159_v41  ;;  %v2178_v41 = vsel %vm1562_vm1, %v2131_v23, 0.0  ;;  %v2134_v14 = vmul.f32 %v4357_v4, %v4357_v4 }
 0x350   : > { %v2081_v6 = vsel %vm1562_vm1, %v4357_v4, 0.0 }
 0x351   : > { %v2062_v62 = vadd.f32 %v2061_v54, %v2060_v26  ;;  %v2163_v3 = vadd.f32 %v2162_v48, %v2161_v34  ;;  %v2184_v54 = vsel %vm1562_vm1, %v2134_v14, 0.0 }
 0x353   : > { %v2064_v28 = vadd.f32 %v2063_v24, %v2062_v62  ;;  %v2165_v15 = vadd.f32 %v2164_v58, %v2163_v3 }
 0x355   : > { %v2167_v10 = vadd.f32 %v2166_v5, %v2165_v15  ;;  %v2066_v42 = vadd.f32 %v2065_v43, %v2064_v28 }
 0x357   : > { %v2068_v37 = vadd.f32 %v2067_v33, %v2066_v42  ;;  %v2169_v16 = vadd.f32 %v2168_v18, %v2167_v10 }
 0x359   : > { %v2070_v51 = vadd.f32 %v2069_v59, %v2068_v37  ;;  %v2171_v21 = vadd.f32 %v2170_v11, %v2169_v16 }
 0x35b   : > { %v1976_v45 = vpop.f32.mrf.mxu2  ;;  %v2173_v50 = vadd.f32 %v2172_v49, %v2171_v21  ;;  %v2140_v21 = vmul.f32 %v4362_v39, %v4362_v39 }
 0x35c   : > { %2032 = vst.msk [vmem:[%s4200_s18 + $0xa0] sm:$0xff] %vm1562_vm1, %v1976_v45  ;;  %v2135_v26 = vmul.f32 %v1976_v45, %v1976_v45  ;;  %v2083_v9 = vsel %vm1562_vm1, %v1976_v45, 0.0 }
 0x35d   : > { %v1958_v52 = vpop.f32.mrf.mxu1 }
 0x35e   : > { %2026 = vst.msk [vmem:[%s4200_s18 + $0x70] sm:$0xff] %vm1562_vm1, %v1958_v52  ;;  %v2129_v30 = vmul.f32 %v1958_v52, %v1958_v52  ;;  %v2071_v35 = vsel %vm1562_vm1, %v1958_v52, 0.0  ;;  %v2186_v3 = vsel %vm1562_vm1, %v2135_v26, 0.0  ;;  %v2194_v52 = vsel %vm1562_vm1, %v2139_v47, 0.0 }
 0x35f   : > { %v2072_v12 = vadd.f32 %v2071_v35, %v2070_v51  ;;  %v2091_v51 = vsel %vm1562_vm1, %v4338_v31, 0.0  ;;  %v2196_v31 = vsel %vm1562_vm1, %v2140_v21, 0.0 }
 0x360   : > { %v2174_v53 = vsel %vm1562_vm1, %v2129_v30, 0.0  ;;  %v2093_v30 = vsel %vm1562_vm1, %v4362_v39, 0.0 }
 0x361   : > { %v2175_v63 = vadd.f32 %v2174_v53, %v2173_v50 }
 0x362   : > { %v4401_v22 = vpop.f32.mrf.mxu3 }
 0x363   : > { %2038 = vst.msk [vmem:[%s4200_s18 + $0xd0] sm:$0xff] %vm1562_vm1, %v4401_v22  ;;  %v2141_v35 = vmul.f32 %v4401_v22, %v4401_v22 }
 0x373   : > { %v1979_v13 = vpop.f32.mrf.mxu2 }
 0x374   : > { %2033 = vst.msk [vmem:[%s4200_s18 + $0xa8] sm:$0xff] %vm1562_vm1, %v1979_v13  ;;  %v2136_v4 = vmul.f32 %v1979_v13, %v1979_v13  ;;  %v2085_v15 = vsel %vm1562_vm1, %v1979_v13, 0.0 }
 0x375   : > { %v1961_v19 = vpop.f32.mrf.mxu1 }
 0x376   : > { %2027 = vst.msk [vmem:[%s4200_s18 + $0x78] sm:$0xff] %vm1562_vm1, %v1961_v19  ;;  %v2073_v44 = vsel %vm1562_vm1, %v1961_v19, 0.0  ;;  %v2130_v55 = vmul.f32 %v1961_v19, %v1961_v19  ;;  %v2188_v38 = vsel %vm1562_vm1, %v2136_v4, 0.0 }
 0x377   : > { %v2074_v60 = vadd.f32 %v2073_v44, %v2072_v12  ;;  %v2095_v12 = vsel %vm1562_vm1, %v4401_v22, 0.0 }
 0x378   : > { %v2176_v7 = vsel %vm1562_vm1, %v2130_v55, 0.0 }
 0x379   : > { %v2076_v2 = vadd.f32 %v2075_v25, %v2074_v60  ;;  %v2177_v8 = vadd.f32 %v2176_v7, %v2175_v63  ;;  %v2198_v63 = vsel %vm1562_vm1, %v2141_v35, 0.0 }
 0x37a   : > { %v1997_v17 = vpop.f32.mrf.mxu3 }
 0x37b   : > { %2039 = vst.msk [vmem:[%s4200_s18 + $0xd8] sm:$0xff] %vm1562_vm1, %v1997_v17  ;;  %v2078_v57 = vadd.f32 %v2077_v20, %v2076_v2  ;;  %v2179_v36 = vadd.f32 %v2178_v41, %v2177_v8  ;;  %v2142_v23 = vmul.f32 %v1997_v17, %v1997_v17  ;;  %v2097_v39 = vsel %vm1562_vm1, %v1997_v17, 0.0 }
 0x37d   : > { %v2080_v29 = vadd.f32 %v2079_v32, %v2078_v57  ;;  %v2181_v27 = vadd.f32 %v2180_v61, %v2179_v36  ;;  %v2200_v56 = vsel %vm1562_vm1, %v2142_v23, 0.0 }
 0x37f   : > { %v2183_v34 = vadd.f32 %v2182_v1, %v2181_v27  ;;  %v2082_v48 = vadd.f32 %v2081_v6, %v2080_v29 }
 0x381   : > { %v2084_v0 = vadd.f32 %v2083_v9, %v2082_v48  ;;  %v2185_v62 = vadd.f32 %v2184_v54, %v2183_v34 }
 0x383   : > { %v2187_v58 = vadd.f32 %v2186_v3, %v2185_v62  ;;  %v2086_v43 = vadd.f32 %v2085_v15, %v2084_v0 }
 0x385   : > { %v2189_v18 = vadd.f32 %v2188_v38, %v2187_v58 }
 0x38b   : > { %v1982_v24 = vpop.f32.mrf.mxu2 }
 0x38c   : > { %2034 = vst.msk [vmem:[%s4200_s18 + $0xb0] sm:$0xff] %vm1562_vm1, %v1982_v24  ;;  %v2137_v28 = vmul.f32 %v1982_v24, %v1982_v24  ;;  %v2087_v5 = vsel %vm1562_vm1, %v1982_v24, 0.0 }
 0x38d   : > { %v2088_v42 = vadd.f32 %v2087_v5, %v2086_v43 }
 0x38e   : > { %v2190_v10 = vsel %vm1562_vm1, %v2137_v28, 0.0 }
 0x38f   : > { %v2191_v11 = vadd.f32 %v2190_v10, %v2189_v18 }
 0x392   : > { %v2000_v40 = vpop.f32.mrf.mxu3 }
 0x393   : > { %2040 = vst.msk [vmem:[%s4200_s18 + $0xe0] sm:$0xff] %vm1562_vm1, %v2000_v40  ;;  %v2143_v7 = vmul.f32 %v2000_v40, %v2000_v40  ;;  %v2099_v8 = vsel %vm1562_vm1, %v2000_v40, 0.0 }
 0x395   : > { %v2202_v20 = vsel %vm1562_vm1, %v2143_v7, 0.0 }
 0x39b   : > { %v1985_v33 = vpop.f32.mrf.mxu2 }
 0x39c   : > { %2035 = vst.msk [vmem:[%s4200_s18 + $0xb8] sm:$0xff] %vm1562_vm1, %v1985_v33  ;;  %v2089_v37 = vsel %vm1562_vm1, %v1985_v33, 0.0  ;;  %v2138_v16 = vmul.f32 %v1985_v33, %v1985_v33 }
 0x39d   : > { %v2090_v59 = vadd.f32 %v2089_v37, %v2088_v42 }
 0x39e   : > { %v2192_v49 = vsel %vm1562_vm1, %v2138_v16, 0.0 }
 0x39f   : > { %v2092_v45 = vadd.f32 %v2091_v51, %v2090_v59  ;;  %v2193_v50 = vadd.f32 %v2192_v49, %v2191_v11 }
 0x3a1   : > { %v2094_v13 = vadd.f32 %v2093_v30, %v2092_v45  ;;  %v2195_v53 = vadd.f32 %v2194_v52, %v2193_v50 }
 0x3a2   : > { %v2003_v19 = vpop.f32.mrf.mxu3 }
 0x3a3   : > { %v2096_v44 = vadd.f32 %v2095_v12, %v2094_v13  ;;  %v2197_v55 = vadd.f32 %v2196_v31, %v2195_v53  ;;  %2041 = vst.msk [vmem:[%s4200_s18 + $0xe8] sm:$0xff] %vm1562_vm1, %v2003_v19  ;;  %v2144_v46 = vmul.f32 %v2003_v19, %v2003_v19  ;;  %v2101_v36 = vsel %vm1562_vm1, %v2003_v19, 0.0 }
 0x3a5   : > { %v2199_v60 = vadd.f32 %v2198_v63, %v2197_v55  ;;  %v2098_v25 = vadd.f32 %v2097_v39, %v2096_v44  ;;  %v2204_v32 = vsel %vm1562_vm1, %v2144_v46, 0.0 }
 0x3a7   : > { %v2201_v2 = vadd.f32 %v2200_v56, %v2199_v60  ;;  %v2100_v22 = vadd.f32 %v2099_v8, %v2098_v25 }
 0x3a9   : > { %v2203_v57 = vadd.f32 %v2202_v20, %v2201_v2  ;;  %v2102_v61 = vadd.f32 %v2101_v36, %v2100_v22 }
 0x3aa   : > { %v2006_v41 = vpop.f32.mrf.mxu3 }
 0x3ab   : > { %2042 = vst.msk [vmem:[%s4200_s18 + $0xf0] sm:$0xff] %vm1562_vm1, %v2006_v41  ;;  %v2145_v17 = vmul.f32 %v2006_v41, %v2006_v41  ;;  %v2103_v14 = vsel %vm1562_vm1, %v2006_v41, 0.0  ;;  %v2205_v29 = vadd.f32 %v2204_v32, %v2203_v57 }
 0x3ac   : > { %v2104_v1 = vadd.f32 %v2103_v14, %v2102_v61 }
 0x3ad   : > { %v2206_v27 = vsel %vm1562_vm1, %v2145_v17, 0.0 }
 0x3ae   : > { %v2207_v48 = vadd.f32 %v2206_v27, %v2205_v29 }
 0x3b2   : > { %v2009_v6 = vpop.f32.mrf.mxu3 }
 0x3b3   : > { %2043 = vst.msk [vmem:[%s4200_s18 + $0xf8] sm:$0xff] %vm1562_vm1, %v2009_v6  ;;  %v2105_v26 = vsel %vm1562_vm1, %v2009_v6, 0.0  ;;  %v2146_v34 = vmul.f32 %v2009_v6, %v2009_v6 }
 0x3b4   : > { %v2106_v54 = vadd.f32 %v2105_v26, %v2104_v1 }
 0x3b5   : > { %v2208_v9 = vsel %vm1562_vm1, %v2146_v34, 0.0 }
 0x3b6   : > { %v2107_v0 = vrot.slane %v2106_v54, 4  ;;  %v2209_v62 = vadd.f32 %v2208_v9, %v2207_v48 }
 0x3b8   : > { %v2108_v3 = vadd.f32 %v2107_v0, %v2106_v54  ;;  %v2210_v58 = vrot.slane %v2209_v62, 4 }
 0x3ba   : > { %v2109_v24 = vrot.slane %v2108_v3, 2  ;;  %v2211_v40 = vadd.f32 %v2210_v58, %v2209_v62 }
 0x3bc   : > { %v2110_v4 = vadd.f32 %v2109_v24, %v2108_v3  ;;  %v2212_v28 = vrot.slane %v2211_v40, 2 }
 0x3be   : > { %v2111_v15 = vrot.slane %v2110_v4, 1  ;;  %v2213_v5 = vadd.f32 %v2212_v28, %v2211_v40 }
 0x3c0   : > { %v2112_v43 = vadd.f32 %v2111_v15, %v2110_v4  ;;  %v2214_v38 = vrot.slane %v2213_v5, 1 }
 0x3c2   : > { %2114 = vst.msk [vmem:[%s211_s21] sm:$0x1] %vm2113_vm10, %v2112_v43  ;;  %v2215_v10 = vadd.f32 %v2214_v38, %v2213_v5 }
 0x3c4   : > { %2216 = vst.msk [vmem:[%s214_s24] sm:$0x1] %vm2113_vm10, %v2215_v10 }
 0x3c5 PF: > { %s15_s15 = sadd.s32 1, %s2603_s15  }
 0x3c6   : > { %p12_p4 = scmp.ge.s32.totalorder %s15_s15, 4  }
 0x3c8   :  { %14 = sbr.rel (!%p12_p4) target bundleno = 1 (0x1), region = 84 }

</bundles_post_ra>
